<compile_context>
chip_gen: v7x
topology: tpu7x:2x2x1
jax: 0.10.0
libtpu: 0.0.40
codegen_flags: <defaults>
</compile_context>

<pallas_src>
import jax
import jax.numpy as jnp
import numpy as np
from jax import lax
from jax.experimental import pallas as pl
from jax.experimental.pallas import tpu as pltpu

_HIGH = jax.lax.Precision.HIGHEST  # keep f32 accuracy on the MXU


def _cbam_kernel(x_ref, w1t_ref, w2t_ref, mconv_ref, o_ref):
    # x_ref    : (Bt, C, HW)  VMEM -- Bt images, channels on sublanes, H*W on lanes
    # w1t_ref  : (C, Cr)      VMEM -- conv1x1 #1 weight, transposed to [in, out]
    # w2t_ref  : (Cr, C)      VMEM -- conv1x1 #2 weight, [in, out]
    # mconv_ref: (2, HW, HW)  VMEM -- 3x3 conv (zero-padded) as dense matrices
    #                                 [0] for the channel-max map, [1] for the mean map
    # o_ref    : (Bt, C, HW)  VMEM
    x = x_ref[...].astype(jnp.float32)                  # (Bt, C, HW)
    C = x.shape[1]
    HW = x.shape[2]
    w1t = w1t_ref[...]
    w2t = w2t_ref[...]

    # ---- channel attention: global max / avg pool over spatial (lane axis) ----
    vmax = jnp.max(x, axis=2)                           # (Bt, C)
    vavg = jnp.sum(x, axis=2) * (1.0 / HW)              # (Bt, C)

    def fc(v):                                          # shared 1x1-conv MLP on MXU
        h = jnp.dot(v, w1t, precision=_HIGH, preferred_element_type=jnp.float32)
        h = jnp.maximum(h, 0.0)                         # ReLU
        return jnp.dot(h, w2t, precision=_HIGH, preferred_element_type=jnp.float32)

    ca = jax.nn.sigmoid(fc(vmax) + fc(vavg))            # (Bt, C)
    x1 = x * ca[:, :, None]                             # (Bt, C, HW) lane-dense VPU

    # ---- spatial attention ----
    cmax = jnp.max(x1, axis=1)                          # (Bt, HW) channel-max (sublane reduce)
    cmean = jnp.sum(x1, axis=1) * (1.0 / C)             # (Bt, HW) channel-mean

    # 3x3 conv (2 in-channels -> 1 out, zero padding) as one dense matmul per feature.
    s = (jnp.dot(cmax, mconv_ref[0], precision=_HIGH, preferred_element_type=jnp.float32)
         + jnp.dot(cmean, mconv_ref[1], precision=_HIGH, preferred_element_type=jnp.float32))
    sa = jax.nn.sigmoid(s)                              # (Bt, HW)

    o_ref[...] = (x1 * sa[:, None, :]).astype(o_ref.dtype)


def _spatial_conv_matrices(w3_flat, H, W):
    """Dense (HW, HW) matrices realizing a zero-padded 3x3 correlation.

    out_flat = cmax_flat @ M[0] + cmean_flat @ M[1]
    # TODO(synk): for large H*W switch to a banded/separable formulation; the
    # dense matrix scales as (H*W)^2.
    """
    w3 = jnp.asarray(w3_flat, jnp.float32).reshape(2, 3, 3)   # [ci, kh, kw]
    mats = []
    for ci in range(2):
        m = jnp.zeros((H * W, H * W), jnp.float32)
        for dy in range(3):
            eye_h = jnp.eye(H, k=1 - dy, dtype=jnp.float32)
            for dx in range(3):
                eye_w = jnp.eye(W, k=1 - dx, dtype=jnp.float32)
                m = m + w3[ci, dy, dx] * jnp.kron(eye_h, eye_w)
        mats.append(m)
    return jnp.stack(mats, axis=0)                            # (2, HW, HW)


def _pick_block_batch(batch, per_image_bytes, budget_bytes):
    """Largest divisor of `batch` whose block fits the budget; keep >=2 grid
    steps when possible so the parallel batch axis can shard across cores."""
    best = 1
    for d in range(1, batch + 1):
        if batch % d == 0 and d * per_image_bytes <= budget_bytes:
            best = d
    if best == batch and batch > 1:
        for d in range(batch // 2, 0, -1):
            if batch % d == 0:
                best = d
                break
    return best


def cbam_pallas(x_nchw, w1, w2, w3_flat, *, block_budget_bytes=2 * 1024 * 1024):
    """CBAM forward.  x_nchw: (B, C, H, W); w1: (Cr, C) [out,in]; w2: (Cr, C)
    [in,out]; w3_flat: (18,) = conv3x3 weight (1, 2, 3, 3) flattened."""
    B, C, H, W = x_nchw.shape
    Cr = w1.shape[0]
    HW = H * W

    x_flat = x_nchw.reshape(B, C, HW)                       # free (contiguous)
    w1t = jnp.asarray(w1, jnp.float32).T                    # (C, Cr)
    w2t = jnp.asarray(w2, jnp.float32)                      # (Cr, C)
    mconv = _spatial_conv_matrices(w3_flat, H, W)           # (2, HW, HW)

    per_image = C * HW * x_nchw.dtype.itemsize
    bt = _pick_block_batch(B, per_image, block_budget_bytes)
    grid = (B // bt,)

    grid_spec = pltpu.PrefetchScalarGridSpec(
        num_scalar_prefetch=0,
        grid=grid,
        in_specs=[
            pl.BlockSpec((bt, C, HW), lambda b: (b, 0, 0)),
            pl.BlockSpec((C, Cr), lambda b: (0, 0)),
            pl.BlockSpec((Cr, C), lambda b: (0, 0)),
            pl.BlockSpec((2, HW, HW), lambda b: (0, 0, 0)),
        ],
        out_specs=pl.BlockSpec((bt, C, HW), lambda b: (b, 0, 0)),
    )
    out_flat = pl.pallas_call(
        _cbam_kernel,
        out_shape=jax.ShapeDtypeStruct((B, C, HW), x_nchw.dtype),
        grid_spec=grid_spec,
        compiler_params=pltpu.CompilerParams(
            dimension_semantics=("parallel",),
            vmem_limit_bytes=32 * 1024 * 1024,
        ),
    )(x_flat, w1t, w2t, mconv)
    return out_flat.reshape(B, C, H, W)


def cbam_ref(x_nchw, w1, w2, w3_flat):
    """Pure-JAX reference matching the PyTorch CBAM forward (NCHW)."""
    x = x_nchw.astype(jnp.float32)
    vmax = jnp.max(x, axis=(2, 3))                          # (B, C)
    vavg = jnp.mean(x, axis=(2, 3))

    def fc(v):
        h = jnp.maximum(v @ w1.T, 0.0)                      # (B, Cr)
        return h @ w2                                       # (B, C)

    ca = jax.nn.sigmoid(fc(vmax) + fc(vavg))                # (B, C)
    x1 = x * ca[:, :, None, None]
    cmax = jnp.max(x1, axis=1, keepdims=True)               # (B, 1, H, W)
    cmean = jnp.mean(x1, axis=1, keepdims=True)
    feat = jnp.concatenate([cmax, cmean], axis=1)           # (B, 2, H, W)
    w_oihw = w3_flat.reshape(1, 2, 3, 3)
    sa = lax.conv_general_dilated(
        feat, w_oihw, window_strides=(1, 1), padding=((1, 1), (1, 1)),
        dimension_numbers=("NCHW", "OIHW", "NCHW"))
    sa = jax.nn.sigmoid(sa)                                 # (B, 1, H, W)
    return x1 * sa


if __name__ == "__main__":
    B, C, H, W = 2, 8, 16, 16
    reduction = 2
    Cr = C // reduction

    key = jax.random.PRNGKey(0)
    kx, k1, k2, k3 = jax.random.split(key, 4)
    # Input in PyTorch NCHW convention.
    x_nchw = jax.random.normal(kx, (B, C, H, W), jnp.float32)
    # Kaiming-normal (fan_in, relu) init, mirroring init_weight() for the Conv layers.
    w1 = jax.random.normal(k1, (Cr, C), jnp.float32) * (2.0 / C) ** 0.5    # conv1x1 C->Cr, [out,in]
    w2 = jax.random.normal(k2, (Cr, C), jnp.float32) * (2.0 / Cr) ** 0.5   # conv1x1 Cr->C, [in,out]
    w3 = jax.random.normal(k3, (18,), jnp.float32) * (2.0 / 18.0) ** 0.5   # conv3x3 (1,2,3,3) flattened

    out = jax.block_until_ready(cbam_pallas(x_nchw, w1, w2, w3))

    ref = cbam_ref(x_nchw, w1, w2, w3)
    np.testing.assert_allclose(np.asarray(out), np.asarray(ref),
                               rtol=2e-4, atol=2e-4)
    print("KERNEL_OK")
</pallas_src>

<mosaic_0001>
module attributes {stable_mosaic.version = 11 : i64} {
  func.func @_cbam_kernel(%arg0: i32, %arg1: memref<1x8x256xf32, #tpu.memory_space<vmem>>, %arg2: memref<8x4xf32, #tpu.memory_space<vmem>>, %arg3: memref<4x8xf32, #tpu.memory_space<vmem>>, %arg4: memref<2x256x256xf32, #tpu.memory_space<vmem>>, %arg5: memref<1x8x256xf32, #tpu.memory_space<vmem>>) attributes {dimension_semantics = [#tpu.dimension_semantics<parallel>], iteration_bounds = array<i64: 2>, scalar_prefetch = 0 : i64, scratch_operands = 0 : i64, tpu.core_type = #tpu.core_type<tc>, window_params = [{transform_indices = @transform_0, window_bounds = array<i64: 1, 8, 256>}, {pipeline_mode = #tpu.pipeline_mode<synchronous>, transform_indices = @transform_1, window_bounds = array<i64: 8, 4>}, {pipeline_mode = #tpu.pipeline_mode<synchronous>, transform_indices = @transform_2, window_bounds = array<i64: 4, 8>}, {pipeline_mode = #tpu.pipeline_mode<synchronous>, transform_indices = @transform_3, window_bounds = array<i64: 2, 256, 256>}, {transform_indices = @transform_4, window_bounds = array<i64: 1, 8, 256>}]} {
    %c0 = arith.constant 0 : index
    %c0_0 = arith.constant 0 : index
    %c0_1 = arith.constant 0 : index
    %0 = vector.load %arg1[%c0, %c0_0, %c0_1] : memref<1x8x256xf32, #tpu.memory_space<vmem>>, vector<1x8x256xf32>
    %c0_2 = arith.constant 0 : index
    %c0_3 = arith.constant 0 : index
    %1 = vector.load %arg2[%c0_2, %c0_3] : memref<8x4xf32, #tpu.memory_space<vmem>>, vector<8x4xf32>
    %c0_4 = arith.constant 0 : index
    %c0_5 = arith.constant 0 : index
    %2 = vector.load %arg3[%c0_4, %c0_5] : memref<4x8xf32, #tpu.memory_space<vmem>>, vector<4x8xf32>
    %cst = arith.constant dense<0xFF800000> : vector<1x8xf32>
    %3 = vector.multi_reduction <maximumf>, %0, %cst [2] : vector<1x8x256xf32> to vector<1x8xf32>
    %cst_6 = arith.constant dense<0.000000e+00> : vector<1x8xf32>
    %4 = vector.multi_reduction <add>, %0, %cst_6 [2] : vector<1x8x256xf32> to vector<1x8xf32>
    %cst_7 = arith.constant 3.906250e-03 : f32
    %5 = vector.broadcast %cst_7 : f32 to vector<1x8xf32>
    %6 = arith.mulf %4, %5 : vector<1x8xf32>
    %cst_8 = arith.constant dense<0.000000e+00> : vector<1x4xf32>
    %7 = tpu.matmul %3, %1, %cst_8 {dimension_numbers = #tpu.dot_dimension_numbers<[1], [0], [0], [1], [0, 0, 1, 1], [], []>, precision = #tpu.contract_precision<fp32>} : vector<1x8xf32>, vector<8x4xf32>, vector<1x4xf32> -> vector<1x4xf32>
    %cst_9 = arith.constant 0.000000e+00 : f32
    %8 = vector.broadcast %cst_9 : f32 to vector<1x4xf32>
    %9 = arith.maximumf %7, %8 : vector<1x4xf32>
    %cst_10 = arith.constant dense<0.000000e+00> : vector<1x8xf32>
    %10 = tpu.matmul %9, %2, %cst_10 {dimension_numbers = #tpu.dot_dimension_numbers<[1], [0], [0], [1], [0, 0, 1, 1], [], []>, precision = #tpu.contract_precision<fp32>} : vector<1x4xf32>, vector<4x8xf32>, vector<1x8xf32> -> vector<1x8xf32>
    %cst_11 = arith.constant dense<0.000000e+00> : vector<1x4xf32>
    %11 = tpu.matmul %6, %1, %cst_11 {dimension_numbers = #tpu.dot_dimension_numbers<[1], [0], [0], [1], [0, 0, 1, 1], [], []>, precision = #tpu.contract_precision<fp32>} : vector<1x8xf32>, vector<8x4xf32>, vector<1x4xf32> -> vector<1x4xf32>
    %cst_12 = arith.constant 0.000000e+00 : f32
    %12 = vector.broadcast %cst_12 : f32 to vector<1x4xf32>
    %13 = arith.maximumf %11, %12 : vector<1x4xf32>
    %cst_13 = arith.constant dense<0.000000e+00> : vector<1x8xf32>
    %14 = tpu.matmul %13, %2, %cst_13 {dimension_numbers = #tpu.dot_dimension_numbers<[1], [0], [0], [1], [0, 0, 1, 1], [], []>, precision = #tpu.contract_precision<fp32>} : vector<1x4xf32>, vector<4x8xf32>, vector<1x8xf32> -> vector<1x8xf32>
    %15 = arith.addf %10, %14 : vector<1x8xf32>
    %16 = arith.negf %15 : vector<1x8xf32>
    %17 = math.exp %16 : vector<1x8xf32>
    %cst_14 = arith.constant 1.000000e+00 : f32
    %18 = vector.broadcast %cst_14 : f32 to vector<1x8xf32>
    %19 = arith.addf %18, %17 : vector<1x8xf32>
    %20 = arith.divf %18, %19 : vector<1x8xf32>
    %21 = vector.shape_cast %20 : vector<1x8xf32> to vector<1x8x1xf32>
    %22 = vector.broadcast %21 : vector<1x8x1xf32> to vector<1x8x256xf32>
    %23 = arith.mulf %0, %22 : vector<1x8x256xf32>
    %cst_15 = arith.constant dense<0xFF800000> : vector<1x256xf32>
    %24 = vector.multi_reduction <maximumf>, %23, %cst_15 [1] : vector<1x8x256xf32> to vector<1x256xf32>
    %cst_16 = arith.constant dense<0.000000e+00> : vector<1x256xf32>
    %25 = vector.multi_reduction <add>, %23, %cst_16 [1] : vector<1x8x256xf32> to vector<1x256xf32>
    %cst_17 = arith.constant 1.250000e-01 : f32
    %26 = vector.broadcast %cst_17 : f32 to vector<1x256xf32>
    %27 = arith.mulf %25, %26 : vector<1x256xf32>
    %c0_18 = arith.constant 0 : index
    %c0_19 = arith.constant 0 : index
    %c0_20 = arith.constant 0 : index
    %28 = vector.load %arg4[%c0_18, %c0_19, %c0_20] : memref<2x256x256xf32, #tpu.memory_space<vmem>>, vector<1x256x256xf32>
    %29 = vector.shape_cast %28 : vector<1x256x256xf32> to vector<256x256xf32>
    %cst_21 = arith.constant dense<0.000000e+00> : vector<1x256xf32>
    %30 = tpu.matmul %24, %29, %cst_21 {dimension_numbers = #tpu.dot_dimension_numbers<[1], [0], [0], [1], [0, 0, 1, 1], [], []>, precision = #tpu.contract_precision<fp32>} : vector<1x256xf32>, vector<256x256xf32>, vector<1x256xf32> -> vector<1x256xf32>
    %c1 = arith.constant 1 : index
    %c0_22 = arith.constant 0 : index
    %c0_23 = arith.constant 0 : index
    %31 = vector.load %arg4[%c1, %c0_22, %c0_23] : memref<2x256x256xf32, #tpu.memory_space<vmem>>, vector<1x256x256xf32>
    %32 = vector.shape_cast %31 : vector<1x256x256xf32> to vector<256x256xf32>
    %cst_24 = arith.constant dense<0.000000e+00> : vector<1x256xf32>
    %33 = tpu.matmul %27, %32, %cst_24 {dimension_numbers = #tpu.dot_dimension_numbers<[1], [0], [0], [1], [0, 0, 1, 1], [], []>, precision = #tpu.contract_precision<fp32>} : vector<1x256xf32>, vector<256x256xf32>, vector<1x256xf32> -> vector<1x256xf32>
    %34 = arith.addf %30, %33 : vector<1x256xf32>
    %35 = arith.negf %34 : vector<1x256xf32>
    %36 = math.exp %35 : vector<1x256xf32>
    %cst_25 = arith.constant 1.000000e+00 : f32
    %37 = vector.broadcast %cst_25 : f32 to vector<1x256xf32>
    %38 = arith.addf %37, %36 : vector<1x256xf32>
    %39 = arith.divf %37, %38 : vector<1x256xf32>
    %40 = vector.shape_cast %39 : vector<1x256xf32> to vector<1x1x256xf32>
    %41 = vector.broadcast %40 : vector<1x1x256xf32> to vector<1x8x256xf32>
    %42 = arith.mulf %23, %41 : vector<1x8x256xf32>
    %c0_26 = arith.constant 0 : index
    %c0_27 = arith.constant 0 : index
    %c0_28 = arith.constant 0 : index
    %43 = vector.load %arg5[%c0_26, %c0_27, %c0_28] : memref<1x8x256xf32, #tpu.memory_space<vmem>>, vector<1x8x256xf32>
    tpu.vector_store %arg5[%c0_26, %c0_27, %c0_28], %42 {strides = array<i32>} : memref<1x8x256xf32, #tpu.memory_space<vmem>>, vector<1x8x256xf32>,
    return
  }
  func.func @transform_0(%arg0: i32) -> (i32, i32, i32) {
    %c0_i32 = arith.constant 0 : i32
    %c0_i32_0 = arith.constant 0 : i32
    %c0_i32_1 = arith.constant 0 : i32
    return %arg0, %c0_i32, %c0_i32_0 : i32, i32, i32
  }
  func.func @transform_1(%arg0: i32) -> (i32, i32) {
    %c0_i32 = arith.constant 0 : i32
    %c0_i32_0 = arith.constant 0 : i32
    %c0_i32_1 = arith.constant 0 : i32
    return %c0_i32, %c0_i32_0 : i32, i32
  }
  func.func @transform_2(%arg0: i32) -> (i32, i32) {
    %c0_i32 = arith.constant 0 : i32
    %c0_i32_0 = arith.constant 0 : i32
    %c0_i32_1 = arith.constant 0 : i32
    return %c0_i32, %c0_i32_0 : i32, i32
  }
  func.func @transform_3(%arg0: i32) -> (i32, i32, i32) {
    %c0_i32 = arith.constant 0 : i32
    %c0_i32_0 = arith.constant 0 : i32
    %c0_i32_1 = arith.constant 0 : i32
    %c0_i32_2 = arith.constant 0 : i32
    return %c0_i32, %c0_i32_0, %c0_i32_1 : i32, i32, i32
  }
  func.func @transform_4(%arg0: i32) -> (i32, i32, i32) {
    %c0_i32 = arith.constant 0 : i32
    %c0_i32_0 = arith.constant 0 : i32
    %c0_i32_1 = arith.constant 0 : i32
    return %arg0, %c0_i32, %c0_i32_0 : i32, i32, i32
  }
}

</mosaic_0001>

<bundles_post_ra>
// kernel: tpu_custom_call.1
= control target key start
LH: loop header
LB: loop body
LE: loop exit
PB: predicated region body
PF: predicated region fallthrough
CT: control target
= control target key end

     0   :  { %9 = vsyncpa [#allocation3], 0  ;;  %s8565_s0 = inlined_call_operand.hbm [shape: f32[2,8,256], index: 0, kind: input, shape index: {}]   ;;  %s8566_s1 = inlined_call_operand.vmem [shape: f32[8,4], index: 1, kind: input, shape index: {}]   ;;  %s8567_s2 = inlined_call_operand.vmem [shape: f32[4,8], index: 2, kind: input, shape index: {}]   ;;  %s8568_s3 = inlined_call_operand.hbm [shape: f32[2,256,256], index: 3, kind: input, shape index: {}]   ;;  %s8569_s4 = inlined_call_operand.hbm [shape: f32[2,8,256], index: 4, kind: output, shape index: {}]  }
   0x1   :  { %11 = vsyncpa [#allocation3 + $0x1], 0 }
   0x2   :  { %12 = vsyncpa [#allocation6], 0 }
   0x3   :  { %13 = vsyncpa [#allocation4], 0 }
   0x4   :  { %15 = vsyncpa [#allocation4 + $0x1], 0  ;;  %s6169_s15 = smov 0   ;;  %s6171_s16 = smov 0  }
   0x5   :  { %s6173_s17 = smov 0   ;;  %s6175_s18 = smov 0  }
   0x6 LB: > { %s6190_s19 = sadd.s32 4294967295, %s6135_s18   ;;  %s4911_s20 = sadd.s32 4294967294, %s6135_s18   ;;  %s6135_s18 = sphi %s6175_s18, %s10033_s18   ;;  %s6131_s17 = sphi %s6173_s17, %s10032_s17   ;;  %s6127_s16 = sphi %s6171_s16, %s10031_s16   ;;  %s6123_s15 = sphi %s6169_s15, %s10030_s15  }
   0x7   : > { %p41_p0 = scmp.ne.s32.totalorder %s6127_s16, %s6123_s15  ;;  %p8570_p1 = scmp.eq.s32.totalorder %s6190_s19, 0 }
   0x8   : > { %p134_p3 = scmp.eq.s32.totalorder %s4911_s20, 1  ;;  %p4912_p5 = scmp.ge.s32.totalorder %s6135_s18, 1 }
   0x9   : > { %p6199_p4 = por %p8570_p1, %p41_p0  ;;  %p141_p7 = scmp.lt.s32.totalorder %s6135_s18, 3 }
   0xa   : > { %p6204_p6 = por %p134_p3, %p41_p0  ;;  %s6137_s24 = smov [#allocation5]  }
   0xb   : > { %s9023_s21 = scalar_select %p6199_p4, 1, 0 }
   0xc   : > { %s9024_s22 = scalar_select %p6204_p6, 1, 0 }
   0xd   : > { %p6209_p8 = pnand %p4912_p5, %p141_p7  ;;  %s159_s25 = sshll.u32 %s6137_s24, 4  ;;  %s6213_s25 = int_to_ptr.vmem [resolvable:$true] %s159_s25 }
   0xe   : > { %s6225_s27 = sadd.s32 1, %s6135_s18   ;;  %s28_s28 = sadd.s32 1, %s6131_s17 }
   0xf   : > { %s9025_s23 = scalar_select %p6209_p8, 1, 0 }
  0x10   : > { %p5940_p9 = pneg %p6209_p8  ;;  %s25_s29 = ssub.s32 %s6135_s18, %s6225_s27 }
  0x11   : > { %s6007_s6 = scalar_lea.hbm %s8568_s3, 16384 }
  0x12   : > { %p6220_p11 = pnand %p5940_p9, %p8570_p1  ;;  %p6008_p12 = scmp.ne.s32.totalorder %s8568_s3, %s6007_s6 }
  0x13   : > { %p6014_p5 = scmp.lt.u32.totalorder %s6007_s6, %s8568_s3 }
  0x14   : > { %p6009_p13 = pneg %p6220_p11 }
  0x16   : > { %p6010_p0 = pnand %p6009_p13, %p6008_p12 }
  0x18   : > { %p6011_p3 = pneg %p6010_p0 }
  0x1a   : > { %p6016_p7 = pnand %p6014_p5, %p6011_p3 }
  0x1c   : > { %6019 = shalt.err (!%p6016_p7)
}
  0x1d   : > { %s6020_s11 = scalar_lea.vmem %s6213_s25, 16384  ;;  %p6028_p2 = scmp.lt.s32.totalorder %s6213_s25, %s6213_s25 }
  0x1e   : > { %p6021_p9 = scmp.ne.s32.totalorder %s6213_s25, %s6020_s11  ;;  %p6029_p6 = scmp.lt.s32.totalorder %s6020_s11, %s6020_s11 }
  0x20   : > { %p6023_p10 = pnand %p6021_p9, %p6009_p13  ;;  %p6030_p4 = por %p6029_p6, %p6028_p2 }
  0x22   : > { %p6024_p1 = pneg %p6023_p10 }
  0x24   : > { %p6031_p8 = pnand %p6030_p4, %p6024_p1 }
  0x26   : > { %6034 = shalt.err (!%p6031_p8)
}
  0x27   : > { %s6138_s12 = smov 256   ;;  %s6139_s13 = smov 16  }
  0x28   : > { %5943 = dma.hbm_to_vmem [thread:$0]  (!%p6220_p11), %s8568_s3, 16384, %s6213_s25, [#allocation6], %s6138_s12, %s6138_s12, %s6139_s13  }
  0x29   : > { %p26_p2 = scmp.eq.s32.totalorder %s25_s29, 0  ;;  %p35_p1 = scmp.ne.s32.totalorder %s6131_s17, %s6127_s16 }
  0x2a   : > { %p36_p4 = scmp.eq.s32.totalorder %s6135_s18, 0  ;;  %p5953_p6 = scmp.lt.s32.totalorder %s6135_s18, 2 }
  0x2b   : > { %s6256_s24 = scalar_select %p26_p2, %s6131_s17, %s28_s28  }
  0x2c   : > { %p37_p8 = por %p36_p4, %p35_p1  ;;  %p9027_p10 = scmp.eq.s32.totalorder %s6190_s19, 1 }
  0x2d   : > { %s173_s5 = sand.u32 1, %s6131_s17   ;;  %s4930_s6 = sshll.u32 %s6135_s18, 8 }
  0x2e   : > { %p6260_p12 = por %p9027_p10, %p35_p1  ;;  %s4915_s7 = sshll.u32 %s173_s5, 4 }
  0x2f   : > { %s6269_s9 = scalar_lea.hbm %s8565_s0, %s4930_s6  ;;  %s177_s25 = scalar_lea.vmem [#allocation2], %s4915_s7 }
  0x30   : > { %s185_s28 = sshll.u32 %s177_s25, 4  ;;  %p6271_p11 = pnand %p5953_p6, %p37_p8  ;;  %s6275_s28 = int_to_ptr.vmem [resolvable:$true] %s185_s28 }
  0x31   : > { %s174_s10 = scalar_lea.sflag [#allocation3], %s173_s5  ;;  %s6035_s11 = scalar_lea.hbm %s6269_s9, 256 }
  0x32   : > { %p6036_p13 = scmp.ne.s32.totalorder %s6269_s9, %s6035_s11  ;;  %p6037_p0 = pneg %p6271_p11 }
  0x33   : > { %s6040_s14 = scalar_lea.hbm %s8565_s0, 512  ;;  %p6041_p7 = scmp.lt.u32.totalorder %s6269_s9, %s8565_s0 }
  0x34   : > { %p6038_p3 = pnand %p6037_p0, %p6036_p13  ;;  %p6042_p9 = scmp.lt.u32.totalorder %s6040_s14, %s6035_s11 }
  0x35   : > { %p6044_p1 = scmp.lt.u32.totalorder %s6035_s11, %s6269_s9 }
  0x36   : > { %p6039_p5 = pneg %p6038_p3  ;;  %p6043_p2 = por %p6042_p9, %p6041_p7 }
  0x38   : > { %p6045_p4 = por %p6044_p1, %p6043_p2 }
  0x3a   : > { %p6046_p6 = pnand %p6045_p4, %p6039_p5 }
  0x3c   : > { %6049 = shalt.err (!%p6046_p6)
}
  0x3d   : > { %s6050_s5 = scalar_lea.vmem %s6275_s28, 256  ;;  %s6140_s7 = smov [#allocation2]  }
  0x3e   : > { %p6051_p8 = scmp.ne.s32.totalorder %s6275_s28, %s6050_s5  ;;  %s6055_s26 = sshll.u32 %s6140_s7, 4  ;;  %s6056_s26 = int_to_ptr.vmem [resolvable:$false] %s6055_s26 }
  0x3f   : > { %s6057_s8 = scalar_lea.vmem %s6056_s26, 512  ;;  %p6058_p3 = scmp.lt.s32.totalorder %s6275_s28, %s6056_s26 }
  0x40   : > { %p6053_p10 = pnand %p6051_p8, %p6037_p0  ;;  %p6059_p7 = scmp.lt.s32.totalorder %s6057_s8, %s6050_s5 }
  0x42   : > { %p6054_p13 = pneg %p6053_p10  ;;  %p6060_p9 = por %p6059_p7, %p6058_p3 }
  0x44   : > { %p6061_p2 = pnand %p6060_p9, %p6054_p13 }
  0x46   : > { %6064 = shalt.err (!%p6061_p2)
}
  0x47   : > { %5947 = dma.hbm_to_vmem [thread:$0]  (!%p6271_p11), %s6269_s9, 256, %s6275_s28, %s174_s10  }
  0x48   : > { %p9030_p5 = scmp.ne.s32.totalorder %s9025_s23, 0 }
  0x4a   : > { %194 = sbr.rel (%p9030_p5) target bundleno = 1605 (0x645), region = 36 }
  0x51   : > { %s6305_s25 = sand.u32 1, %s6127_s16   ;;  %p9031_p0 = scmp.ne.s32.totalorder %s9023_s21, 0 }
  0x52   : > { %s4919_s11 = sshll.u32 %s6305_s25, 4  ;;  %s197_s12 = scalar_lea.sflag [#allocation3], %s6305_s25 }
  0x53   : > { %s6311_s13 = scalar_lea.vmem [#allocation2], %s4919_s11 }
  0x54   : > { %6110 = dma.done.wait (%p9031_p0), %s197_s12, 256  }
  0x55   : > { %6112 = vsyncadd (%p9031_p0), %s197_s12, 4294967040  ;;  %p9032_p11 = scmp.eq.s32.totalorder %s6190_s19, 0 }
  0x57   : > { %6114 = dma.done.wait (%p9032_p11), [#allocation6], 16384   ;;  %p9033_p1 = pmov %p9032_p11 }
  0x58   : > { %v229_v0 = vld [vmem:[%s6311_s13] sm:$0xff]  ;;  %v230_v1 = vld [vmem:[%s6311_s13 + $0x8] sm:$0xff]  ;;  %v6141_v5 = vmov 0.0   ;;  %vm6142_vm0 = vmmov 0   ;;  %v241_v7 = vlaneseq  ;;  %vm247_vm1 = vcmask 64512   ;;  %s4931_s29 = sshll.u32 %s6190_s19, 8 }
  0x59   : > { %6116 = vsyncadd (%p9033_p1), [#allocation6], 4294950912  ;;  %v233_v2 = vmax.f32 %v229_v0, %v230_v1  ;;  %v236_v3 = vadd.f32 %v230_v1, %v229_v0  ;;  %v231_v4 = vld [vmem:[%s8566_s1] sm:$0xff]  ;;  %4980 = vmatprep.subr.mxu1 %v6141_v5  ;;  %4982 = vmatprep.mubr.msk.f32.mxu1 %vm6142_vm0, %v6141_v5  ;;  %vm1155_vm2 = vcmask 1043456   ;;  %vm1151_vm3 = vcmask 31744   ;;  %v2096_v57 = vld [vmem:[#allocation5 + $0x8] sm:$0xff]  ;;  %s8521_s5 = scalar_lea.hbm %s8569_s4, %s4931_s29 }
  0x5a   : > { %v6327_v6 = vand.u32 4294901760, %v231_v4  ;;  %5040 = vmatprep.subr.mxu0 %v6141_v5  ;;  %5042 = vmatprep.mubr.msk.f32.mxu0 %vm6142_vm0, %v6141_v5  ;;  %v242_v8 = vand.u32 127, %v241_v7  ;;  %v6336_v9 = vshrl.u32 %v241_v7, 7  ;;  %v232_v32 = vld [vmem:[%s8567_s2] sm:$0xf]  ;;  %v2098_v58 = vld [vmem:[#allocation5 + $0x18] sm:$0xff] }
  0x5b   : > { %234 = vmax.xlane.f32.xlu0 %v233_v2  ;;  %v1157_v33 = vsel %vm1155_vm2, %v232_v32, 0  ;;  %v2095_v59 = vld [vmem:[#allocation5] sm:$0xff]  ;;  %v3508_v60 = vand.u32 4294901760, %v2096_v57  ;;  %v3512_v61 = vand.u32 4294901760, %v2098_v58  ;;  %v2097_v62 = vld [vmem:[#allocation5 + $0x10] sm:$0xff]  ;;  %v2161_v0 = vld [vmem:[#allocation5 + $0x208] sm:$0xff] }
  0x5c   : > { %4981 = vmatpush3.msra.mxu1 %v6327_v6  ;;  %v245_v10 = vsub.s32 %v242_v8, %v6336_v9  ;;  %v328_v11 = vsub.f32 %v231_v4, %v6327_v6  ;;  %v6382_v34 = vand.u32 4294901760, %v1157_v33  ;;  %v3510_v63 = vand.u32 4294901760, %v2095_v59  ;;  %v2163_v1 = vld [vmem:[#allocation5 + $0x218] sm:$0xff]  ;;  %v2162_v7 = vld [vmem:[#allocation5 + $0x210] sm:$0xff]  ;;  %v2100_v8 = vld [vmem:[#allocation5 + $0x28] sm:$0xff]  ;;  %s228_s10 = scalar_lea.vmem [#allocation7], %s4919_s11 }
  0x5d   : > { %4985 = vmatprep.subr.mxu1 %v6141_v5  ;;  %v3514_v2 = vand.u32 4294901760, %v2097_v62  ;;  %v2228_v4 = vand.u32 4294901760, %v2163_v1  ;;  %s4831_s14 = sshll.u32 %s228_s10, 4  ;;  %s4817_s19 = scalar_lea.sflag [#allocation4], %s6305_s25  ;;  %s8523_s14 = int_to_ptr.vmem [resolvable:$true] %s4831_s14 }
  0x5e   : > { %v329_v15 = vand.u32 4294901760, %v328_v11  ;;  %5041 = vmatpush3.msra.mxu0 %v6382_v34  ;;  %v1237_v37 = vsub.f32 %v1157_v33, %v6382_v34  ;;  %s6065_s7 = scalar_lea.vmem %s8523_s14, 256  ;;  %s6143_s26 = smov [#allocation7]  }
  0x5f   : > { %237 = vadd.xlane.f32.xlu0 %v236_v3  ;;  %5045 = vmatprep.subr.mxu0 %v6141_v5  ;;  %v2224_v3 = vand.u32 4294901760, %v2161_v0  ;;  %p6066_p4 = scmp.ne.s32.totalorder %s8523_s14, %s6065_s7  ;;  %s6069_s8 = sshll.u32 %s6143_s26, 4  ;;  %s6070_s8 = int_to_ptr.vmem [resolvable:$false] %s6069_s8 }
  0x60   : > { %v330_v18 = vsub.f32 %v328_v11, %v329_v15  ;;  %v1238_v42 = vand.u32 4294901760, %v1237_v37  ;;  %s6071_s11 = scalar_lea.vmem %s6070_s8, 512  ;;  %p6072_p10 = scmp.lt.s32.totalorder %s8523_s14, %s6070_s8 }
  0x61   : > { %p6067_p6 = pnand %p6066_p4, %p6260_p12  ;;  %p6073_p13 = scmp.lt.s32.totalorder %s6071_s11, %s6065_s7 }
  0x62   : > { %v331_v21 = vand.u32 4294901760, %v330_v18  ;;  %v1239_v45 = vsub.f32 %v1237_v37, %v1238_v42  ;;  %v6438_v18 = vpack.c.bf16 %v2228_v4, %v2224_v3 }
  0x63   : > { %p6068_p8 = pneg %p6067_p6  ;;  %p6074_p3 = por %p6073_p13, %p6072_p10 }
  0x64   : > { %v1240_v48 = vand.u32 4294901760, %v1239_v45  ;;  %9040 = vst [vmem:[#allocation17_spill] sm:$0xff] %v6438_v18 }
  0x65   : > { %p6075_p7 = pnand %p6074_p3, %p6068_p8 }
  0xe8   : > { %v235_v12 = vpop.xlane.xlu0 %234 }
  0xe9   : > { %v246_v13 = vrot.slane %v235_v12, %v245_v10  ;;  %v6432_v12 = vsub.f32 %v2095_v59, %v3510_v63  ;;  %v2170_v59 = vld [vmem:[#allocation5 + $0x250] sm:$0xff] }
  0xeb   : > { %v248_v14 = vsel %vm247_vm1, %v246_v13, 0  ;;  %9037 = vst [vmem:[#allocation14_spill] sm:$0xff] %v6432_v12  ;;  %v2102_v13 = vld [vmem:[#allocation5 + $0x38] sm:$0xff] }
  0xec   : > { %v316_v16 = vand.u32 4294901760, %v248_v14  ;;  %v238_v23 = vpop.xlane.xlu0 %237 }
  0xed   : > { %v239_v24 = vmul.f32 0.00390625, %v238_v23  ;;  %v2230_v23 = vand.u32 4294901760, %v2162_v7 }
  0xee   : > { %v317_v17 = vsub.f32 %v248_v14, %v316_v16  ;;  %v2099_v14 = vld [vmem:[#allocation5 + $0x20] sm:$0xff] }
  0xef   : > { %v701_v25 = vrot.slane %v239_v24, %v245_v10  ;;  %v6426_v10 = vpack.c.bf16 %v3512_v61, %v3508_v60  ;;  %v3516_v24 = vand.u32 4294901760, %v2100_v8 }
  0xf0   : > { %v318_v19 = vand.u32 4294901760, %v317_v17 }
  0xf1   : > { %v702_v26 = vsel %vm247_vm1, %v701_v25, 0  ;;  %9034 = vst [vmem:[#allocation11_spill] sm:$0xff] %v6426_v10  ;;  %v2167_v25 = vld [vmem:[#allocation5 + $0x238] sm:$0xff] }
  0xf2   : > { %v319_v20 = vsub.f32 %v317_v17, %v318_v19  ;;  %v770_v27 = vand.u32 4294901760, %v702_v26  ;;  %v2236_v45 = vand.u32 4294901760, %v2167_v25 }
  0xf4   : > { %v320_v22 = vand.u32 4294901760, %v319_v20  ;;  %v771_v28 = vsub.f32 %v702_v26, %v770_v27  ;;  %v2165_v20 = vld [vmem:[#allocation5 + $0x228] sm:$0xff]  ;;  %v3520_v26 = vand.u32 4294901760, %v2102_v13 }
  0xf6   : > { %4983 = vmatmul.mubr.f32.vlgmr.msra.gmra.mrb[0].mxu1 %v320_v22  ;;  %v772_v29 = vand.u32 4294901760, %v771_v28 }
  0xf7   : > { %4986 = vmatpush3.msra.mxu1 %v331_v21  ;;  %4987 = vmatprep.mubr.msk.f32.mxu1 %vm6142_vm0, %v6141_v5 }
  0xf8   : > { %4990 = vmatprep.subr.mxu1 %v6141_v5  ;;  %v773_v30 = vsub.f32 %v771_v28, %v772_v29 }
  0xfa   : > { %v774_v31 = vand.u32 4294901760, %v773_v30  ;;  %v2164_v30 = vld [vmem:[#allocation5 + $0x220] sm:$0xff] }
  0xfe   : > { %4988 = vmatmul.mubr.f32.vlgmr.msra.gmra.mrb[0].mxu1 %v316_v16 }
  0xff   : > { %4991 = vmatpush3.msra.mxu1 %v328_v11  ;;  %4992 = vmatprep.mubr.msk.f32.mxu1 %vm6142_vm0, %v6141_v5 }
 0x100   : > { %4995 = vmatprep.subr.mxu1 %v6141_v5 }
 0x106   : > { %4993 = vmatmul.mubr.f32.vlgmr.msra.gmra.mrb[0].mxu1 %v317_v17  ;;  %v6436_v17 = vsub.f32 %v2097_v62, %v3514_v2 }
 0x107   : > { %4996 = vmatpush3.msra.mxu1 %v6327_v6  ;;  %4997 = vmatprep.mubr.msk.f32.mxu1 %vm6142_vm0, %v6141_v5 }
 0x108   : > { %5000 = vmatprep.subr.mxu1 %v6141_v5  ;;  %9039 = vst [vmem:[#allocation16_spill] sm:$0xff] %v6436_v17 }
 0x10e   : > { %4998 = vmatmul.mubr.f32.vlgmr.msra.gmra.mrb[0].mxu1 %v318_v19  ;;  %v6440_v19 = vsub.f32 %v2161_v0, %v2224_v3  ;;  %v2109_v3 = vld [vmem:[#allocation5 + $0x70] sm:$0xff] }
 0x10f   : > { %5001 = vmatpush3.msra.mxu1 %v329_v15  ;;  %5002 = vmatprep.mubr.msk.f32.mxu1 %vm6142_vm0, %v6141_v5 }
 0x110   : > { %5005 = vmatprep.subr.mxu1 %v6141_v5  ;;  %9041 = vst [vmem:[#allocation18_spill] sm:$0xff] %v6440_v19 }
 0x116   : > { %5003 = vmatmul.mubr.f32.vlgmr.msra.gmra.mrb[0].mxu1 %v316_v16 }
 0x117   : > { %5006 = vmatpush3.msra.mxu1 %v6327_v6  ;;  %5007 = vmatprep.mubr.msk.f32.mxu1 %vm6142_vm0, %v6141_v5 }
 0x118   : > { %5010 = vmatprep.subr.mxu1 %v6141_v5 }
 0x11e   : > { %5008 = vmatmul.mubr.f32.vlgmr.msra.gmra.mrb[0].mxu1 %v316_v16  ;;  %v6434_v16 = vpack.c.bf16 %v3514_v2, %v3510_v63  ;;  %v2107_v2 = vld [vmem:[#allocation5 + $0x60] sm:$0xff] }
 0x11f   : > { %5011 = vmatpush3.msra.mxu1 %v6327_v6  ;;  %5012 = vmatprep.mubr.msk.f32.mxu1 %vm6142_vm0, %v6141_v5 }
 0x120   : > { %5015 = vmatprep.subr.mxu1 %v6141_v5  ;;  %9038 = vst [vmem:[#allocation15_spill] sm:$0xff] %v6434_v16 }
 0x122   : > { %5013 = vmatmul.mubr.f32.vlgmr.msra.gmra.mrb[2].mxu1 %v774_v31  ;;  %v2166_v31 = vld [vmem:[#allocation5 + $0x230] sm:$0xff] }
 0x123   : > { %5016 = vmatpush3.msra.mxu1 %v331_v21  ;;  %5017 = vmatprep.mubr.msk.f32.mxu1 %vm6142_vm0, %v6141_v5  ;;  %v6443_v21 = vsub.f32 %v2163_v1, %v2228_v4  ;;  %v2110_v1 = vld [vmem:[#allocation5 + $0x78] sm:$0xff] }
 0x124   : > { %5020 = vmatprep.subr.mxu1 %v6141_v5 }
 0x125   : > { %9042 = vst [vmem:[#allocation19_spill] sm:$0xff] %v6443_v21 }
 0x12a   : > { %5018 = vmatmul.mubr.f32.vlgmr.msra.gmra.mrb[2].mxu1 %v770_v27 }
 0x12b   : > { %5021 = vmatpush3.msra.mxu1 %v328_v11  ;;  %5022 = vmatprep.mubr.msk.f32.mxu1 %vm6142_vm0, %v6141_v5  ;;  %v6428_v11 = vsub.f32 %v2096_v57, %v3508_v60  ;;  %v2108_v60 = vld [vmem:[#allocation5 + $0x68] sm:$0xff] }
 0x12c   : > { %5025 = vmatprep.subr.mxu1 %v6141_v5 }
 0x12d   : > { %9035 = vst [vmem:[#allocation12_spill] sm:$0xff] %v6428_v11 }
 0x132   : > { %5023 = vmatmul.mubr.f32.vlgmr.msra.gmra.mrb[2].mxu1 %v771_v28 }
 0x133   : > { %5026 = vmatpush3.msra.mxu1 %v6327_v6  ;;  %5027 = vmatprep.mubr.msk.f32.mxu1 %vm6142_vm0, %v6141_v5 }
 0x134   : > { %5030 = vmatprep.subr.mxu1 %v6141_v5 }
 0x13a   : > { %5028 = vmatmul.mubr.f32.vlgmr.msra.gmra.mrb[2].mxu1 %v772_v29  ;;  %v2232_v29 = vand.u32 4294901760, %v2165_v20 }
 0x13b   : > { %5031 = vmatpush3.msra.mxu1 %v329_v15  ;;  %5032 = vmatprep.mubr.msk.f32.mxu1 %vm6142_vm0, %v6141_v5  ;;  %v2101_v15 = vld [vmem:[#allocation5 + $0x30] sm:$0xff] }
 0x13c   : > { %5035 = vmatprep.subr.mxu1 %v6141_v5  ;;  %v3522_v28 = vand.u32 4294901760, %v2101_v15 }
 0x142   : > { %5033 = vmatmul.mubr.f32.vlgmr.msra.gmra.mrb[2].mxu1 %v770_v27 }
 0x143   : > { %5036 = vmatpush3.msra.mxu1 %v6327_v6  ;;  %5037 = vmatprep.mubr.msk.f32.mxu1 %vm6142_vm0, %v6141_v5  ;;  %v2160_v6 = vld [vmem:[#allocation5 + $0x200] sm:$0xff] }
 0x144   : > { %5485 = vmatprep.subr.bf16.mxu1 %v6426_v10  ;;  %v2226_v22 = vand.u32 4294901760, %v2160_v6 }
 0x146   : > { %v6447_v32 = vpack.c.bf16 %v2230_v23, %v2226_v22  ;;  %v6449_v33 = vsub.f32 %v2160_v6, %v2226_v22  ;;  %v3532_v22 = vand.u32 4294901760, %v2108_v60 }
 0x148   : > { %9043 = vst [vmem:[#allocation20_spill] sm:$0xff] %v6447_v32  ;;  %9044 = vst [vmem:[#allocation21_spill] sm:$0xff] %v6449_v33 }
 0x14a   : > { %5038 = vmatmul.mubr.f32.vlgmr.msra.gmra.mrb[2].mxu1 %v770_v27  ;;  %v3518_v27 = vand.u32 4294901760, %v2099_v14 }
 0x14b   : > { %5487 = vmatpush1.bf16.msra.mxu1 %v6434_v16  ;;  %v2183_v16 = vld [vmem:[#allocation5 + $0x2b8] sm:$0xff] }
 0x1f1   : > { %v692_v35 = vpop.f32.mrb[0].mxu1 }
 0x1f2   : > { %v5009_v36 = vpop.f32.mrb[1].mxu1  ;;  %v696_v50 = vmax.f32 %v692_v35, 0.0  ;;  %v6453_v35 = vsub.f32 %v2100_v8, %v3516_v24 }
 0x1f3   : > { %v2104_v36 = vld [vmem:[#allocation5 + $0x48] sm:$0xff] }
 0x1f4   : > { %v1606_v51 = vsel %vm1151_vm3, %v696_v50, 0  ;;  %9046 = vst [vmem:[#allocation23_spill] sm:$0xff] %v6453_v35 }
 0x1f5   : > { %v1674_v52 = vand.u32 4294901760, %v1606_v51 }
 0x1f7   : > { %v1675_v53 = vsub.f32 %v1606_v51, %v1674_v52 }
 0x1f9   : > { %v1676_v54 = vand.u32 4294901760, %v1675_v53 }
 0x1fb   : > { %v1677_v55 = vsub.f32 %v1675_v53, %v1676_v54 }
 0x1fd   : > { %v1678_v56 = vand.u32 4294901760, %v1677_v55  ;;  %v6472_v55 = vsub.f32 %v2167_v25, %v2236_v45  ;;  %v3538_v25 = vand.u32 4294901760, %v2109_v3 }
 0x1ff   : > { %9054 = vst [vmem:[#allocation31_spill] sm:$0xff] %v6472_v55  ;;  %v2219_v55 = vld [vmem:[#allocation5 + $0x3d8] sm:$0xff] }
 0x21d   : > { %v1146_v38 = vpop.f32.mrb[2].mxu1 }
 0x21e   : > { %v1150_v39 = vmax.f32 %v1146_v38, 0.0  ;;  %v5039_v40 = vpop.f32.mrb[3].mxu1  ;;  %v2103_v38 = vld [vmem:[#allocation5 + $0x40] sm:$0xff] }
 0x21f   : > { %v6457_v40 = vsub.f32 %v2102_v13, %v3520_v26  ;;  %v3526_v51 = vand.u32 4294901760, %v2103_v38 }
 0x220   : > { %v1153_v41 = vsel %vm1151_vm3, %v1150_v39, 0  ;;  %v6455_v39 = vpack.c.bf16 %v3520_v26, %v3516_v24  ;;  %v3534_v24 = vand.u32 4294901760, %v2107_v2  ;;  %v2173_v26 = vld [vmem:[#allocation5 + $0x268] sm:$0xff] }
 0x221   : > { %v1225_v43 = vand.u32 4294901760, %v1153_v41  ;;  %9048 = vst [vmem:[#allocation25_spill] sm:$0xff] %v6457_v40 }
 0x222   : > { %9047 = vst [vmem:[#allocation24_spill] sm:$0xff] %v6455_v39  ;;  %5489 = vmatprep.subr.bf16.mxu1 %v6455_v39  ;;  %v2117_v39 = vld [vmem:[#allocation5 + $0xb0] sm:$0xff] }
 0x223   : > { %v1226_v44 = vsub.f32 %v1153_v41, %v1225_v43  ;;  %v6459_v41 = vpack.c.bf16 %v3522_v28, %v3518_v27 }
 0x225   : > { %v1227_v46 = vand.u32 4294901760, %v1226_v44  ;;  %9049 = vst [vmem:[#allocation26_spill] sm:$0xff] %v6459_v41  ;;  %5491 = vmatpush1.bf16.msra.mxu1 %v6459_v41 }
 0x227   : > { %v1228_v47 = vsub.f32 %v1226_v44, %v1227_v46 }
 0x229   : > { %v1229_v49 = vand.u32 4294901760, %v1228_v47  ;;  %v2234_v47 = vand.u32 4294901760, %v2164_v30 }
 0x22b   : > { %5043 = vmatmul.mubr.f32.vlgmr.msra.gmra.mrb[0].mxu0 %v1229_v49  ;;  %v3524_v49 = vand.u32 4294901760, %v2104_v36 }
 0x22c   : > { %5046 = vmatpush3.msra.mxu0 %v1240_v48  ;;  %5047 = vmatprep.mubr.msk.f32.mxu0 %vm6142_vm0, %v6141_v5 }
 0x22d   : > { %5050 = vmatprep.subr.mxu0 %v6141_v5  ;;  %v6482_v0 = vsub.f32 %v2104_v36, %v3524_v49  ;;  %v2172_v36 = vld [vmem:[#allocation5 + $0x260] sm:$0xff] }
 0x22f   : > { %9059 = vst [vmem:[#allocation36_spill] sm:$0xff] %v6482_v0  ;;  %v2153_v0 = vld [vmem:[#allocation5 + $0x1d0] sm:$0xff] }
 0x233   : > { %5048 = vmatmul.mubr.f32.vlgmr.msra.gmra.mrb[0].mxu0 %v1225_v43 }
 0x234   : > { %5051 = vmatpush3.msra.mxu0 %v1237_v37  ;;  %5052 = vmatprep.mubr.msk.f32.mxu0 %vm6142_vm0, %v6141_v5 }
 0x235   : > { %5055 = vmatprep.subr.mxu0 %v6141_v5 }
 0x23b   : > { %5053 = vmatmul.mubr.f32.vlgmr.msra.gmra.mrb[0].mxu0 %v1226_v44  ;;  %v6464_v44 = vsub.f32 %v2101_v15, %v3522_v28 }
 0x23c   : > { %5056 = vmatpush3.msra.mxu0 %v6382_v34  ;;  %5057 = vmatprep.mubr.msk.f32.mxu0 %vm6142_vm0, %v6141_v5 }
 0x23d   : > { %5060 = vmatprep.subr.mxu0 %v6141_v5  ;;  %9051 = vst [vmem:[#allocation28_spill] sm:$0xff] %v6464_v44 }
 0x243   : > { %5058 = vmatmul.mubr.f32.vlgmr.msra.gmra.mrb[0].mxu0 %v1227_v46  ;;  %v6466_v46 = vsub.f32 %v2165_v20, %v2232_v29  ;;  %v2246_v20 = vand.u32 4294901760, %v2170_v59 }
 0x244   : > { %5061 = vmatpush3.msra.mxu0 %v1238_v42  ;;  %5062 = vmatprep.mubr.msk.f32.mxu0 %vm6142_vm0, %v6141_v5 }
 0x245   : > { %5065 = vmatprep.subr.mxu0 %v6141_v5  ;;  %9052 = vst [vmem:[#allocation29_spill] sm:$0xff] %v6466_v46 }
 0x24b   : > { %5063 = vmatmul.mubr.f32.vlgmr.msra.gmra.mrb[0].mxu0 %v1225_v43 }
 0x24c   : > { %5066 = vmatpush3.msra.mxu0 %v6382_v34  ;;  %5067 = vmatprep.mubr.msk.f32.mxu0 %vm6142_vm0, %v6141_v5 }
 0x24d   : > { %5070 = vmatprep.subr.mxu0 %v6141_v5 }
 0x253   : > { %5068 = vmatmul.mubr.f32.vlgmr.msra.gmra.mrb[0].mxu0 %v1225_v43  ;;  %v2105_v43 = vld [vmem:[#allocation5 + $0x50] sm:$0xff] }
 0x254   : > { %5071 = vmatpush3.msra.mxu0 %v6382_v34  ;;  %5072 = vmatprep.mubr.msk.f32.mxu0 %vm6142_vm0, %v6141_v5  ;;  %v3530_v57 = vand.u32 4294901760, %v2105_v43 }
 0x255   : > { %5075 = vmatprep.subr.mxu0 %v6141_v5 }
 0x256   : > { %v6487_v6 = vpack.c.bf16 %v3530_v57, %v3526_v51  ;;  %v6491_v8 = vsub.f32 %v2105_v43, %v3530_v57  ;;  %v6517_v57 = vsub.f32 %v2107_v2, %v3534_v24 }
 0x258   : > { %9061 = vst [vmem:[#allocation38_spill] sm:$0xff] %v6487_v6  ;;  %9063 = vst [vmem:[#allocation40_spill] sm:$0xff] %v6491_v8 }
 0x259   : > { %9074 = vst [vmem:[#allocation51_spill] sm:$0xff] %v6517_v57 }
 0x25b   : > { %5073 = vmatmul.mubr.f32.vlgmr.msra.gmra.mrb[0].mxu0 %v1678_v56  ;;  %v6474_v56 = vsub.f32 %v2164_v30, %v2234_v47 }
 0x25c   : > { %5076 = vmatpush3.msra.mxu0 %v1240_v48  ;;  %5077 = vmatprep.mubr.msk.f32.mxu0 %vm6142_vm0, %v6141_v5  ;;  %v2238_v48 = vand.u32 4294901760, %v2166_v31 }
 0x25d   : > { %5080 = vmatprep.subr.mxu0 %v6141_v5  ;;  %9055 = vst [vmem:[#allocation32_spill] sm:$0xff] %v6474_v56  ;;  %v2217_v56 = vld [vmem:[#allocation5 + $0x3c8] sm:$0xff] }
 0x25e   : > { %v6478_v62 = vsub.f32 %v2166_v31, %v2238_v48  ;;  %v2336_v46 = vand.u32 4294901760, %v2217_v56 }
 0x260   : > { %9057 = vst [vmem:[#allocation34_spill] sm:$0xff] %v6478_v62  ;;  %v3626_v62 = vand.u32 4294901760, %v2153_v0 }
 0x263   : > { %5078 = vmatmul.mubr.f32.vlgmr.msra.gmra.mrb[0].mxu0 %v1674_v52 }
 0x264   : > { %5081 = vmatpush3.msra.mxu0 %v1237_v37  ;;  %5082 = vmatprep.mubr.msk.f32.mxu0 %vm6142_vm0, %v6141_v5  ;;  %v2106_v37 = vld [vmem:[#allocation5 + $0x58] sm:$0xff] }
 0x265   : > { %5085 = vmatprep.subr.mxu0 %v6141_v5  ;;  %v3528_v50 = vand.u32 4294901760, %v2106_v37 }
 0x267   : > { %v6480_v63 = vpack.c.bf16 %v3528_v50, %v3524_v49  ;;  %v6485_v4 = vsub.f32 %v2106_v37, %v3528_v50  ;;  %v2174_v37 = vld [vmem:[#allocation5 + $0x270] sm:$0xff]  ;;  %v2114_v49 = vld [vmem:[#allocation5 + $0x98] sm:$0xff]  ;;  %v2111_v50 = vld [vmem:[#allocation5 + $0x80] sm:$0xff] }
 0x269   : > { %9058 = vst [vmem:[#allocation35_spill] sm:$0xff] %v6480_v63  ;;  %9060 = vst [vmem:[#allocation37_spill] sm:$0xff] %v6485_v4  ;;  %5493 = vmatprep.subr.bf16.mxu1 %v6480_v63  ;;  %v2151_v4 = vld [vmem:[#allocation5 + $0x1c0] sm:$0xff] }
 0x26a   : > { %5495 = vmatpush1.bf16.msra.mxu1 %v6487_v6  ;;  %v2179_v6 = vld [vmem:[#allocation5 + $0x298] sm:$0xff] }
 0x26b   : > { %5083 = vmatmul.mubr.f32.vlgmr.msra.gmra.mrb[0].mxu0 %v1675_v53  ;;  %v2171_v53 = vld [vmem:[#allocation5 + $0x258] sm:$0xff] }
 0x26c   : > { %5086 = vmatpush3.msra.mxu0 %v6382_v34  ;;  %5087 = vmatprep.mubr.msk.f32.mxu0 %vm6142_vm0, %v6141_v5 }
 0x26d   : > { %5090 = vmatprep.subr.mxu0 %v6141_v5 }
 0x273   : > { %5088 = vmatmul.mubr.f32.vlgmr.msra.gmra.mrb[0].mxu0 %v1676_v54  ;;  %v6470_v54 = vpack.c.bf16 %v2236_v45, %v2232_v29  ;;  %v6506_v45 = vsub.f32 %v2170_v59, %v2246_v20 }
 0x274   : > { %5091 = vmatpush3.msra.mxu0 %v1238_v42  ;;  %5092 = vmatprep.mubr.msk.f32.mxu0 %vm6142_vm0, %v6141_v5  ;;  %v6461_v42 = vsub.f32 %v2099_v14, %v3518_v27  ;;  %v2244_v14 = vand.u32 4294901760, %v2171_v53  ;;  %v2175_v27 = vld [vmem:[#allocation5 + $0x278] sm:$0xff] }
 0x275   : > { %5095 = vmatprep.subr.mxu0 %v6141_v5  ;;  %9053 = vst [vmem:[#allocation30_spill] sm:$0xff] %v6470_v54  ;;  %9069 = vst [vmem:[#allocation46_spill] sm:$0xff] %v6506_v45  ;;  %v2252_v59 = vand.u32 4294901760, %v2175_v27 }
 0x276   : > { %9050 = vst [vmem:[#allocation27_spill] sm:$0xff] %v6461_v42  ;;  %v6500_v30 = vsub.f32 %v2171_v53, %v2244_v14  ;;  %v6515_v53 = vpack.c.bf16 %v3538_v25, %v3534_v24 }
 0x277   : > { %v6528_v24 = vsub.f32 %v2175_v27, %v2252_v59 }
 0x278   : > { %9066 = vst [vmem:[#allocation43_spill] sm:$0xff] %v6500_v30  ;;  %9073 = vst [vmem:[#allocation50_spill] sm:$0xff] %v6515_v53 }
 0x279   : > { %9078 = vst [vmem:[#allocation55_spill] sm:$0xff] %v6528_v24 }
 0x27b   : > { %5093 = vmatmul.mubr.f32.vlgmr.msra.gmra.mrb[0].mxu0 %v1674_v52 }
 0x27c   : > { %5096 = vmatpush3.msra.mxu0 %v6382_v34  ;;  %5097 = vmatprep.mubr.msk.f32.mxu0 %vm6142_vm0, %v6141_v5  ;;  %v6430_v5 = vsub.f32 %v2098_v58, %v3512_v61  ;;  %v6451_v34 = vsub.f32 %v2162_v7, %v2230_v23  ;;  %v2168_v58 = vld [vmem:[#allocation5 + $0x240] sm:$0xff]  ;;  %v6476_v61 = vpack.c.bf16 %v2238_v48, %v2234_v47  ;;  %v3536_v23 = vand.u32 4294901760, %v2110_v1 }
 0x27d   : > { %5101 = vmatprep.subr.bf16.mxu0 %v6438_v18  ;;  %v6489_v7 = vsub.f32 %v2103_v38, %v3526_v51  ;;  %v2242_v15 = vand.u32 4294901760, %v2168_v58  ;;  %v2112_v38 = vld [vmem:[#allocation5 + $0x88] sm:$0xff]  ;;  %v6510_v48 = vsub.f32 %v2108_v60, %v3532_v22  ;;  %v2113_v51 = vld [vmem:[#allocation5 + $0x90] sm:$0xff]  ;;  %v2250_v60 = vand.u32 4294901760, %v2172_v36 }
 0x27e   : > { %9036 = vst [vmem:[#allocation13_spill] sm:$0xff] %v6430_v5  ;;  %9045 = vst [vmem:[#allocation22_spill] sm:$0xff] %v6451_v34  ;;  %v6508_v47 = vpack.c.bf16 %v3536_v23, %v3532_v22  ;;  %v3546_v22 = vand.u32 4294901760, %v2113_v51  ;;  %v2120_v18 = vld [vmem:[#allocation5 + $0xc8] sm:$0xff] }
 0x27f   : > { %9056 = vst [vmem:[#allocation33_spill] sm:$0xff] %v6476_v61  ;;  %9062 = vst [vmem:[#allocation39_spill] sm:$0xff] %v6489_v7  ;;  %v6502_v31 = vpack.c.bf16 %v2246_v20, %v2242_v15  ;;  %v6504_v43 = vsub.f32 %v2168_v58, %v2242_v15  ;;  %v2248_v58 = vand.u32 4294901760, %v2173_v26  ;;  %v3540_v15 = vand.u32 4294901760, %v2112_v38 }
 0x280   : > { %9070 = vst [vmem:[#allocation47_spill] sm:$0xff] %v6508_v47  ;;  %9071 = vst [vmem:[#allocation48_spill] sm:$0xff] %v6510_v48  ;;  %5497 = vmatprep.subr.bf16.mxu1 %v6508_v47  ;;  %v3544_v20 = vand.u32 4294901760, %v2114_v49  ;;  %v2178_v47 = vld [vmem:[#allocation5 + $0x290] sm:$0xff] }
 0x281   : > { %9067 = vst [vmem:[#allocation44_spill] sm:$0xff] %v6502_v31  ;;  %9068 = vst [vmem:[#allocation45_spill] sm:$0xff] %v6504_v43  ;;  %5499 = vmatpush1.bf16.msra.mxu1 %v6515_v53  ;;  %v6524_v2 = vpack.c.bf16 %v2252_v59, %v2248_v58  ;;  %v6538_v41 = vsub.f32 %v2112_v38, %v3540_v15  ;;  %v6547_v59 = vsub.f32 %v2113_v51, %v3546_v22 }
 0x282   : > { %v6536_v63 = vpack.c.bf16 %v3544_v20, %v3540_v15 }
 0x283   : > { %5098 = vmatmul.mubr.f32.vlgmr.msra.gmra.mrb[0].mxu0 %v1674_v52  ;;  %v2169_v52 = vld [vmem:[#allocation5 + $0x248] sm:$0xff]  ;;  %9076 = vst [vmem:[#allocation53_spill] sm:$0xff] %v6524_v2  ;;  %9083 = vst [vmem:[#allocation60_spill] sm:$0xff] %v6538_v41  ;;  %v2119_v41 = vld [vmem:[#allocation5 + $0xc0] sm:$0xff] }
 0x284   : > { %5103 = vmatpush1.bf16.msra.mxu0 %v6447_v32  ;;  %v2240_v13 = vand.u32 4294901760, %v2169_v52  ;;  %9082 = vst [vmem:[#allocation59_spill] sm:$0xff] %v6536_v63  ;;  %v2115_v32 = vld [vmem:[#allocation5 + $0xa0] sm:$0xff]  ;;  %9087 = vst [vmem:[#allocation64_spill] sm:$0xff] %v6547_v59  ;;  %5501 = vmatprep.subr.bf16.mxu1 %v6536_v63  ;;  %v2182_v63 = vld [vmem:[#allocation5 + $0x2b0] sm:$0xff] }
 0x285   : > { %5105 = vmatprep.subr.bf16.mxu0 %v6470_v54  ;;  %v2118_v54 = vld [vmem:[#allocation5 + $0xb8] sm:$0xff] }
 0x286   : > { %v6496_v28 = vpack.c.bf16 %v2244_v14, %v2240_v13  ;;  %v6498_v29 = vsub.f32 %v2169_v52, %v2240_v13  ;;  %v6513_v52 = vsub.f32 %v2110_v1, %v3536_v23  ;;  %v6519_v13 = vsub.f32 %v2109_v3, %v3538_v25  ;;  %v2177_v23 = vld [vmem:[#allocation5 + $0x288] sm:$0xff] }
 0x287   : > { %v2254_v14 = vand.u32 4294901760, %v2174_v37  ;;  %v3542_v1 = vand.u32 4294901760, %v2111_v50  ;;  %v6526_v3 = vsub.f32 %v2173_v26, %v2248_v58  ;;  %v6541_v26 = vsub.f32 %v2114_v49, %v3544_v20 }
 0x288   : > { %5107 = vmatpush1.bf16.msra.mxu0 %v6476_v61  ;;  %9064 = vst [vmem:[#allocation41_spill] sm:$0xff] %v6496_v28  ;;  %9065 = vst [vmem:[#allocation42_spill] sm:$0xff] %v6498_v29  ;;  %v6532_v61 = vsub.f32 %v2172_v36, %v2250_v60  ;;  %v2256_v36 = vand.u32 4294901760, %v2177_v23  ;;  %v3552_v15 = vand.u32 4294901760, %v2118_v54  ;;  %v3550_v49 = vand.u32 4294901760, %v2115_v32 }
 0x289   : > { %5109 = vmatprep.subr.bf16.mxu0 %v6496_v28  ;;  %9072 = vst [vmem:[#allocation49_spill] sm:$0xff] %v6513_v52  ;;  %9075 = vst [vmem:[#allocation52_spill] sm:$0xff] %v6519_v13  ;;  %v6530_v25 = vpack.c.bf16 %v2254_v14, %v2250_v60  ;;  %v2116_v28 = vld [vmem:[#allocation5 + $0xa8] sm:$0xff]  ;;  %v6534_v53 = vsub.f32 %v2174_v37, %v2254_v14  ;;  %v6543_v27 = vpack.c.bf16 %v3546_v22, %v3542_v1  ;;  %v6877_v13 = vld [vmem:[#allocation5 + $0x3b8] sm:$0xff] }
 0x28a   : > { %9077 = vst [vmem:[#allocation54_spill] sm:$0xff] %v6526_v3  ;;  %9080 = vst [vmem:[#allocation57_spill] sm:$0xff] %v6532_v61  ;;  %v6545_v58 = vsub.f32 %v2111_v50, %v3542_v1  ;;  %v2260_v37 = vand.u32 4294901760, %v2179_v6  ;;  %v2262_v60 = vand.u32 4294901760, %v2178_v47  ;;  %v3548_v14 = vand.u32 4294901760, %v2116_v28  ;;  %v6888_v52 = vld [vmem:[#allocation5 + $0x3a0] sm:$0xff] }
 0x28b   : > { %9079 = vst [vmem:[#allocation56_spill] sm:$0xff] %v6530_v25  ;;  %9081 = vst [vmem:[#allocation58_spill] sm:$0xff] %v6534_v53  ;;  %5503 = vmatpush1.bf16.msra.mxu1 %v6543_v27  ;;  %v3554_v20 = vand.u32 4294901760, %v2117_v39  ;;  %v6554_v51 = vsub.f32 %v2177_v23, %v2256_v36  ;;  %v2121_v53 = vld [vmem:[#allocation5 + $0xd0] sm:$0xff] }
 0x28c   : > { %5111 = vmatpush1.bf16.msra.mxu0 %v6502_v31  ;;  %v2176_v31 = vld [vmem:[#allocation5 + $0x280] sm:$0xff]  ;;  %9084 = vst [vmem:[#allocation61_spill] sm:$0xff] %v6541_v26  ;;  %9085 = vst [vmem:[#allocation62_spill] sm:$0xff] %v6543_v27  ;;  %v6552_v50 = vpack.c.bf16 %v2260_v37, %v2256_v36  ;;  %v6556_v1 = vsub.f32 %v2179_v6, %v2260_v37  ;;  %v6562_v27 = vsub.f32 %v2178_v47, %v2262_v60  ;;  %v2122_v26 = vld [vmem:[#allocation5 + $0xd8] sm:$0xff] }
 0x28d   : > { %5113 = vmatprep.subr.bf16.mxu0 %v6524_v2  ;;  %9086 = vst [vmem:[#allocation63_spill] sm:$0xff] %v6545_v58  ;;  %v2258_v38 = vand.u32 4294901760, %v2176_v31  ;;  %v2181_v2 = vld [vmem:[#allocation5 + $0x2a8] sm:$0xff]  ;;  %9089 = vst [vmem:[#allocation66_spill] sm:$0xff] %v6554_v51  ;;  %v6564_v59 = vpack.c.bf16 %v3552_v15, %v3548_v14  ;;  %v6566_v58 = vsub.f32 %v2116_v28, %v3548_v14  ;;  %v2268_v28 = vand.u32 4294901760, %v2183_v16  ;;  %v2125_v51 = vld [vmem:[#allocation5 + $0xf0] sm:$0xff] }
 0x28e   : > { %9088 = vst [vmem:[#allocation65_spill] sm:$0xff] %v6552_v50  ;;  %9090 = vst [vmem:[#allocation67_spill] sm:$0xff] %v6556_v1  ;;  %v6569_v6 = vsub.f32 %v2118_v54, %v3552_v15  ;;  %v6571_v23 = vpack.c.bf16 %v3554_v20, %v3550_v49  ;;  %v6573_v36 = vsub.f32 %v2115_v32, %v3550_v49  ;;  %v3560_v14 = vand.u32 4294901760, %v2122_v26  ;;  %v2123_v1 = vld [vmem:[#allocation5 + $0xe0] sm:$0xff] }
 0x28f   : > { %v6558_v22 = vpack.c.bf16 %v2262_v60, %v2258_v38  ;;  %v6560_v10 = vsub.f32 %v2176_v31, %v2258_v38  ;;  %9093 = vst [vmem:[#allocation70_spill] sm:$0xff] %v6562_v27  ;;  %9094 = vst [vmem:[#allocation71_spill] sm:$0xff] %v6564_v59  ;;  %v6575_v37 = vsub.f32 %v2117_v39, %v3554_v20  ;;  %5505 = vmatprep.subr.bf16.mxu1 %v6564_v59  ;;  %v2186_v59 = vld [vmem:[#allocation5 + $0x2d0] sm:$0xff] }
 0x290   : > { %5115 = vmatpush1.bf16.msra.mxu0 %v6530_v25  ;;  %v2180_v25 = vld [vmem:[#allocation5 + $0x2a0] sm:$0xff]  ;;  %9095 = vst [vmem:[#allocation72_spill] sm:$0xff] %v6566_v58  ;;  %9096 = vst [vmem:[#allocation73_spill] sm:$0xff] %v6569_v6  ;;  %v2264_v31 = vand.u32 4294901760, %v2181_v2  ;;  %v2270_v38 = vand.u32 4294901760, %v2182_v63  ;;  %5507 = vmatpush1.bf16.msra.mxu1 %v6571_v23  ;;  %v3556_v60 = vand.u32 4294901760, %v2120_v18  ;;  %v6584_v49 = vsub.f32 %v2183_v16, %v2268_v28 }
 0x291   : > { %9091 = vst [vmem:[#allocation68_spill] sm:$0xff] %v6558_v22  ;;  %9092 = vst [vmem:[#allocation69_spill] sm:$0xff] %v6560_v10  ;;  %5117 = vmatprep.subr.bf16.mxu0 %v6552_v50  ;;  %v2266_v47 = vand.u32 4294901760, %v2180_v25  ;;  %v3558_v54 = vand.u32 4294901760, %v2119_v41  ;;  %v3562_v15 = vand.u32 4294901760, %v2121_v53  ;;  %v2185_v50 = vld [vmem:[#allocation5 + $0x2c8] sm:$0xff]  ;;  %v6597_v16 = vsub.f32 %v2122_v26, %v3560_v14 }
 0x292   : > { %9097 = vst [vmem:[#allocation74_spill] sm:$0xff] %v6571_v23  ;;  %9098 = vst [vmem:[#allocation75_spill] sm:$0xff] %v6573_v36  ;;  %v2187_v6 = vld [vmem:[#allocation5 + $0x2d8] sm:$0xff]  ;;  %v6580_v32 = vpack.c.bf16 %v2268_v28, %v2264_v31  ;;  %v6582_v39 = vsub.f32 %v2181_v2, %v2264_v31  ;;  %v6590_v23 = vsub.f32 %v2182_v63, %v2270_v38  ;;  %v2272_v63 = vand.u32 4294901760, %v2185_v50 }
 0x293   : > { %9099 = vst [vmem:[#allocation76_spill] sm:$0xff] %v6575_v37  ;;  %9102 = vst [vmem:[#allocation79_spill] sm:$0xff] %v6584_v49  ;;  %v6586_v20 = vpack.c.bf16 %v2270_v38, %v2266_v47  ;;  %v2124_v37 = vld [vmem:[#allocation5 + $0xe8] sm:$0xff]  ;;  %v6588_v36 = vsub.f32 %v2180_v25, %v2266_v47  ;;  %v6592_v58 = vpack.c.bf16 %v3560_v14, %v3556_v60  ;;  %v2126_v10 = vld [vmem:[#allocation5 + $0xf8] sm:$0xff]  ;;  %v2278_v47 = vand.u32 4294901760, %v2186_v59 }
 0x294   : > { %5119 = vmatpush1.bf16.msra.mxu0 %v6558_v22  ;;  %9100 = vst [vmem:[#allocation77_spill] sm:$0xff] %v6580_v32  ;;  %9101 = vst [vmem:[#allocation78_spill] sm:$0xff] %v6582_v39  ;;  %v2184_v22 = vld [vmem:[#allocation5 + $0x2c0] sm:$0xff]  ;;  %v6594_v27 = vsub.f32 %v2120_v18, %v3556_v60  ;;  %v6599_v2 = vpack.c.bf16 %v3562_v15, %v3558_v54  ;;  %v6601_v31 = vsub.f32 %v2119_v41, %v3558_v54  ;;  %v2129_v39 = vld [vmem:[#allocation5 + $0x110] sm:$0xff] }
 0x295   : > { %9103 = vst [vmem:[#allocation80_spill] sm:$0xff] %v6586_v20  ;;  %9104 = vst [vmem:[#allocation81_spill] sm:$0xff] %v6588_v36  ;;  %5121 = vmatprep.subr.bf16.mxu0 %v6580_v32  ;;  %v6603_v28 = vsub.f32 %v2121_v53, %v3562_v15  ;;  %5509 = vmatprep.subr.bf16.mxu1 %v6592_v58  ;;  %v2276_v18 = vand.u32 4294901760, %v2187_v6  ;;  %v2274_v25 = vand.u32 4294901760, %v2184_v22  ;;  %v3564_v38 = vand.u32 4294901760, %v2124_v37  ;;  %v2189_v32 = vld [vmem:[#allocation5 + $0x2e8] sm:$0xff] }
 0x296   : > { %9105 = vst [vmem:[#allocation82_spill] sm:$0xff] %v6590_v23  ;;  %9106 = vst [vmem:[#allocation83_spill] sm:$0xff] %v6592_v58  ;;  %5511 = vmatpush1.bf16.msra.mxu1 %v6599_v2  ;;  %v3568_v60 = vand.u32 4294901760, %v2126_v10  ;;  %v3566_v26 = vand.u32 4294901760, %v2123_v1  ;;  %v3570_v14 = vand.u32 4294901760, %v2125_v51  ;;  %v6610_v53 = vsub.f32 %v2185_v50, %v2272_v63  ;;  %v2190_v58 = vld [vmem:[#allocation5 + $0x2f0] sm:$0xff] }
 0x297   : > { %9107 = vst [vmem:[#allocation84_spill] sm:$0xff] %v6594_v27  ;;  %9108 = vst [vmem:[#allocation85_spill] sm:$0xff] %v6597_v16  ;;  %v2191_v16 = vld [vmem:[#allocation5 + $0x2f8] sm:$0xff]  ;;  %v6608_v41 = vpack.c.bf16 %v2276_v18, %v2272_v63  ;;  %v6612_v54 = vsub.f32 %v2187_v6, %v2276_v18  ;;  %v6614_v15 = vpack.c.bf16 %v2278_v47, %v2274_v25  ;;  %v2127_v49 = vld [vmem:[#allocation5 + $0x100] sm:$0xff] }
 0x298   : > { %9109 = vst [vmem:[#allocation86_spill] sm:$0xff] %v6599_v2  ;;  %9110 = vst [vmem:[#allocation87_spill] sm:$0xff] %v6601_v31  ;;  %5123 = vmatpush1.bf16.msra.mxu0 %v6586_v20  ;;  %v2188_v20 = vld [vmem:[#allocation5 + $0x2e0] sm:$0xff]  ;;  %v6616_v31 = vsub.f32 %v2184_v22, %v2274_v25  ;;  %v6618_v2 = vsub.f32 %v2186_v59, %v2278_v47  ;;  %v6620_v27 = vpack.c.bf16 %v3568_v60, %v3564_v38  ;;  %v2130_v36 = vld [vmem:[#allocation5 + $0x118] sm:$0xff] }
 0x299   : > { %9111 = vst [vmem:[#allocation88_spill] sm:$0xff] %v6603_v28  ;;  %9112 = vst [vmem:[#allocation89_spill] sm:$0xff] %v6608_v41  ;;  %v2128_v28 = vld [vmem:[#allocation5 + $0x108] sm:$0xff]  ;;  %v6622_v23 = vsub.f32 %v2124_v37, %v3564_v38  ;;  %5125 = vmatprep.subr.bf16.mxu0 %v6608_v41  ;;  %v6625_v50 = vsub.f32 %v2126_v10, %v3568_v60  ;;  %v6627_v6 = vpack.c.bf16 %v3570_v14, %v3566_v26 }
 0x29a   : > { %9113 = vst [vmem:[#allocation90_spill] sm:$0xff] %v6610_v53  ;;  %9114 = vst [vmem:[#allocation91_spill] sm:$0xff] %v6612_v54  ;;  %v6629_v63 = vsub.f32 %v2123_v1, %v3566_v26  ;;  %v6631_v18 = vsub.f32 %v2125_v51, %v3570_v14  ;;  %5513 = vmatprep.subr.bf16.mxu1 %v6620_v27  ;;  %v2280_v59 = vand.u32 4294901760, %v2189_v32  ;;  %v2284_v22 = vand.u32 4294901760, %v2191_v16  ;;  %v2193_v41 = vld [vmem:[#allocation5 + $0x308] sm:$0xff]  ;;  %v2131_v54 = vld [vmem:[#allocation5 + $0x120] sm:$0xff] }
 0x29b   : > { %9115 = vst [vmem:[#allocation92_spill] sm:$0xff] %v6614_v15  ;;  %9116 = vst [vmem:[#allocation93_spill] sm:$0xff] %v6616_v31  ;;  %v2282_v37 = vand.u32 4294901760, %v2188_v20  ;;  %v2286_v25 = vand.u32 4294901760, %v2190_v58  ;;  %5515 = vmatpush1.bf16.msra.mxu1 %v6627_v6  ;;  %v3572_v47 = vand.u32 4294901760, %v2128_v28  ;;  %v3576_v38 = vand.u32 4294901760, %v2130_v36 }
 0x29c   : > { %9117 = vst [vmem:[#allocation94_spill] sm:$0xff] %v6618_v2  ;;  %9118 = vst [vmem:[#allocation95_spill] sm:$0xff] %v6620_v27  ;;  %5127 = vmatpush1.bf16.msra.mxu0 %v6614_v15  ;;  %v3574_v10 = vand.u32 4294901760, %v2127_v49  ;;  %v3578_v60 = vand.u32 4294901760, %v2129_v39  ;;  %v6636_v1 = vpack.c.bf16 %v2284_v22, %v2280_v59  ;;  %v6638_v51 = vsub.f32 %v2189_v32, %v2280_v59  ;;  %v2192_v15 = vld [vmem:[#allocation5 + $0x300] sm:$0xff]  ;;  %v2194_v27 = vld [vmem:[#allocation5 + $0x310] sm:$0xff] }
 0x29d   : > { %9119 = vst [vmem:[#allocation96_spill] sm:$0xff] %v6622_v23  ;;  %9120 = vst [vmem:[#allocation97_spill] sm:$0xff] %v6625_v50  ;;  %v2195_v50 = vld [vmem:[#allocation5 + $0x318] sm:$0xff]  ;;  %v6640_v26 = vsub.f32 %v2191_v16, %v2284_v22  ;;  %v6642_v14 = vpack.c.bf16 %v2286_v25, %v2282_v37  ;;  %v6648_v23 = vpack.c.bf16 %v3576_v38, %v3572_v47  ;;  %v2133_v53 = vld [vmem:[#allocation5 + $0x130] sm:$0xff] }
 0x29e   : > { %9121 = vst [vmem:[#allocation98_spill] sm:$0xff] %v6627_v6  ;;  %9122 = vst [vmem:[#allocation99_spill] sm:$0xff] %v6629_v63  ;;  %v6644_v63 = vsub.f32 %v2188_v20, %v2282_v37  ;;  %v6646_v6 = vsub.f32 %v2190_v58, %v2286_v25  ;;  %v6650_v2 = vsub.f32 %v2128_v28, %v3572_v47  ;;  %v2134_v31 = vld [vmem:[#allocation5 + $0x138] sm:$0xff]  ;;  %5129 = vmatprep.subr.bf16.mxu0 %v6636_v1 }
 0x29f   : > { %9123 = vst [vmem:[#allocation100_spill] sm:$0xff] %v6631_v18  ;;  %9124 = vst [vmem:[#allocation101_spill] sm:$0xff] %v6636_v1  ;;  %v2132_v18 = vld [vmem:[#allocation5 + $0x128] sm:$0xff]  ;;  %v6653_v32 = vsub.f32 %v2130_v36, %v3576_v38  ;;  %v6655_v16 = vpack.c.bf16 %v3578_v60, %v3574_v10  ;;  %v6657_v59 = vsub.f32 %v2127_v49, %v3574_v10  ;;  %5517 = vmatprep.subr.bf16.mxu1 %v6648_v23 }
 0x2a0   : > { %9125 = vst [vmem:[#allocation102_spill] sm:$0xff] %v6638_v51  ;;  %9126 = vst [vmem:[#allocation103_spill] sm:$0xff] %v6640_v26  ;;  %v6659_v22 = vsub.f32 %v2129_v39, %v3578_v60  ;;  %5131 = vmatpush1.bf16.msra.mxu0 %v6642_v14  ;;  %v2288_v58 = vand.u32 4294901760, %v2193_v41  ;;  %v2292_v20 = vand.u32 4294901760, %v2195_v50  ;;  %v2290_v28 = vand.u32 4294901760, %v2192_v15  ;;  %v2197_v1 = vld [vmem:[#allocation5 + $0x328] sm:$0xff] }
 0x2a1   : > { %9127 = vst [vmem:[#allocation104_spill] sm:$0xff] %v6642_v14  ;;  %9128 = vst [vmem:[#allocation105_spill] sm:$0xff] %v6644_v63  ;;  %v2294_v37 = vand.u32 4294901760, %v2194_v27  ;;  %5519 = vmatpush1.bf16.msra.mxu1 %v6655_v16  ;;  %v3580_v25 = vand.u32 4294901760, %v2132_v18  ;;  %v3584_v47 = vand.u32 4294901760, %v2134_v31  ;;  %v3582_v36 = vand.u32 4294901760, %v2131_v54 }
 0x2a2   : > { %9129 = vst [vmem:[#allocation106_spill] sm:$0xff] %v6646_v6  ;;  %9130 = vst [vmem:[#allocation107_spill] sm:$0xff] %v6648_v23  ;;  %v3586_v38 = vand.u32 4294901760, %v2133_v53  ;;  %v6666_v49 = vsub.f32 %v2193_v41, %v2288_v58  ;;  %v6668_v39 = vsub.f32 %v2195_v50, %v2292_v20  ;;  %v2199_v60 = vld [vmem:[#allocation5 + $0x338] sm:$0xff]  ;;  %v2196_v14 = vld [vmem:[#allocation5 + $0x320] sm:$0xff] }
 0x2a3   : > { %9131 = vst [vmem:[#allocation108_spill] sm:$0xff] %v6650_v2  ;;  %9132 = vst [vmem:[#allocation109_spill] sm:$0xff] %v6653_v32  ;;  %v6664_v32 = vpack.c.bf16 %v2292_v20, %v2288_v58  ;;  %v6670_v10 = vpack.c.bf16 %v2294_v37, %v2290_v28  ;;  %v2198_v23 = vld [vmem:[#allocation5 + $0x330] sm:$0xff]  ;;  %v6678_v2 = vsub.f32 %v2132_v18, %v3580_v25  ;;  %v2298_v20 = vand.u32 4294901760, %v2196_v14  ;;  %v6851_v51 = vld [vmem:[#allocation5 + $0x1b8] sm:$0xff] }
 0x2a4   : > { %9133 = vst [vmem:[#allocation110_spill] sm:$0xff] %v6655_v16  ;;  %9134 = vst [vmem:[#allocation111_spill] sm:$0xff] %v6657_v59  ;;  %v6674_v59 = vsub.f32 %v2194_v27, %v2294_v37  ;;  %v6676_v16 = vpack.c.bf16 %v3584_v47, %v3580_v25  ;;  %v6681_v6 = vsub.f32 %v2134_v31, %v3584_v47  ;;  %v2296_v27 = vand.u32 4294901760, %v2197_v1  ;;  %v6835_v63 = vld [vmem:[#allocation5 + $0x390] sm:$0xff] }
 0x2a5   : > { %9135 = vst [vmem:[#allocation112_spill] sm:$0xff] %v6659_v22  ;;  %9136 = vst [vmem:[#allocation113_spill] sm:$0xff] %v6664_v32  ;;  %v6672_v22 = vsub.f32 %v2192_v15, %v2290_v28  ;;  %5133 = vmatprep.subr.bf16.mxu0 %v6664_v32  ;;  %v6683_v41 = vpack.c.bf16 %v3586_v38, %v3582_v36  ;;  %v6685_v50 = vsub.f32 %v2131_v54, %v3582_v36 }
 0x2a6   : > { %9137 = vst [vmem:[#allocation114_spill] sm:$0xff] %v6666_v49  ;;  %9138 = vst [vmem:[#allocation115_spill] sm:$0xff] %v6668_v39  ;;  %v6687_v58 = vsub.f32 %v2133_v53, %v3586_v38  ;;  %5135 = vmatpush1.bf16.msra.mxu0 %v6670_v10  ;;  %5521 = vmatprep.subr.bf16.mxu1 %v6676_v16  ;;  %v2300_v15 = vand.u32 4294901760, %v2199_v60  ;;  %v2302_v28 = vand.u32 4294901760, %v2198_v23  ;;  %v6822_v39 = vld [vmem:[#allocation5 + $0x398] sm:$0xff] }
 0x2a7   : > { %9139 = vst [vmem:[#allocation116_spill] sm:$0xff] %v6670_v10  ;;  %9140 = vst [vmem:[#allocation117_spill] sm:$0xff] %v6672_v22  ;;  %5523 = vmatpush1.bf16.msra.mxu1 %v6683_v41  ;;  %v6694_v31 = vsub.f32 %v2197_v1, %v2296_v27  ;;  %v6700_v53 = vsub.f32 %v2196_v14, %v2298_v20  ;;  %v6708_v1 = vld [vmem:[#allocation5 + $0x158] sm:$0xff]  ;;  %v6712_v14 = vld [vmem:[#allocation5 + $0x140] sm:$0xff] }
 0x2a8   : > { %9141 = vst [vmem:[#allocation118_spill] sm:$0xff] %v6674_v59  ;;  %9142 = vst [vmem:[#allocation119_spill] sm:$0xff] %v6676_v16  ;;  %v6692_v18 = vpack.c.bf16 %v2300_v15, %v2296_v27  ;;  %v6696_v37 = vsub.f32 %v2199_v60, %v2300_v15  ;;  %v6698_v54 = vpack.c.bf16 %v2302_v28, %v2298_v20  ;;  %v8689_v27 = vand.u32 4294901760, %v6708_v1  ;;  %v6730_v16 = vld [vmem:[#allocation5 + $0x340] sm:$0xff]  ;;  %v6732_v20 = vld [vmem:[#allocation5 + $0x350] sm:$0xff] }
 0x2a9   : > { %9143 = vst [vmem:[#allocation120_spill] sm:$0xff] %v6678_v2  ;;  %9144 = vst [vmem:[#allocation121_spill] sm:$0xff] %v6681_v6  ;;  %v6702_v25 = vsub.f32 %v2198_v23, %v2302_v28  ;;  %v6714_v23 = vld [vmem:[#allocation5 + $0x150] sm:$0xff]  ;;  %v9155_v28 = vand.u32 4294901760, %v6712_v14  ;;  %v6796_v59 = vld [vmem:[#allocation5 + $0x198] sm:$0xff]  ;;  %v9201_v34 = vand.u32 4294901760, %v6708_v1 }
 0x2aa   : > { %9145 = vst [vmem:[#allocation122_spill] sm:$0xff] %v6683_v41  ;;  %9146 = vst [vmem:[#allocation123_spill] sm:$0xff] %v6685_v50  ;;  %5137 = vmatprep.subr.bf16.mxu0 %v6692_v18  ;;  %v6706_v41 = vld [vmem:[#allocation5 + $0x148] sm:$0xff]  ;;  %v9156_v32 = vand.u32 4294901760, %v6714_v23  ;;  %v6809_v6 = vld [vmem:[#allocation5 + $0x190] sm:$0xff]  ;;  %v9203_v33 = vand.u32 4294901760, %v6712_v14 }
 0x2ab   : > { %9147 = vst [vmem:[#allocation124_spill] sm:$0xff] %v6687_v58  ;;  %9148 = vst [vmem:[#allocation125_spill] sm:$0xff] %v6692_v18  ;;  %5139 = vmatpush1.bf16.msra.mxu0 %v6698_v54  ;;  %v8690_v60 = vand.u32 4294901760, %v6706_v41  ;;  %v9179_v61 = vand.u32 4294901760, %v6809_v6  ;;  %v9199_v40 = vand.u32 4294901760, %v6706_v41 }
 0x2ac   : > { %9149 = vst [vmem:[#allocation126_spill] sm:$0xff] %v6694_v31  ;;  %9150 = vst [vmem:[#allocation127_spill] sm:$0xff] %v6696_v37  ;;  %v6783_v37 = vld [vmem:[#allocation5 + $0x370] sm:$0xff]  ;;  %v6931_v17 = vsub.f32 %v6712_v14, %v9203_v33  ;;  %v9211_v33 = vand.u32 4294901760, %v6730_v16 }
 0x2ad   : > { %9151 = vst [vmem:[#allocation128_spill] sm:$0xff] %v6698_v54  ;;  %9152 = vst [vmem:[#allocation129_spill] sm:$0xff] %v6700_v53  ;;  %v6726_v54 = vpack.c.bf16 %v8689_v27, %v8690_v60  ;;  %v6742_v27 = vld [vmem:[#allocation5 + $0x168] sm:$0xff]  ;;  %v6744_v60 = vld [vmem:[#allocation5 + $0x178] sm:$0xff]  ;;  %v6921_v35 = vsub.f32 %v6706_v41, %v9199_v40 }
 0x2ae   : > { %9153 = vst [vmem:[#allocation130_spill] sm:$0xff] %v6702_v25  ;;  %v6738_v25 = vpack.c.bf16 %v9156_v32, %v9155_v28  ;;  %v6757_v53 = vld [vmem:[#allocation5 + $0x170] sm:$0xff]  ;;  %v6770_v32 = vld [vmem:[#allocation5 + $0x378] sm:$0xff]  ;;  %v9162_v28 = vand.u32 4294901760, %v6742_v27  ;;  %9204 = vst [vmem:[#allocation152_spill] sm:$0xff] %v6931_v17  ;;  %v6952_v14 = vsub.f32 %v6730_v16, %v9211_v33 }
 0x2af   : > { %9154 = vst [vmem:[#allocation131_spill] sm:$0xff] %v6726_v54  ;;  %5525 = vmatprep.subr.bf16.mxu1 %v6726_v54  ;;  %v9160_v54 = vand.u32 4294901760, %v6732_v20  ;;  %9200 = vst [vmem:[#allocation150_spill] sm:$0xff] %v6921_v35  ;;  %v2157_v35 = vld [vmem:[#allocation5 + $0x1f0] sm:$0xff] }
 0x2b0   : > { %9157 = vst [vmem:[#allocation132_spill] sm:$0xff] %v6738_v25  ;;  %5527 = vmatpush1.bf16.msra.mxu1 %v6738_v25  ;;  %v9163_v25 = vand.u32 4294901760, %v6744_v60  ;;  %9212 = vst [vmem:[#allocation156_spill] sm:$0xff] %v6952_v14 }
 0x2b2   : > { %v6777_v31 = vpack.c.bf16 %v9163_v25, %v9162_v28  ;;  %v6794_v28 = vld [vmem:[#allocation5 + $0x188] sm:$0xff] }
 0x2b4   : > { %9164 = vst [vmem:[#allocation135_spill] sm:$0xff] %v6777_v31  ;;  %5529 = vmatprep.subr.bf16.mxu1 %v6777_v31  ;;  %v9172_v31 = vand.u32 4294901760, %v6783_v37 }
 0x356   : > { %v2050_v47 = vpop.f32.mrb[0].mxu0 }
 0x357   : > { %v4922_v36 = vmul.f32 -1.442695, %v2050_v47  ;;  %v5099_v38 = vpop.f32.mrb[1].mxu0  ;;  %v6718_v47 = vld [vmem:[#allocation5 + $0x348] sm:$0xff] }
 0x358   : > { %v8697_v18 = vand.u32 4294901760, %v6718_v47  ;;  %v9207_v40 = vand.u32 4294901760, %v6718_v47 }
 0x359   : > { %5993 = vpow2.f32 %v4922_v36  ;;  %v6720_v36 = vld [vmem:[#allocation5 + $0x358] sm:$0xff] }
 0x35a   : > { %v8696_v10 = vand.u32 4294901760, %v6720_v36  ;;  %v6942_v41 = vsub.f32 %v6718_v47, %v9207_v40  ;;  %v9215_v47 = vand.u32 4294901760, %v6742_v27 }
 0x35c   : > { %v6751_v58 = vpack.c.bf16 %v8696_v10, %v8697_v18  ;;  %v6768_v18 = vld [vmem:[#allocation5 + $0x368] sm:$0xff]  ;;  %9208 = vst [vmem:[#allocation154_spill] sm:$0xff] %v6942_v41  ;;  %v6963_v40 = vsub.f32 %v6742_v27, %v9215_v47  ;;  %v9225_v47 = vand.u32 4294901760, %v6770_v32 }
 0x35e   : > { %9158 = vst [vmem:[#allocation133_spill] sm:$0xff] %v6751_v58  ;;  %5141 = vmatprep.subr.bf16.mxu0 %v6751_v58  ;;  %v9166_v58 = vand.u32 4294901760, %v6757_v53  ;;  %9216 = vst [vmem:[#allocation158_spill] sm:$0xff] %v6963_v40 }
 0x363   : > { %v5994_v15 = vpop.eup %5993 }
 0x364   : > { %v2057_v38 = vadd.f32 1.0, %v5994_v15  ;;  %v6755_v15 = vld [vmem:[#allocation5 + $0x160] sm:$0xff] }
 0x365   : > { %v9165_v10 = vand.u32 4294901760, %v6755_v15 }
 0x366   : > { %5995 = vrcp.f32 %v2057_v38  ;;  %v9159_v38 = vand.u32 4294901760, %v6730_v16  ;;  %v9219_v16 = vand.u32 4294901760, %v6755_v15 }
 0x367   : > { %v6790_v22 = vpack.c.bf16 %v9166_v58, %v9165_v10  ;;  %v6807_v58 = vld [vmem:[#allocation5 + $0x180] sm:$0xff]  ;;  %v9174_v10 = vand.u32 4294901760, %v6794_v28 }
 0x368   : > { %v6764_v50 = vpack.c.bf16 %v9160_v54, %v9159_v38  ;;  %v6781_v38 = vld [vmem:[#allocation5 + $0x360] sm:$0xff]  ;;  %v9168_v54 = vand.u32 4294901760, %v6768_v18  ;;  %v6973_v33 = vsub.f32 %v6755_v15, %v9219_v16  ;;  %v9229_v16 = vand.u32 4294901760, %v6783_v37 }
 0x369   : > { %9167 = vst [vmem:[#allocation136_spill] sm:$0xff] %v6790_v22  ;;  %5531 = vmatpush1.bf16.msra.mxu1 %v6790_v22  ;;  %v9171_v25 = vand.u32 4294901760, %v6781_v38  ;;  %v9175_v22 = vand.u32 4294901760, %v6796_v59 }
 0x36a   : > { %9161 = vst [vmem:[#allocation134_spill] sm:$0xff] %v6764_v50  ;;  %5143 = vmatpush1.bf16.msra.mxu0 %v6764_v50  ;;  %v9169_v50 = vand.u32 4294901760, %v6770_v32  ;;  %9220 = vst [vmem:[#allocation160_spill] sm:$0xff] %v6973_v33 }
 0x36b   : > { %v6816_v49 = vpack.c.bf16 %v9172_v31, %v9171_v25  ;;  %v6829_v26 = vpack.c.bf16 %v9175_v22, %v9174_v10  ;;  %v6833_v25 = vld [vmem:[#allocation5 + $0x380] sm:$0xff]  ;;  %v6849_v31 = vld [vmem:[#allocation5 + $0x1a8] sm:$0xff]  ;;  %v6864_v22 = vld [vmem:[#allocation5 + $0x1b0] sm:$0xff] }
 0x36c   : > { %v6803_v2 = vpack.c.bf16 %v9169_v50, %v9168_v54  ;;  %v6820_v54 = vld [vmem:[#allocation5 + $0x388] sm:$0xff]  ;;  %v6838_v50 = vsub.s32 0, %v6336_v9  ;;  %v9184_v10 = vand.u32 4294901760, %v6833_v25  ;;  %v9187_v48 = vand.u32 4294901760, %v6849_v31 }
 0x36d   : > { %9173 = vst [vmem:[#allocation138_spill] sm:$0xff] %v6816_v49  ;;  %9176 = vst [vmem:[#allocation139_spill] sm:$0xff] %v6829_v26  ;;  %5533 = vmatprep.subr.bf16.mxu1 %v6829_v26  ;;  %v9181_v9 = vand.u32 4294901760, %v6820_v54  ;;  %v9185_v26 = vand.u32 4294901760, %v6835_v63  ;;  %v9191_v30 = vand.u32 4294901760, %v6864_v22 }
 0x36e   : > { %9170 = vst [vmem:[#allocation137_spill] sm:$0xff] %v6803_v2  ;;  %5145 = vmatprep.subr.bf16.mxu0 %v6803_v2  ;;  %9177 = vst [vmem:[#allocation140_spill] sm:$0xff] %v6838_v50  ;;  %v9178_v2 = vand.u32 4294901760, %v6807_v58 }
 0x36f   : > { %5147 = vmatpush1.bf16.msra.mxu0 %v6816_v49  ;;  %v9182_v49 = vand.u32 4294901760, %v6822_v39  ;;  %v6871_v57 = vpack.c.bf16 %v9185_v26, %v9184_v10  ;;  %v2152_v26 = vld [vmem:[#allocation5 + $0x1c8] sm:$0xff]  ;;  %v2154_v10 = vld [vmem:[#allocation5 + $0x1d8] sm:$0xff] }
 0x370   : > { %v6845_v24 = vpack.c.bf16 %v9179_v61, %v9178_v2  ;;  %v6862_v2 = vld [vmem:[#allocation5 + $0x1a0] sm:$0xff]  ;;  %v5996_v61 = vpop.eup %5995  ;;  %v3624_v7 = vand.u32 4294901760, %v2154_v10 }
 0x371   : > { %v6858_v3 = vpack.c.bf16 %v9182_v49, %v9181_v9  ;;  %9186 = vst [vmem:[#allocation143_spill] sm:$0xff] %v6871_v57  ;;  %v6875_v9 = vld [vmem:[#allocation5 + $0x3a8] sm:$0xff]  ;;  %v6890_v49 = vld [vmem:[#allocation5 + $0x3b0] sm:$0xff]  ;;  %v2063_v43 = vrot.slane %v5996_v61, %v6838_v50  ;;  %v9194_v61 = vand.u32 4294901760, %v6877_v13 }
 0x372   : > { %9180 = vst [vmem:[#allocation141_spill] sm:$0xff] %v6845_v24  ;;  %5535 = vmatpush1.bf16.msra.mxu1 %v6845_v24  ;;  %v9188_v24 = vand.u32 4294901760, %v6851_v51  ;;  %v9193_v8 = vand.u32 4294901760, %v6875_v9 }
 0x373   : > { %9183 = vst [vmem:[#allocation142_spill] sm:$0xff] %v6858_v3  ;;  %5149 = vmatprep.subr.bf16.mxu0 %v6858_v3  ;;  %v9190_v3 = vand.u32 4294901760, %v6862_v2  ;;  %2065 = vbcast.lane.b32.xlu1 %v2063_v43, 256  ;;  %v2340_v43 = vand.u32 4294901760, %v2219_v55 }
 0x374   : > { %v6884_v45 = vpack.c.bf16 %v9188_v24, %v9187_v48  ;;  %5151 = vmatpush1.bf16.msra.mxu0 %v6871_v57  ;;  %v2330_v48 = vand.u32 4294901760, %v6888_v52  ;;  %v2334_v24 = vand.u32 4294901760, %v6890_v49  ;;  %v6907_v50 = vpack.c.bf16 %v9194_v61, %v9193_v8  ;;  %v2216_v8 = vld [vmem:[#allocation5 + $0x3c0] sm:$0xff]  ;;  %v2218_v61 = vld [vmem:[#allocation5 + $0x3d0] sm:$0xff] }
 0x375   : > { %v6898_v29 = vpack.c.bf16 %v9191_v30, %v9190_v3  ;;  %v3620_v57 = vand.u32 4294901760, %v2152_v26  ;;  %v3622_v3 = vand.u32 4294901760, %v2151_v4  ;;  %v2338_v42 = vand.u32 4294901760, %v2216_v8 }
 0x376   : > { %9189 = vst [vmem:[#allocation144_spill] sm:$0xff] %v6884_v45  ;;  %5537 = vmatprep.subr.bf16.mxu1 %v6884_v45  ;;  %9195 = vst [vmem:[#allocation146_spill] sm:$0xff] %v6907_v50  ;;  %v6910_v30 = vpack.c.bf16 %v2334_v24, %v2330_v48  ;;  %5153 = vmatprep.subr.bf16.mxu0 %v6907_v50  ;;  %v6926_v50 = vsub.f32 %v6708_v1, %v9201_v34  ;;  %v9209_v34 = vand.u32 4294901760, %v6720_v36 }
 0x377   : > { %9192 = vst [vmem:[#allocation145_spill] sm:$0xff] %v6898_v29  ;;  %5539 = vmatpush1.bf16.msra.mxu1 %v6898_v29  ;;  %v6913_v45 = vpack.c.bf16 %v3624_v7, %v3620_v57  ;;  %v6916_v44 = vpack.c.bf16 %v3626_v62, %v3622_v3  ;;  %v2342_v29 = vand.u32 4294901760, %v2218_v61 }
 0x378   : > { %9196 = vst [vmem:[#allocation147_spill] sm:$0xff] %v6910_v30  ;;  %5155 = vmatpush1.bf16.msra.mxu0 %v6910_v30  ;;  %9202 = vst [vmem:[#allocation151_spill] sm:$0xff] %v6926_v50  ;;  %v9205_v30 = vand.u32 4294901760, %v6714_v23  ;;  %v6947_v1 = vsub.f32 %v6720_v36, %v9209_v34  ;;  %v9217_v36 = vand.u32 4294901760, %v6744_v60  ;;  %v7078_v50 = vsub.f32 %v2154_v10, %v3624_v7 }
 0x379   : > { %9197 = vst [vmem:[#allocation148_spill] sm:$0xff] %v6913_v45  ;;  %9198 = vst [vmem:[#allocation149_spill] sm:$0xff] %v6916_v44  ;;  %5541 = vmatprep.subr.bf16.mxu1 %v6913_v45  ;;  %v2158_v45 = vld [vmem:[#allocation5 + $0x1f8] sm:$0xff]  ;;  %v7094_v7 = vsub.f32 %v2218_v61, %v2342_v29 }
 0x37a   : > { %v6936_v12 = vsub.f32 %v6714_v23, %v9205_v30  ;;  %9210 = vst [vmem:[#allocation155_spill] sm:$0xff] %v6947_v1  ;;  %v9213_v23 = vand.u32 4294901760, %v6732_v20  ;;  %v6968_v34 = vsub.f32 %v6744_v60, %v9217_v36  ;;  %v6988_v60 = vsub.f32 %v6770_v32, %v9225_v47  ;;  %9262 = vst [vmem:[#allocation183_spill] sm:$0xff] %v7078_v50 }
 0x37b   : > { %5543 = vmatpush1.bf16.msra.mxu1 %v6916_v44  ;;  %v9223_v44 = vand.u32 4294901760, %v6768_v18  ;;  %v9227_v36 = vand.u32 4294901760, %v6781_v38  ;;  %v9235_v47 = vand.u32 4294901760, %v6807_v58  ;;  %9270 = vst [vmem:[#allocation191_spill] sm:$0xff] %v7094_v7 }
 0x37c   : > { %9206 = vst [vmem:[#allocation153_spill] sm:$0xff] %v6936_v12  ;;  %v6957_v30 = vsub.f32 %v6732_v20, %v9213_v23  ;;  %9218 = vst [vmem:[#allocation159_spill] sm:$0xff] %v6968_v34  ;;  %v9221_v20 = vand.u32 4294901760, %v6757_v53 }
 0x37d   : > { %v6983_v27 = vsub.f32 %v6768_v18, %v9223_v44  ;;  %9226 = vst [vmem:[#allocation163_spill] sm:$0xff] %v6988_v60  ;;  %v6993_v15 = vsub.f32 %v6781_v38, %v9227_v36  ;;  %v9233_v18 = vand.u32 4294901760, %v6796_v59  ;;  %v7013_v38 = vsub.f32 %v6807_v58, %v9235_v47 }
 0x37e   : > { %9214 = vst [vmem:[#allocation157_spill] sm:$0xff] %v6957_v30  ;;  %v6978_v23 = vsub.f32 %v6757_v53, %v9221_v20  ;;  %v6998_v53 = vsub.f32 %v6783_v37, %v9229_v16  ;;  %v9231_v20 = vand.u32 4294901760, %v6794_v28  ;;  %v9237_v36 = vand.u32 4294901760, %v6809_v6 }
 0x37f   : > { %9224 = vst [vmem:[#allocation162_spill] sm:$0xff] %v6983_v27  ;;  %9228 = vst [vmem:[#allocation164_spill] sm:$0xff] %v6993_v15  ;;  %v7008_v32 = vsub.f32 %v6796_v59, %v9233_v18  ;;  %v9239_v16 = vand.u32 4294901760, %v6820_v54  ;;  %v9243_v18 = vand.u32 4294901760, %v6833_v25  ;;  %v9245_v47 = vand.u32 4294901760, %v6835_v63 }
 0x380   : > { %9222 = vst [vmem:[#allocation161_spill] sm:$0xff] %v6978_v23  ;;  %9230 = vst [vmem:[#allocation165_spill] sm:$0xff] %v6998_v53  ;;  %v7003_v44 = vsub.f32 %v6794_v28, %v9231_v20  ;;  %v7018_v37 = vsub.f32 %v6809_v6, %v9237_v36  ;;  %v9241_v20 = vand.u32 4294901760, %v6822_v39  ;;  %v9247_v36 = vand.u32 4294901760, %v6849_v31 }
 0x381   : > { %9234 = vst [vmem:[#allocation167_spill] sm:$0xff] %v7008_v32  ;;  %9236 = vst [vmem:[#allocation168_spill] sm:$0xff] %v7013_v38  ;;  %v7023_v28 = vsub.f32 %v6820_v54, %v9239_v16  ;;  %v7033_v58 = vsub.f32 %v6833_v25, %v9243_v18  ;;  %v7038_v6 = vsub.f32 %v6835_v63, %v9245_v47  ;;  %v9249_v16 = vand.u32 4294901760, %v6851_v51 }
 0x382   : > { %9232 = vst [vmem:[#allocation166_spill] sm:$0xff] %v7003_v44  ;;  %9238 = vst [vmem:[#allocation169_spill] sm:$0xff] %v7018_v37  ;;  %v7028_v59 = vsub.f32 %v6822_v39, %v9241_v20  ;;  %v7043_v54 = vsub.f32 %v6849_v31, %v9247_v36  ;;  %v9251_v20 = vand.u32 4294901760, %v6862_v2  ;;  %v9253_v18 = vand.u32 4294901760, %v6864_v22 }
 0x383   : > { %9240 = vst [vmem:[#allocation170_spill] sm:$0xff] %v7023_v28  ;;  %9244 = vst [vmem:[#allocation172_spill] sm:$0xff] %v7033_v58  ;;  %v7048_v39 = vsub.f32 %v6851_v51, %v9249_v16  ;;  %v9255_v47 = vand.u32 4294901760, %v6875_v9  ;;  %v9257_v36 = vand.u32 4294901760, %v6877_v13  ;;  %v7071_v16 = vsub.f32 %v6888_v52, %v2330_v48 }
 0x384   : > { %9242 = vst [vmem:[#allocation171_spill] sm:$0xff] %v7028_v59  ;;  %9246 = vst [vmem:[#allocation173_spill] sm:$0xff] %v7038_v6  ;;  %v7053_v25 = vsub.f32 %v6862_v2, %v9251_v20  ;;  %v7058_v63 = vsub.f32 %v6864_v22, %v9253_v18  ;;  %v7074_v2 = vsub.f32 %v6890_v49, %v2334_v24  ;;  %v2156_v20 = vld [vmem:[#allocation5 + $0x1e8] sm:$0xff]  ;;  %v2155_v22 = vld [vmem:[#allocation5 + $0x1e0] sm:$0xff] }
 0x385   : > { %9248 = vst [vmem:[#allocation174_spill] sm:$0xff] %v7043_v54  ;;  %9250 = vst [vmem:[#allocation175_spill] sm:$0xff] %v7048_v39  ;;  %v7063_v31 = vsub.f32 %v6875_v9, %v9255_v47  ;;  %v7068_v51 = vsub.f32 %v6877_v13, %v9257_v36  ;;  %v7076_v18 = vsub.f32 %v2152_v26, %v3620_v57  ;;  %v2221_v13 = vld [vmem:[#allocation5 + $0x3e8] sm:$0xff]  ;;  %v2223_v36 = vld [vmem:[#allocation5 + $0x3f8] sm:$0xff]  ;;  %v3632_v26 = vand.u32 4294901760, %v2158_v45 }
 0x386   : > { %9252 = vst [vmem:[#allocation176_spill] sm:$0xff] %v7053_v25  ;;  %9254 = vst [vmem:[#allocation177_spill] sm:$0xff] %v7058_v63  ;;  %v7080_v9 = vsub.f32 %v2151_v4, %v3622_v3  ;;  %v7082_v47 = vsub.f32 %v2153_v0, %v3626_v62  ;;  %v7086_v52 = vsub.f32 %v2217_v56, %v2336_v46  ;;  %v2220_v24 = vld [vmem:[#allocation5 + $0x3e0] sm:$0xff]  ;;  %v3628_v4 = vand.u32 4294901760, %v2156_v20 }
 0x387   : > { %9256 = vst [vmem:[#allocation178_spill] sm:$0xff] %v7063_v31  ;;  %9258 = vst [vmem:[#allocation179_spill] sm:$0xff] %v7068_v51  ;;  %v7084_v51 = vpack.c.bf16 %v2340_v43, %v2336_v46  ;;  %v7088_v49 = vsub.f32 %v2219_v55, %v2340_v43  ;;  %v7090_v48 = vpack.c.bf16 %v2342_v29, %v2338_v42  ;;  %v3630_v62 = vand.u32 4294901760, %v2155_v22 }
 0x388   : > { %9259 = vst [vmem:[#allocation180_spill] sm:$0xff] %v7071_v16  ;;  %9260 = vst [vmem:[#allocation181_spill] sm:$0xff] %v7074_v2  ;;  %v7092_v57 = vsub.f32 %v2216_v8, %v2338_v42  ;;  %v3634_v0 = vand.u32 4294901760, %v2157_v35  ;;  %v2344_v10 = vand.u32 4294901760, %v2221_v13  ;;  %v2348_v3 = vand.u32 4294901760, %v2223_v36 }
 0x389   : > { %9261 = vst [vmem:[#allocation182_spill] sm:$0xff] %v7076_v18  ;;  %9263 = vst [vmem:[#allocation184_spill] sm:$0xff] %v7080_v9  ;;  %5157 = vmatprep.subr.bf16.mxu0 %v7084_v51  ;;  %v7098_v46 = vpack.c.bf16 %v3632_v26, %v3628_v4  ;;  %v7100_v55 = vsub.f32 %v2156_v20, %v3628_v4  ;;  %v7102_v56 = vsub.f32 %v2158_v45, %v3632_v26 }
 0x38a   : > { %9264 = vst [vmem:[#allocation185_spill] sm:$0xff] %v7082_v47  ;;  %9265 = vst [vmem:[#allocation186_spill] sm:$0xff] %v7084_v51  ;;  %v2222_v47 = vld [vmem:[#allocation5 + $0x3f0] sm:$0xff]  ;;  %5159 = vmatpush1.bf16.msra.mxu0 %v7090_v48  ;;  %v2346_v42 = vand.u32 4294901760, %v2220_v24  ;;  %v7104_v29 = vpack.c.bf16 %v3634_v0, %v3630_v62  ;;  %v7106_v8 = vsub.f32 %v2155_v22, %v3630_v62  ;;  %v8780_v45 = vand.u32 4294901760, %v6428_v11 }
 0x38b   : > { %9266 = vst [vmem:[#allocation187_spill] sm:$0xff] %v7086_v52  ;;  %9267 = vst [vmem:[#allocation188_spill] sm:$0xff] %v7088_v49  ;;  %v7108_v61 = vsub.f32 %v2157_v35, %v3634_v0  ;;  %v7110_v43 = vpack.c.bf16 %v2348_v3, %v2344_v10  ;;  %5545 = vmatprep.subr.bf16.mxu1 %v7098_v46  ;;  %v7113_v51 = vsub.f32 %v2221_v13, %v2344_v10 }
 0x38c   : > { %9268 = vst [vmem:[#allocation189_spill] sm:$0xff] %v7090_v48  ;;  %9269 = vst [vmem:[#allocation190_spill] sm:$0xff] %v7092_v57  ;;  %v7115_v48 = vsub.f32 %v2223_v36, %v2348_v3  ;;  %v2350_v7 = vand.u32 4294901760, %v2222_v47  ;;  %v7117_v20 = vsub.f32 %v2220_v24, %v2346_v42  ;;  %5547 = vmatpush1.bf16.msra.mxu1 %v7104_v29  ;;  %v8783_v35 = vand.u32 4294901760, %v6430_v5 }
 0x38d   : > { %9271 = vst [vmem:[#allocation192_spill] sm:$0xff] %v7098_v46  ;;  %9272 = vst [vmem:[#allocation193_spill] sm:$0xff] %v7100_v55  ;;  %5161 = vmatprep.subr.bf16.mxu0 %v7110_v43  ;;  %v8794_v13 = vand.u32 4294901760, %v6440_v19  ;;  %v8799_v36 = vand.u32 4294901760, %v6443_v21  ;;  %v3656_v24 = vsub.f32 %v6428_v11, %v8780_v45  ;;  %v9285_v46 = vld [vmem:[#allocation21_spill] sm:$0xff]  ;;  %v9286_v11 = vld [vmem:[#allocation22_spill] sm:$0xff] }
 0x38e   : > { %9273 = vst [vmem:[#allocation194_spill] sm:$0xff] %v7102_v56  ;;  %9274 = vst [vmem:[#allocation195_spill] sm:$0xff] %v7104_v29  ;;  %v7123_v22 = vpack.c.bf16 %v2350_v7, %v2346_v42  ;;  %v7125_v4 = vsub.f32 %v2222_v47, %v2350_v7  ;;  %v3668_v26 = vsub.f32 %v6430_v5, %v8783_v35  ;;  %v9283_v29 = vld [vmem:[#allocation14_spill] sm:$0xff]  ;;  %v8804_v5 = vand.u32 4294901760, %v9285_v46  ;;  %v9307_v56 = vld [vmem:[#allocation45_spill] sm:$0xff] }
 0x38f   : > { %9275 = vst [vmem:[#allocation196_spill] sm:$0xff] %v7106_v8  ;;  %9276 = vst [vmem:[#allocation197_spill] sm:$0xff] %v7108_v61  ;;  %v2372_v62 = vsub.f32 %v6440_v19, %v8794_v13  ;;  %v2384_v47 = vsub.f32 %v6443_v21, %v8799_v36  ;;  %v3657_v7 = vand.u32 4294901760, %v3656_v24  ;;  %v8800_v35 = vand.u32 4294901760, %v9283_v29  ;;  %v9287_v19 = vld [vmem:[#allocation23_spill] sm:$0xff] }
 0x390   : > { %9277 = vst [vmem:[#allocation198_spill] sm:$0xff] %v7110_v43  ;;  %9278 = vst [vmem:[#allocation199_spill] sm:$0xff] %v7113_v51  ;;  %5163 = vmatpush1.bf16.msra.mxu0 %v7123_v22  ;;  %v3669_v0 = vand.u32 4294901760, %v3668_v26  ;;  %v9284_v43 = vld [vmem:[#allocation16_spill] sm:$0xff]  ;;  %v8806_v13 = vand.u32 4294901760, %v9286_v11  ;;  %v9289_v24 = vld [vmem:[#allocation27_spill] sm:$0xff]  ;;  %v2378_v36 = vsub.f32 %v9285_v46, %v8804_v5 }
 0x391   : > { %9279 = vst [vmem:[#allocation200_spill] sm:$0xff] %v7115_v48  ;;  %9280 = vst [vmem:[#allocation201_spill] sm:$0xff] %v7117_v20  ;;  %v2373_v10 = vand.u32 4294901760, %v2372_v62  ;;  %v2385_v3 = vand.u32 4294901760, %v2384_v47  ;;  %v9288_v20 = vld [vmem:[#allocation25_spill] sm:$0xff]  ;;  %v8815_v26 = vand.u32 4294901760, %v9289_v24 }
 0x392   : > { %9281 = vst [vmem:[#allocation202_spill] sm:$0xff] %v7123_v22  ;;  %9282 = vst [vmem:[#allocation203_spill] sm:$0xff] %v7125_v4  ;;  %v5548_v42 = vpack.c.bf16 %v3669_v0, %v3657_v7  ;;  %v8801_v22 = vand.u32 4294901760, %v9284_v43  ;;  %v8808_v4 = vand.u32 4294901760, %v9287_v19  ;;  %v9290_v62 = vld [vmem:[#allocation28_spill] sm:$0xff]  ;;  %v9291_v7 = vld [vmem:[#allocation29_spill] sm:$0xff]  ;;  %v2390_v47 = vsub.f32 %v9286_v11, %v8806_v13 }
 0x393   : > { %v5164_v45 = vpack.c.bf16 %v2385_v3, %v2373_v10  ;;  %v9292_v10 = vld [vmem:[#allocation31_spill] sm:$0xff]  ;;  %v3662_v3 = vsub.f32 %v9283_v29, %v8800_v35  ;;  %v9293_v0 = vand.u32 4294901760, %v9288_v20  ;;  %v9295_v5 = vand.u32 4294901760, %v9290_v62 }
 0x394   : > { %5549 = vmatprep.subr.bf16.mxu1 %v5548_v42  ;;  %v3674_v42 = vsub.f32 %v9284_v43, %v8801_v22  ;;  %v3686_v22 = vsub.f32 %v9289_v24, %v8815_v26  ;;  %v9294_v43 = vld [vmem:[#allocation32_spill] sm:$0xff]  ;;  %v9296_v13 = vand.u32 4294901760, %v9291_v7  ;;  %v2379_v51 = vand.u32 4294901760, %v2378_v36 }
 0x395   : > { %5165 = vmatprep.subr.bf16.mxu0 %v5164_v45  ;;  %v3680_v45 = vsub.f32 %v9287_v19, %v8808_v4  ;;  %v3692_v35 = vsub.f32 %v9288_v20, %v9293_v0  ;;  %v3698_v46 = vsub.f32 %v9290_v62, %v9295_v5  ;;  %v9297_v4 = vand.u32 4294901760, %v9292_v10  ;;  %v9298_v20 = vld [vmem:[#allocation34_spill] sm:$0xff]  ;;  %v9300_v62 = vld [vmem:[#allocation36_spill] sm:$0xff] }
 0x396   : > { %v2396_v11 = vsub.f32 %v9291_v7, %v9296_v13  ;;  %v3663_v21 = vand.u32 4294901760, %v3662_v3  ;;  %v3675_v0 = vand.u32 4294901760, %v3674_v42  ;;  %v8827_v48 = vand.u32 4294901760, %v9298_v20  ;;  %v9301_v13 = vld [vmem:[#allocation37_spill] sm:$0xff]  ;;  %v9302_v3 = vld [vmem:[#allocation39_spill] sm:$0xff]  ;;  %v9308_v7 = vld [vmem:[#allocation46_spill] sm:$0xff] }
 0x397   : > { %v2408_v19 = vsub.f32 %v9292_v10, %v9297_v4  ;;  %v2391_v26 = vand.u32 4294901760, %v2390_v47  ;;  %v3681_v24 = vand.u32 4294901760, %v3680_v45  ;;  %v3693_v29 = vand.u32 4294901760, %v3692_v35  ;;  %v9303_v47 = vld [vmem:[#allocation40_spill] sm:$0xff]  ;;  %v9305_v10 = vld [vmem:[#allocation43_spill] sm:$0xff] }
 0x398   : > { %v3687_v61 = vand.u32 4294901760, %v3686_v22  ;;  %v9299_v8 = vand.u32 4294901760, %v9294_v43  ;;  %v3699_v55 = vand.u32 4294901760, %v3698_v46  ;;  %v2397_v57 = vand.u32 4294901760, %v2396_v11  ;;  %v9304_v22 = vld [vmem:[#allocation42_spill] sm:$0xff] }
 0x399   : > { %v2409_v4 = vand.u32 4294901760, %v2408_v19  ;;  %v2414_v36 = vsub.f32 %v9298_v20, %v8827_v48  ;;  %v8834_v49 = vand.u32 4294901760, %v9305_v10  ;;  %v7200_v11 = vpack.c.bf16 %v2391_v26, %v2379_v51 }
 0x39a   : > { %v2402_v5 = vsub.f32 %v9294_v43, %v9299_v8  ;;  %v7196_v8 = vpack.c.bf16 %v3675_v0, %v3663_v21  ;;  %v7202_v19 = vpack.c.bf16 %v3693_v29, %v3681_v24  ;;  %v9311_v42 = vand.u32 4294901760, %v9300_v62 }
 0x39b   : > { %9309 = vst [vmem:[#allocation205_spill] sm:$0xff] %v7200_v11  ;;  %v9312_v35 = vand.u32 4294901760, %v9301_v13  ;;  %v7210_v20 = vpack.c.bf16 %v3699_v55, %v3687_v61  ;;  %v7212_v21 = vpack.c.bf16 %v2409_v4, %v2397_v57  ;;  %v9315_v43 = vand.u32 4294901760, %v9302_v3  ;;  %v9320_v4 = vld [vmem:[#allocation48_spill] sm:$0xff] }
 0x39c   : > { %9306 = vst [vmem:[#allocation204_spill] sm:$0xff] %v7196_v8  ;;  %9310 = vst [vmem:[#allocation206_spill] sm:$0xff] %v7202_v19  ;;  %v3704_v48 = vsub.f32 %v9300_v62, %v9311_v42  ;;  %v2403_v0 = vand.u32 4294901760, %v2402_v5  ;;  %v2415_v26 = vand.u32 4294901760, %v2414_v36  ;;  %v9316_v29 = vand.u32 4294901760, %v9303_v47 }
 0x39d   : > { %v3716_v45 = vsub.f32 %v9301_v13, %v9312_v35  ;;  %9313 = vst [vmem:[#allocation207_spill] sm:$0xff] %v7210_v20  ;;  %9314 = vst [vmem:[#allocation208_spill] sm:$0xff] %v7212_v21  ;;  %v3710_v51 = vsub.f32 %v9302_v3, %v9315_v43  ;;  %v9317_v42 = vand.u32 4294901760, %v9304_v22  ;;  %v2432_v55 = vsub.f32 %v9305_v10, %v8834_v49  ;;  %v9321_v35 = vld [vmem:[#allocation49_spill] sm:$0xff]  ;;  %v9322_v13 = vld [vmem:[#allocation51_spill] sm:$0xff] }
 0x39e   : > { %v3722_v24 = vsub.f32 %v9303_v47, %v9316_v29  ;;  %v9318_v57 = vand.u32 4294901760, %v9307_v56  ;;  %v9319_v5 = vand.u32 4294901760, %v9308_v7  ;;  %v3705_v47 = vand.u32 4294901760, %v3704_v48  ;;  %v9324_v49 = vld [vmem:[#allocation54_spill] sm:$0xff]  ;;  %v9325_v21 = vld [vmem:[#allocation55_spill] sm:$0xff] }
 0x39f   : > { %v2420_v46 = vsub.f32 %v9304_v22, %v9317_v42  ;;  %v3717_v3 = vand.u32 4294901760, %v3716_v45  ;;  %v8839_v42 = vand.u32 4294901760, %v9322_v13  ;;  %v9323_v22 = vld [vmem:[#allocation52_spill] sm:$0xff]  ;;  %v3711_v20 = vand.u32 4294901760, %v3710_v51 }
 0x3a0   : > { %v2426_v61 = vsub.f32 %v9307_v56, %v9318_v57  ;;  %v2438_v43 = vsub.f32 %v9308_v7, %v9319_v5  ;;  %v9326_v57 = vld [vmem:[#allocation57_spill] sm:$0xff]  ;;  %v3723_v11 = vand.u32 4294901760, %v3722_v24  ;;  %v2433_v5 = vand.u32 4294901760, %v2432_v55  ;;  %v9327_v7 = vld [vmem:[#allocation58_spill] sm:$0xff] }
 0x3a1   : > { %v8846_v56 = vand.u32 4294901760, %v9326_v57  ;;  %v2421_v8 = vand.u32 4294901760, %v2420_v46  ;;  %v8848_v36 = vand.u32 4294901760, %v9327_v7  ;;  %v9328_v48 = vand.u32 4294901760, %v9320_v4 }
 0x3a2   : > { %v2427_v52 = vand.u32 4294901760, %v2426_v61  ;;  %v2439_v29 = vand.u32 4294901760, %v2438_v43  ;;  %v9329_v62 = vand.u32 4294901760, %v9321_v35  ;;  %v7246_v10 = vpack.c.bf16 %v2415_v26, %v2403_v0  ;;  %v9356_v0 = vld [vmem:[#allocation76_spill] sm:$0xff] }
 0x3a3   : > { %v3728_v45 = vsub.f32 %v9320_v4, %v9328_v48  ;;  %v7248_v19 = vpack.c.bf16 %v3717_v3, %v3705_v47  ;;  %v3734_v46 = vsub.f32 %v9322_v13, %v8839_v42  ;;  %v9332_v24 = vand.u32 4294901760, %v9323_v22  ;;  %v9335_v47 = vld [vmem:[#allocation60_spill] sm:$0xff] }
 0x3a4   : > { %v3740_v51 = vsub.f32 %v9321_v35, %v9329_v62  ;;  %9330 = vst [vmem:[#allocation209_spill] sm:$0xff] %v7246_v10  ;;  %v9333_v61 = vand.u32 4294901760, %v9324_v49  ;;  %v9334_v48 = vand.u32 4294901760, %v9325_v21  ;;  %v2450_v3 = vsub.f32 %v9326_v57, %v8846_v56  ;;  %v9341_v57 = vld [vmem:[#allocation64_spill] sm:$0xff] }
 0x3a5   : > { %9331 = vst [vmem:[#allocation210_spill] sm:$0xff] %v7248_v19  ;;  %v3746_v55 = vsub.f32 %v9323_v22, %v9332_v24  ;;  %v7266_v26 = vpack.c.bf16 %v3723_v11, %v3711_v20  ;;  %v7268_v42 = vpack.c.bf16 %v2433_v5, %v2421_v8  ;;  %v2462_v24 = vsub.f32 %v9327_v7, %v8848_v36  ;;  %v9338_v22 = vld [vmem:[#allocation61_spill] sm:$0xff]  ;;  %v9342_v20 = vld [vmem:[#allocation66_spill] sm:$0xff] }
 0x3a6   : > { %v2444_v43 = vsub.f32 %v9324_v49, %v9333_v61  ;;  %v2456_v62 = vsub.f32 %v9325_v21, %v9334_v48  ;;  %v7274_v13 = vpack.c.bf16 %v2439_v29, %v2427_v52  ;;  %v3729_v49 = vand.u32 4294901760, %v3728_v45  ;;  %v9340_v21 = vld [vmem:[#allocation63_spill] sm:$0xff]  ;;  %v9349_v7 = vld [vmem:[#allocation73_spill] sm:$0xff] }
 0x3a7   : > { %9336 = vst [vmem:[#allocation211_spill] sm:$0xff] %v7266_v26  ;;  %9337 = vst [vmem:[#allocation212_spill] sm:$0xff] %v7268_v42  ;;  %v3741_v48 = vand.u32 4294901760, %v3740_v51  ;;  %v8852_v35 = vand.u32 4294901760, %v9340_v21  ;;  %v3735_v4 = vand.u32 4294901760, %v3734_v46  ;;  %v3747_v56 = vand.u32 4294901760, %v3746_v55 }
 0x3a8   : > { %9339 = vst [vmem:[#allocation213_spill] sm:$0xff] %v7274_v13  ;;  %v2445_v8 = vand.u32 4294901760, %v2444_v43  ;;  %v2457_v5 = vand.u32 4294901760, %v2456_v62  ;;  %v2451_v26 = vand.u32 4294901760, %v2450_v3  ;;  %v9343_v42 = vand.u32 4294901760, %v9335_v47  ;;  %v9345_v45 = vld [vmem:[#allocation67_spill] sm:$0xff] }
 0x3a9   : > { %v2463_v61 = vand.u32 4294901760, %v2462_v24  ;;  %v9344_v52 = vand.u32 4294901760, %v9338_v22  ;;  %v9346_v46 = vld [vmem:[#allocation69_spill] sm:$0xff]  ;;  %v3758_v11 = vsub.f32 %v9340_v21, %v8852_v35  ;;  %v9347_v43 = vld [vmem:[#allocation70_spill] sm:$0xff]  ;;  %v9348_v3 = vld [vmem:[#allocation72_spill] sm:$0xff]  ;;  %v9351_v24 = vand.u32 4294901760, %v9341_v57 }
 0x3aa   : > { %v3752_v36 = vsub.f32 %v9335_v47, %v9343_v42  ;;  %v7293_v42 = vpack.c.bf16 %v3741_v48, %v3729_v49  ;;  %v9352_v51 = vand.u32 4294901760, %v9342_v20  ;;  %v7302_v10 = vpack.c.bf16 %v3747_v56, %v3735_v4 }
 0x3ab   : > { %v3764_v29 = vsub.f32 %v9338_v22, %v9344_v52  ;;  %v3770_v52 = vsub.f32 %v9341_v57, %v9351_v24  ;;  %v9353_v22 = vld [vmem:[#allocation75_spill] sm:$0xff]  ;;  %v7304_v35 = vpack.c.bf16 %v2457_v5, %v2445_v8  ;;  %v8864_v21 = vand.u32 4294901760, %v9356_v0 }
 0x3ac   : > { %9350 = vst [vmem:[#allocation214_spill] sm:$0xff] %v7293_v42  ;;  %v2468_v55 = vsub.f32 %v9342_v20, %v9352_v51  ;;  %v8861_v47 = vand.u32 4294901760, %v9353_v22  ;;  %9354 = vst [vmem:[#allocation215_spill] sm:$0xff] %v7302_v10  ;;  %v3753_v62 = vand.u32 4294901760, %v3752_v36  ;;  %v7307_v13 = vpack.c.bf16 %v2463_v61, %v2451_v26 }
 0x3ad   : > { %9355 = vst [vmem:[#allocation216_spill] sm:$0xff] %v7304_v35  ;;  %v3765_v49 = vand.u32 4294901760, %v3764_v29  ;;  %v9358_v48 = vand.u32 4294901760, %v9345_v45  ;;  %v9359_v57 = vand.u32 4294901760, %v9346_v46  ;;  %v3759_v20 = vand.u32 4294901760, %v3758_v11  ;;  %v9369_v11 = vld [vmem:[#allocation87_spill] sm:$0xff] }
 0x3ae   : > { %9357 = vst [vmem:[#allocation217_spill] sm:$0xff] %v7307_v13  ;;  %v9360_v56 = vand.u32 4294901760, %v9347_v43  ;;  %v9361_v36 = vand.u32 4294901760, %v9348_v3  ;;  %v9362_v26 = vand.u32 4294901760, %v9349_v7  ;;  %v3771_v5 = vand.u32 4294901760, %v3770_v52  ;;  %v9367_v52 = vld [vmem:[#allocation84_spill] sm:$0xff] }
 0x3af   : > { %v2480_v24 = vsub.f32 %v9345_v45, %v9358_v48  ;;  %v2474_v51 = vsub.f32 %v9346_v46, %v9359_v57  ;;  %v2469_v29 = vand.u32 4294901760, %v2468_v55  ;;  %v3782_v48 = vsub.f32 %v9353_v22, %v8861_v47  ;;  %v9363_v57 = vld [vmem:[#allocation78_spill] sm:$0xff]  ;;  %v9365_v45 = vld [vmem:[#allocation81_spill] sm:$0xff] }
 0x3b0   : > { %v2486_v4 = vsub.f32 %v9347_v43, %v9360_v56  ;;  %v3776_v8 = vsub.f32 %v9348_v3, %v9361_v36  ;;  %v3788_v61 = vsub.f32 %v9349_v7, %v9362_v26  ;;  %v3794_v56 = vsub.f32 %v9356_v0, %v8864_v21  ;;  %v9364_v43 = vld [vmem:[#allocation79_spill] sm:$0xff]  ;;  %v9366_v3 = vld [vmem:[#allocation82_spill] sm:$0xff]  ;;  %v9368_v7 = vld [vmem:[#allocation85_spill] sm:$0xff] }
 0x3b1   : > { %v2481_v10 = vand.u32 4294901760, %v2480_v24  ;;  %v2475_v26 = vand.u32 4294901760, %v2474_v51  ;;  %v8865_v55 = vand.u32 4294901760, %v9367_v52  ;;  %v8871_v19 = vand.u32 4294901760, %v9369_v11 }
 0x3b2   : > { %v2487_v42 = vand.u32 4294901760, %v2486_v4  ;;  %v3777_v47 = vand.u32 4294901760, %v3776_v8  ;;  %v3789_v22 = vand.u32 4294901760, %v3788_v61  ;;  %v7337_v9 = vpack.c.bf16 %v3765_v49, %v3753_v62 }
 0x3b3   : > { %v7339_v21 = vpack.c.bf16 %v3771_v5, %v3759_v20  ;;  %v3783_v46 = vand.u32 4294901760, %v3782_v48  ;;  %v9372_v36 = vand.u32 4294901760, %v9363_v57  ;;  %v3795_v24 = vand.u32 4294901760, %v3794_v56  ;;  %v9378_v56 = vld [vmem:[#allocation88_spill] sm:$0xff] }
 0x3b4   : > { %9370 = vst [vmem:[#allocation218_spill] sm:$0xff] %v7337_v9  ;;  %v9373_v51 = vand.u32 4294901760, %v9364_v43  ;;  %v9374_v4 = vand.u32 4294901760, %v9365_v45  ;;  %v9375_v20 = vand.u32 4294901760, %v9366_v3  ;;  %v7361_v49 = vpack.c.bf16 %v2481_v10, %v2469_v29  ;;  %v9381_v29 = vld [vmem:[#allocation90_spill] sm:$0xff] }
 0x3b5   : > { %9371 = vst [vmem:[#allocation219_spill] sm:$0xff] %v7339_v21  ;;  %v7344_v13 = vsub.f32 %v9363_v57, %v9372_v36  ;;  %v7366_v61 = vsub.f32 %v9367_v52, %v8865_v55  ;;  %v9377_v5 = vand.u32 4294901760, %v9368_v7  ;;  %v7381_v10 = vsub.f32 %v9369_v11, %v8871_v19  ;;  %v9383_v52 = vld [vmem:[#allocation93_spill] sm:$0xff] }
 0x3b6   : > { %v7349_v35 = vsub.f32 %v9364_v43, %v9373_v51  ;;  %v7354_v8 = vsub.f32 %v9365_v45, %v9374_v4  ;;  %v7359_v62 = vsub.f32 %v9366_v3, %v9375_v20  ;;  %9376 = vst [vmem:[#allocation220_spill] sm:$0xff] %v7361_v49  ;;  %v7374_v51 = vpack.c.bf16 %v2487_v42, %v2475_v26  ;;  %v9382_v3 = vld [vmem:[#allocation91_spill] sm:$0xff]  ;;  %v9391_v42 = vld [vmem:[#allocation97_spill] sm:$0xff] }
 0x3b7   : > { %v7371_v48 = vsub.f32 %v9368_v7, %v9377_v5  ;;  %v7376_v4 = vpack.c.bf16 %v3789_v22, %v3777_v47  ;;  %v9384_v7 = vld [vmem:[#allocation94_spill] sm:$0xff]  ;;  %v7388_v36 = vpack.c.bf16 %v3795_v24, %v3783_v46  ;;  %v9386_v55 = vand.u32 4294901760, %v9378_v56  ;;  %v9387_v5 = vld [vmem:[#allocation96_spill] sm:$0xff] }
 0x3b8   : > { %9379 = vst [vmem:[#allocation221_spill] sm:$0xff] %v7374_v51  ;;  %v8877_v0 = vand.u32 4294901760, %v9384_v7  ;;  %v9388_v24 = vand.u32 4294901760, %v9381_v29  ;;  %v9389_v19 = vand.u32 4294901760, %v9382_v3  ;;  %v9392_v26 = vand.u32 4294901760, %v6931_v17  ;;  %v9396_v51 = vld [vmem:[#allocation100_spill] sm:$0xff] }
 0x3b9   : > { %9380 = vst [vmem:[#allocation222_spill] sm:$0xff] %v7376_v4  ;;  %9385 = vst [vmem:[#allocation223_spill] sm:$0xff] %v7388_v36  ;;  %v7398_v45 = vsub.f32 %v9378_v56, %v9386_v55  ;;  %v9390_v55 = vand.u32 4294901760, %v9383_v52  ;;  %v8884_v43 = vand.u32 4294901760, %v6952_v14  ;;  %v8885_v36 = vand.u32 4294901760, %v6957_v30 }
 0x3ba   : > { %v7405_v22 = vsub.f32 %v9381_v29, %v9388_v24  ;;  %v7412_v47 = vsub.f32 %v9382_v3, %v9389_v19  ;;  %v7422_v46 = vsub.f32 %v9384_v7, %v8877_v0  ;;  %v8882_v24 = vand.u32 4294901760, %v6942_v41  ;;  %v9395_v0 = vld [vmem:[#allocation99_spill] sm:$0xff] }
 0x3bb   : > { %v7417_v20 = vsub.f32 %v9383_v52, %v9390_v55  ;;  %v3902_v11 = vsub.f32 %v6931_v17, %v9392_v26  ;;  %v9393_v19 = vand.u32 4294901760, %v6936_v12  ;;  %v8883_v55 = vand.u32 4294901760, %v6947_v1 }
 0x3bc   : > { %v9394_v52 = vand.u32 4294901760, %v9387_v5  ;;  %v2612_v56 = vsub.f32 %v6942_v41, %v8882_v24  ;;  %v2618_v7 = vsub.f32 %v6952_v14, %v8884_v43  ;;  %v8888_v4 = vand.u32 4294901760, %v6973_v33 }
 0x3bd   : > { %v3914_v3 = vsub.f32 %v6936_v12, %v9393_v19  ;;  %v3903_v26 = vand.u32 4294901760, %v3902_v11  ;;  %v2624_v19 = vsub.f32 %v6947_v1, %v8883_v55  ;;  %v8887_v11 = vand.u32 4294901760, %v6968_v34 }
 0x3be   : > { %v7436_v29 = vsub.f32 %v9387_v5, %v9394_v52  ;;  %v2613_v52 = vand.u32 4294901760, %v2612_v56  ;;  %v8886_v5 = vand.u32 4294901760, %v6963_v40  ;;  %v2619_v55 = vand.u32 4294901760, %v2618_v7 }
 0x3bf   : > { %v3915_v57 = vand.u32 4294901760, %v3914_v3  ;;  %v2625_v21 = vand.u32 4294901760, %v2624_v19  ;;  %v2630_v3 = vsub.f32 %v6957_v30, %v8885_v36  ;;  %v8889_v43 = vand.u32 4294901760, %v6978_v23 }
 0x3c0   : > { %v3920_v56 = vsub.f32 %v6963_v40, %v8886_v5  ;;  %v8892_v19 = vand.u32 4294901760, %v6983_v27  ;;  %v3926_v7 = vsub.f32 %v6973_v33, %v8888_v4  ;;  %v8895_v9 = vand.u32 4294901760, %v6998_v53 }
 0x3c1   : > { %v7452_v24 = vpack.c.bf16 %v3915_v57, %v3903_v26  ;;  %v7463_v49 = vpack.c.bf16 %v2625_v21, %v2613_v52  ;;  %v2631_v57 = vand.u32 4294901760, %v2630_v3  ;;  %v3932_v26 = vsub.f32 %v6968_v34, %v8887_v11 }
 0x3c2   : > { %v3921_v36 = vand.u32 4294901760, %v3920_v56  ;;  %v3938_v5 = vsub.f32 %v6978_v23, %v8889_v43  ;;  %v2636_v3 = vsub.f32 %v6983_v27, %v8892_v19  ;;  %v8894_v11 = vand.u32 4294901760, %v6993_v15 }
 0x3c3   : > { %9397 = vst [vmem:[#allocation224_spill] sm:$0xff] %v7452_v24  ;;  %9398 = vst [vmem:[#allocation225_spill] sm:$0xff] %v7463_v49  ;;  %v8893_v24 = vand.u32 4294901760, %v6988_v60  ;;  %v7476_v21 = vpack.c.bf16 %v2631_v57, %v2619_v55  ;;  %v3933_v52 = vand.u32 4294901760, %v3932_v26  ;;  %v3927_v56 = vand.u32 4294901760, %v3926_v7 }
 0x3c4   : > { %v3939_v49 = vand.u32 4294901760, %v3938_v5  ;;  %v2637_v23 = vand.u32 4294901760, %v2636_v3  ;;  %v2642_v55 = vsub.f32 %v6993_v15, %v8894_v11  ;;  %v8896_v57 = vand.u32 4294901760, %v7003_v44 }
 0x3c5   : > { %9399 = vst [vmem:[#allocation226_spill] sm:$0xff] %v7476_v21  ;;  %v2648_v4 = vsub.f32 %v6988_v60, %v8893_v24  ;;  %v7486_v43 = vpack.c.bf16 %v3933_v52, %v3921_v36  ;;  %v2654_v5 = vsub.f32 %v6998_v53, %v8895_v9  ;;  %v8897_v7 = vand.u32 4294901760, %v7008_v32 }
 0x3c6   : > { %v7492_v26 = vpack.c.bf16 %v3939_v49, %v3927_v56  ;;  %v2643_v24 = vand.u32 4294901760, %v2642_v55  ;;  %v3944_v36 = vsub.f32 %v7003_v44, %v8896_v57  ;;  %v8898_v52 = vand.u32 4294901760, %v7013_v38 }
 0x3c7   : > { %9400 = vst [vmem:[#allocation227_spill] sm:$0xff] %v7486_v43  ;;  %v2649_v19 = vand.u32 4294901760, %v2648_v4  ;;  %v8899_v3 = vand.u32 4294901760, %v7018_v37  ;;  %v2655_v49 = vand.u32 4294901760, %v2654_v5  ;;  %v3956_v4 = vsub.f32 %v7008_v32, %v8897_v7 }
 0x3c8   : > { %9401 = vst [vmem:[#allocation228_spill] sm:$0xff] %v7492_v26  ;;  %v8900_v56 = vand.u32 4294901760, %v7023_v28  ;;  %v3945_v9 = vand.u32 4294901760, %v3944_v36  ;;  %v3950_v55 = vsub.f32 %v7013_v38, %v8898_v52  ;;  %v8901_v26 = vand.u32 4294901760, %v7028_v59 }
 0x3c9   : > { %v7503_v11 = vpack.c.bf16 %v2649_v19, %v2637_v23  ;;  %v3962_v57 = vsub.f32 %v7018_v37, %v8899_v3  ;;  %v7516_v23 = vpack.c.bf16 %v2655_v49, %v2643_v24  ;;  %v3957_v19 = vand.u32 4294901760, %v3956_v4  ;;  %v9508_v37 = vld [vmem:[#allocation121_spill] sm:$0xff] }
 0x3ca   : > { %v2660_v5 = vsub.f32 %v7023_v28, %v8900_v56  ;;  %v8902_v7 = vand.u32 4294901760, %v7033_v58  ;;  %v3951_v36 = vand.u32 4294901760, %v3950_v55  ;;  %v2672_v52 = vsub.f32 %v7028_v59, %v8901_v26  ;;  %v9510_v59 = vld [vmem:[#allocation221_spill] sm:$0xff]  ;;  %v9520_v28 = vld [vmem:[#allocation124_spill] sm:$0xff] }
 0x3cb   : > { %9402 = vst [vmem:[#allocation229_spill] sm:$0xff] %v7503_v11  ;;  %9403 = vst [vmem:[#allocation230_spill] sm:$0xff] %v7516_v23  ;;  %v3963_v11 = vand.u32 4294901760, %v3962_v57  ;;  %v8903_v21 = vand.u32 4294901760, %v7038_v6  ;;  %v7526_v3 = vpack.c.bf16 %v3957_v19, %v3945_v9  ;;  %v8904_v49 = vand.u32 4294901760, %v7043_v54 }
 0x3cc   : > { %v2661_v43 = vand.u32 4294901760, %v2660_v5  ;;  %v2666_v24 = vsub.f32 %v7033_v58, %v8902_v7  ;;  %v2673_v56 = vand.u32 4294901760, %v2672_v52  ;;  %v8905_v55 = vand.u32 4294901760, %v7048_v39  ;;  %v9498_v58 = vld [vmem:[#allocation219_spill] sm:$0xff] }
 0x3cd   : > { %9404 = vst [vmem:[#allocation231_spill] sm:$0xff] %v7526_v3  ;;  %v7532_v4 = vpack.c.bf16 %v3963_v11, %v3951_v36  ;;  %v2678_v57 = vsub.f32 %v7038_v6, %v8903_v21  ;;  %v3968_v9 = vsub.f32 %v7043_v54, %v8904_v49  ;;  %v8906_v19 = vand.u32 4294901760, %v7053_v25 }
 0x3ce   : > { %v2667_v26 = vand.u32 4294901760, %v2666_v24  ;;  %v8907_v5 = vand.u32 4294901760, %v7058_v63  ;;  %v7543_v7 = vpack.c.bf16 %v2673_v56, %v2661_v43  ;;  %v3980_v52 = vsub.f32 %v7048_v39, %v8905_v55 }
 0x3cf   : > { %9405 = vst [vmem:[#allocation232_spill] sm:$0xff] %v7532_v4  ;;  %v2679_v11 = vand.u32 4294901760, %v2678_v57  ;;  %v8910_v36 = vand.u32 4294901760, %v7063_v31  ;;  %v3969_v21 = vand.u32 4294901760, %v3968_v9  ;;  %v3974_v24 = vsub.f32 %v7053_v25, %v8906_v19  ;;  %v9407_v4 = vld [vmem:[#allocation179_spill] sm:$0xff] }
 0x3d0   : > { %9406 = vst [vmem:[#allocation233_spill] sm:$0xff] %v7543_v7  ;;  %v3986_v49 = vsub.f32 %v7058_v63, %v8907_v5  ;;  %v8913_v43 = vand.u32 4294901760, %v9407_v4  ;;  %v3981_v57 = vand.u32 4294901760, %v3980_v52  ;;  %v8914_v9 = vand.u32 4294901760, %v7071_v16 }
 0x3d1   : > { %v7556_v56 = vpack.c.bf16 %v2679_v11, %v2667_v26  ;;  %v2684_v55 = vsub.f32 %v7063_v31, %v8910_v36  ;;  %v3975_v7 = vand.u32 4294901760, %v3974_v24  ;;  %v8915_v52 = vand.u32 4294901760, %v7076_v18  ;;  %v6005_v36 = vld [vmem:[%s6311_s13] sm:$0xff] }
 0x3d2   : > { %v3987_v23 = vand.u32 4294901760, %v3986_v49  ;;  %v2696_v19 = vsub.f32 %v9407_v4, %v8913_v43  ;;  %v7566_v63 = vpack.c.bf16 %v3981_v57, %v3969_v21  ;;  %v2690_v11 = vsub.f32 %v7071_v16, %v8914_v9  ;;  %v6006_v49 = vld [vmem:[%s6311_s13 + $0x8] sm:$0xff] }
 0x3d3   : > { %9408 = vst [vmem:[#allocation234_spill] sm:$0xff] %v7556_v56  ;;  %v2685_v26 = vand.u32 4294901760, %v2684_v55  ;;  %v9413_v21 = vand.u32 4294901760, %v7074_v2  ;;  %v3992_v57 = vsub.f32 %v7076_v18, %v8915_v52  ;;  %v8922_v9 = vand.u32 4294901760, %v7078_v50 }
 0x3d4   : > { %9409 = vst [vmem:[#allocation235_spill] sm:$0xff] %v7566_v63  ;;  %v7578_v31 = vpack.c.bf16 %v3987_v23, %v3975_v7  ;;  %v2697_v43 = vand.u32 4294901760, %v2696_v19  ;;  %v2691_v5 = vand.u32 4294901760, %v2690_v11  ;;  %v9415_v7 = vld [vmem:[#allocation184_spill] sm:$0xff] }
 0x3d5   : > { %v2702_v55 = vsub.f32 %v7074_v2, %v9413_v21  ;;  %v8933_v23 = vand.u32 4294901760, %v9415_v7  ;;  %v3993_v11 = vand.u32 4294901760, %v3992_v57  ;;  %v9416_v21 = vld [vmem:[#allocation185_spill] sm:$0xff] }
 0x3d6   : > { %9412 = vst [vmem:[#allocation238_spill] sm:$0xff] %v7578_v31  ;;  %v8932_v31 = vand.u32 4294901760, %v9416_v21 }
 0x3d7   : > { %v2703_v19 = vand.u32 4294901760, %v2702_v55  ;;  %v3998_v55 = vsub.f32 %v9415_v7, %v8933_v23  ;;  %v9421_v23 = vld [vmem:[#allocation188_spill] sm:$0xff]  ;;  %v9422_v7 = vld [vmem:[#allocation190_spill] sm:$0xff] }
 0x3d8   : > { %v4010_v57 = vsub.f32 %v9416_v21, %v8932_v31  ;;  %v8940_v21 = vand.u32 4294901760, %v9421_v23  ;;  %v8942_v54 = vand.u32 4294901760, %v9422_v7 }
 0x3e5   : > { %v2066_v3 = vpop.permute.xlu1 %2065 }
 0x3e6   : > { %v7573_v56 = vmul.f32 %v6005_v36, %v2066_v3  ;;  %v7576_v24 = vmul.f32 %v6006_v49, %v2066_v3  ;;  %v7589_v3 = vpack.c.bf16 %v2697_v43, %v2685_v26  ;;  %v4004_v49 = vsub.f32 %v7078_v50, %v8922_v9 }
 0x3e7   : > { %v7600_v43 = vpack.c.bf16 %v2703_v19, %v2691_v5 }
 0x3e8   : > { %9410 = vst [vmem:[#allocation236_spill] sm:$0xff] %v7573_v56  ;;  %9411 = vst [vmem:[#allocation237_spill] sm:$0xff] %v7576_v24  ;;  %v2069_v36 = vrot.slane %v7573_v56, 4  ;;  %v2075_v63 = vrot.slane %v7576_v24, 4  ;;  %v4005_v26 = vand.u32 4294901760, %v4004_v49 }
 0x3e9   : > { %9414 = vst [vmem:[#allocation239_spill] sm:$0xff] %v7589_v3  ;;  %9417 = vst [vmem:[#allocation240_spill] sm:$0xff] %v7600_v43 }
 0x3ea   : > { %v2070_v52 = vmax.f32 %v7573_v56, %v2069_v36  ;;  %v2076_v18 = vmax.f32 %v7576_v24, %v2075_v63  ;;  %v2082_v2 = vadd.f32 %v2069_v36, %v7573_v56  ;;  %v2088_v16 = vadd.f32 %v2075_v63, %v7576_v24  ;;  %v9419_v63 = vld [vmem:[#allocation187_spill] sm:$0xff] }
 0x3eb   : > { %v7608_v25 = vpack.c.bf16 %v4005_v26, %v3993_v11  ;;  %v3999_v36 = vand.u32 4294901760, %v3998_v55  ;;  %v4011_v56 = vand.u32 4294901760, %v4010_v57  ;;  %v8938_v5 = vand.u32 4294901760, %v9419_v63 }
 0x3ec   : > { %v2071_v9 = vrot.slane %v2070_v52, 2  ;;  %v2077_v3 = vrot.slane %v2076_v18, 2  ;;  %v2083_v50 = vrot.slane %v2082_v2, 2  ;;  %v2089_v4 = vrot.slane %v2088_v16, 2 }
 0x3ed   : > { %9418 = vst [vmem:[#allocation241_spill] sm:$0xff] %v7608_v25  ;;  %v7611_v39 = vpack.c.bf16 %v4011_v56, %v3999_v36  ;;  %v2708_v31 = vsub.f32 %v9419_v63, %v8938_v5  ;;  %v9424_v5 = vld [vmem:[#allocation193_spill] sm:$0xff] }
 0x3ee   : > { %v2072_v19 = vmax.f32 %v2070_v52, %v2071_v9  ;;  %v2078_v49 = vmax.f32 %v2076_v18, %v2077_v3  ;;  %v2084_v24 = vadd.f32 %v2083_v50, %v2082_v2  ;;  %v2090_v43 = vadd.f32 %v2089_v4, %v2088_v16  ;;  %v9423_v2 = vld [vmem:[#allocation191_spill] sm:$0xff] }
 0x3ef   : > { %9420 = vst [vmem:[#allocation242_spill] sm:$0xff] %v7611_v39  ;;  %v2709_v25 = vand.u32 4294901760, %v2708_v31  ;;  %v2720_v50 = vsub.f32 %v9421_v23, %v8940_v21  ;;  %v2714_v16 = vsub.f32 %v9422_v7, %v8942_v54  ;;  %v8944_v18 = vand.u32 4294901760, %v9423_v2 }
 0x3f0   : > { %v2073_v11 = vrot.slane %v2072_v19, 1  ;;  %v2079_v26 = vrot.slane %v2078_v49, 1  ;;  %v2085_v55 = vrot.slane %v2084_v24, 1  ;;  %v2091_v57 = vrot.slane %v2090_v43, 1 }
 0x3f1   : > { %v2721_v3 = vand.u32 4294901760, %v2720_v50  ;;  %v2715_v36 = vand.u32 4294901760, %v2714_v16  ;;  %v2726_v31 = vsub.f32 %v9423_v2, %v8944_v18  ;;  %v8946_v39 = vand.u32 4294901760, %v9424_v5  ;;  %v9523_v2 = vld [vmem:[#allocation150_spill] sm:$0xff] }
 0x3f2   : > { %v2074_v4 = vmax.f32 %v2072_v19, %v2073_v11  ;;  %v2086_v56 = vadd.f32 %v2085_v55, %v2084_v24  ;;  %v2080_v9 = vmax.f32 %v2078_v49, %v2079_v26  ;;  %v2092_v52 = vadd.f32 %v2091_v57, %v2090_v43  ;;  %v9428_v43 = vld [vmem:[#allocation194_spill] sm:$0xff] }
 0x3f3   : > { %v7633_v7 = vpack.c.bf16 %v2721_v3, %v2709_v25  ;;  %v2727_v19 = vand.u32 4294901760, %v2726_v31  ;;  %v4016_v24 = vsub.f32 %v9424_v5, %v8946_v39  ;;  %v8945_v49 = vand.u32 4294901760, %v9428_v43 }
 0x3f4   : > { %v2093_v63 = vmul.f32 0.125, %v2086_v56  ;;  %v7629_v21 = vand.u32 4294901760, %v2074_v4  ;;  %v7631_v23 = vand.u32 4294901760, %v2080_v9  ;;  %v2094_v54 = vmul.f32 0.125, %v2092_v52  ;;  %v9434_v56 = vld [vmem:[#allocation196_spill] sm:$0xff] }
 0x3f5   : > { %9427 = vst [vmem:[#allocation245_spill] sm:$0xff] %v7633_v7  ;;  %v7649_v50 = vpack.c.bf16 %v2727_v19, %v2715_v36  ;;  %v4017_v25 = vand.u32 4294901760, %v4016_v24  ;;  %v4028_v16 = vsub.f32 %v9428_v43, %v8945_v49  ;;  %v8951_v52 = vand.u32 4294901760, %v9434_v56  ;;  %v9437_v19 = vld [vmem:[#allocation197_spill] sm:$0xff]  ;;  %v9438_v49 = vld [vmem:[#allocation199_spill] sm:$0xff] }
 0x3f6   : > { %9425 = vst [vmem:[#allocation243_spill] sm:$0xff] %v7629_v21  ;;  %9426 = vst [vmem:[#allocation244_spill] sm:$0xff] %v7631_v23  ;;  %v7639_v11 = vand.u32 4294901760, %v2093_v63  ;;  %v7642_v26 = vsub.f32 %v2080_v9, %v7631_v23  ;;  %v7645_v55 = vsub.f32 %v2074_v4, %v7629_v21  ;;  %v7647_v57 = vand.u32 4294901760, %v2094_v54 }
 0x3f7   : > { %9433 = vst [vmem:[#allocation250_spill] sm:$0xff] %v7649_v50  ;;  %v4029_v18 = vand.u32 4294901760, %v4028_v16  ;;  %v4022_v36 = vsub.f32 %v9434_v56, %v8951_v52  ;;  %v8959_v24 = vand.u32 4294901760, %v9437_v19  ;;  %v8962_v39 = vand.u32 4294901760, %v9438_v49 }
 0x3f8   : > { %9429 = vst [vmem:[#allocation246_spill] sm:$0xff] %v7639_v11  ;;  %9430 = vst [vmem:[#allocation247_spill] sm:$0xff] %v7642_v26  ;;  %v8952_v3 = vand.u32 4294901760, %v7642_v26  ;;  %v8955_v31 = vand.u32 4294901760, %v7645_v55  ;;  %v7658_v9 = vsub.f32 %v2094_v54, %v7647_v57  ;;  %v7661_v4 = vsub.f32 %v2093_v63, %v7639_v11 }
 0x3f9   : > { %9431 = vst [vmem:[#allocation248_spill] sm:$0xff] %v7645_v55  ;;  %9432 = vst [vmem:[#allocation249_spill] sm:$0xff] %v7647_v57  ;;  %v7676_v11 = vpack.c.bf16 %v4029_v18, %v4017_v25  ;;  %v4023_v50 = vand.u32 4294901760, %v4022_v36  ;;  %v4034_v52 = vsub.f32 %v9437_v19, %v8959_v24  ;;  %v2732_v7 = vsub.f32 %v9438_v49, %v8962_v39  ;;  %v9440_v25 = vld [vmem:[#allocation102_spill] sm:$0xff]  ;;  %v9442_v24 = vld [vmem:[#allocation201_spill] sm:$0xff] }
 0x3fa   : > { %9435 = vst [vmem:[#allocation251_spill] sm:$0xff] %v7658_v9  ;;  %9436 = vst [vmem:[#allocation252_spill] sm:$0xff] %v7661_v4  ;;  %v3639_v21 = vsub.f32 %v7642_v26, %v8952_v3  ;;  %v3645_v54 = vsub.f32 %v7645_v55, %v8955_v31  ;;  %v8965_v63 = vand.u32 4294901760, %v7658_v9  ;;  %v8968_v16 = vand.u32 4294901760, %v7661_v4  ;;  %v9444_v49 = vld [vmem:[#allocation203_spill] sm:$0xff]  ;;  %v9445_v36 = vld [vmem:[#allocation204_spill] sm:$0xff] }
 0x3fb   : > { %9439 = vst [vmem:[#allocation253_spill] sm:$0xff] %v7676_v11  ;;  %v4035_v55 = vand.u32 4294901760, %v4034_v52  ;;  %v9441_v11 = vld [vmem:[#allocation200_spill] sm:$0xff]  ;;  %v8969_v19 = vand.u32 4294901760, %v9442_v24  ;;  %v8971_v5 = vand.u32 4294901760, %v9444_v49 }
 0x3fc   : > { %v3640_v3 = vand.u32 4294901760, %v3639_v21  ;;  %v3646_v26 = vand.u32 4294901760, %v3645_v54  ;;  %v2355_v31 = vsub.f32 %v7658_v9, %v8965_v63  ;;  %v2361_v18 = vsub.f32 %v7661_v4, %v8968_v16  ;;  %v9443_v21 = vld [vmem:[#allocation103_spill] sm:$0xff] }
 0x3fd   : > { %v8970_v56 = vand.u32 4294901760, %v9441_v11  ;;  %v7695_v63 = vpack.c.bf16 %v4035_v55, %v4023_v50  ;;  %v2733_v9 = vand.u32 4294901760, %v2732_v7  ;;  %v2738_v52 = vsub.f32 %v9442_v24, %v8969_v19  ;;  %v9516_v24 = vld [vmem:[#allocation126_spill] sm:$0xff] }
 0x3fe   : > { %3641 = vmatprep.mubr.f32.mxu1 %v3640_v3  ;;  %v2356_v43 = vand.u32 4294901760, %v2355_v31  ;;  %v2362_v39 = vand.u32 4294901760, %v2361_v18  ;;  %v3819_v3 = vand.u32 4294901760, %v7398_v45  ;;  %v9446_v31 = vand.u32 4294901760, %v9391_v42  ;;  %v9449_v45 = vld [vmem:[#allocation105_spill] sm:$0xff] }
 0x3ff   : > { %3647 = vmatmul.mubr.f32.vlgmr.msra.gmra.mrb[4].mxu1 %v3646_v26  ;;  %v2744_v16 = vsub.f32 %v9441_v11, %v8970_v56  ;;  %v9447_v55 = vand.u32 4294901760, %v9395_v0  ;;  %v2750_v50 = vsub.f32 %v9444_v49, %v8971_v5  ;;  %v9448_v18 = vand.u32 4294901760, %v9396_v51  ;;  %v9518_v49 = vld [vmem:[#allocation223_spill] sm:$0xff] }
 0x400   : > { %5551 = vmatpush1.bf16.msra.mxu1 %v9445_v36  ;;  %2357 = vmatprep.mubr.f32.mxu0 %v2356_v43  ;;  %v3836_v26 = vsub.f32 %v9391_v42, %v9446_v31  ;;  %v2739_v56 = vand.u32 4294901760, %v2738_v52  ;;  %v9450_v31 = vld [vmem:[#allocation205_spill] sm:$0xff]  ;;  %v9452_v5 = vand.u32 4294901760, %v9443_v21  ;;  %v9455_v36 = vld [vmem:[#allocation208_spill] sm:$0xff]  ;;  %v2529_v52 = vand.u32 4294901760, %v7412_v47 }
 0x401   : > { %v3830_v7 = vsub.f32 %v9395_v0, %v9447_v55  ;;  %4038 = vmatprep.mubr.f32.mxu1 %v7631_v23  ;;  %2363 = vmatmul.mubr.f32.vlgmr.msra.gmra.mrb[2].mxu0 %v2362_v39  ;;  %v3842_v43 = vsub.f32 %v9396_v51, %v9448_v18  ;;  %v2745_v19 = vand.u32 4294901760, %v2744_v16  ;;  %v9451_v55 = vand.u32 4294901760, %v9440_v25  ;;  %v9453_v23 = vld [vmem:[#allocation106_spill] sm:$0xff] }
 0x402   : > { %5167 = vmatpush1.bf16.msra.mxu0 %v9450_v31  ;;  %2754 = vmatprep.mubr.f32.mxu0 %v7647_v57  ;;  %v2552_v39 = vsub.f32 %v9443_v21, %v9452_v5  ;;  %v2751_v0 = vand.u32 4294901760, %v2750_v50  ;;  %v9454_v18 = vld [vmem:[#allocation206_spill] sm:$0xff]  ;;  %v2517_v16 = vand.u32 4294901760, %v7405_v22  ;;  %v9456_v31 = vld [vmem:[#allocation108_spill] sm:$0xff]  ;;  %v2535_v5 = vand.u32 4294901760, %v7422_v46 }
 0x403   : > { %v2540_v54 = vsub.f32 %v9440_v25, %v9451_v55  ;;  %5553 = vmatprep.subr.bf16.mxu1 %v9454_v18  ;;  %5169 = vmatprep.subr.bf16.mxu0 %v9455_v36  ;;  %v7733_v51 = vpack.c.bf16 %v2745_v19, %v2733_v9  ;;  %v9457_v55 = vld [vmem:[#allocation207_spill] sm:$0xff]  ;;  %v2523_v25 = vand.u32 4294901760, %v7417_v20  ;;  %v3825_v50 = vand.u32 4294901760, %v7436_v29  ;;  %v9458_v18 = vld [vmem:[#allocation210_spill] sm:$0xff]  ;;  %v9460_v19 = vld [vmem:[#allocation209_spill] sm:$0xff] }
 0x404   : > { %5555 = vmatpush1.bf16.msra.mxu1 %v9457_v55  ;;  %v7739_v4 = vpack.c.bf16 %v2751_v0, %v2739_v56  ;;  %v3837_v36 = vand.u32 4294901760, %v3836_v26  ;;  %v3831_v22 = vand.u32 4294901760, %v3830_v7  ;;  %v3843_v21 = vand.u32 4294901760, %v3842_v43  ;;  %v9462_v0 = vld [vmem:[#allocation109_spill] sm:$0xff]  ;;  %v9463_v57 = vld [vmem:[#allocation212_spill] sm:$0xff] }
 0x405   : > { %5557 = vmatprep.subr.bf16.mxu1 %v9458_v18  ;;  %v9459_v47 = vand.u32 4294901760, %v9449_v45  ;;  %v2541_v55 = vand.u32 4294901760, %v2540_v54  ;;  %v2553_v20 = vand.u32 4294901760, %v2552_v39  ;;  %v9461_v46 = vand.u32 4294901760, %v9453_v23 }
 0x406   : > { %5171 = vmatpush1.bf16.msra.mxu0 %v9460_v19  ;;  %v9464_v26 = vand.u32 4294901760, %v7344_v13  ;;  %v9465_v7 = vand.u32 4294901760, %v7349_v35  ;;  %v9466_v18 = vand.u32 4294901760, %v7354_v8  ;;  %v9468_v54 = vand.u32 4294901760, %v9456_v31 }
 0x407   : > { %v7745_v9 = vsub.f32 %v9449_v45, %v9459_v47  ;;  %v2558_v29 = vsub.f32 %v9453_v23, %v9461_v46  ;;  %5173 = vmatprep.subr.bf16.mxu0 %v9463_v57  ;;  %v9467_v47 = vand.u32 4294901760, %v7359_v62  ;;  %v9469_v46 = vld [vmem:[#allocation111_spill] sm:$0xff]  ;;  %v9471_v13 = vand.u32 4294901760, %v7366_v61 }
 0x408   : > { %v5184_v43 = vpack.c.bf16 %v9465_v7, %v9464_v26  ;;  %v7766_v39 = vsub.f32 %v9456_v31, %v9468_v54  ;;  %v8983_v56 = vand.u32 4294901760, %v9469_v46  ;;  %v9470_v23 = vld [vmem:[#allocation211_spill] sm:$0xff]  ;;  %v9472_v35 = vand.u32 4294901760, %v7371_v48 }
 0x409   : > { %v7761_v19 = vpack.c.bf16 %v9467_v47, %v9466_v18  ;;  %5559 = vmatpush1.bf16.msra.mxu1 %v9470_v23  ;;  %v9473_v8 = vand.u32 4294901760, %v7381_v10  ;;  %v7780_v26 = vpack.c.bf16 %v2529_v52, %v2517_v16  ;;  %v7782_v7 = vpack.c.bf16 %v2535_v5, %v2523_v25  ;;  %v9474_v18 = vld [vmem:[#allocation214_spill] sm:$0xff]  ;;  %v9475_v23 = vld [vmem:[#allocation112_spill] sm:$0xff]  ;;  %v9519_v48 = vld [vmem:[#allocation123_spill] sm:$0xff] }
 0x40a   : > { %v7774_v57 = vpack.c.bf16 %v9472_v35, %v9471_v13  ;;  %5561 = vmatprep.subr.bf16.mxu1 %v9474_v18  ;;  %v7785_v47 = vpack.c.bf16 %v3837_v36, %v3825_v50  ;;  %v7787_v54 = vpack.c.bf16 %v3843_v21, %v3831_v22  ;;  %v2547_v61 = vand.u32 4294901760, %v7745_v9  ;;  %v9476_v13 = vld [vmem:[#allocation213_spill] sm:$0xff]  ;;  %v9478_v16 = vld [vmem:[#allocation114_spill] sm:$0xff]  ;;  %v9479_v5 = vld [vmem:[#allocation216_spill] sm:$0xff] }
 0x40b   : > { %v7778_v62 = vpack.c.bf16 %v3819_v3, %v9473_v8  ;;  %5175 = vmatpush1.bf16.msra.mxu0 %v9476_v13  ;;  %v7792_v35 = vpack.c.bf16 %v2553_v20, %v2541_v55  ;;  %v2559_v10 = vand.u32 4294901760, %v2558_v29  ;;  %v9477_v3 = vand.u32 4294901760, %v9462_v0  ;;  %v9480_v36 = vld [vmem:[#allocation115_spill] sm:$0xff]  ;;  %v9484_v9 = vld [vmem:[#allocation217_spill] sm:$0xff]  ;;  %v9489_v52 = vld [vmem:[#allocation220_spill] sm:$0xff] }
 0x40c   : > { %5177 = vmatprep.subr.bf16.mxu0 %v9479_v5  ;;  %v7805_v50 = vsub.f32 %v9469_v46, %v8983_v56  ;;  %v9481_v55 = vld [vmem:[#allocation215_spill] sm:$0xff]  ;;  %v9506_v29 = vld [vmem:[#allocation222_spill] sm:$0xff]  ;;  %v9507_v8 = vld [vmem:[#allocation120_spill] sm:$0xff]  ;;  %v9511_v15 = vand.u32 4294901760, %v9475_v23  ;;  %v9532_v6 = vand.u32 4294901760, %v9519_v48 }
 0x40d   : > { %v7797_v25 = vsub.f32 %v9462_v0, %v9477_v3  ;;  %5563 = vmatpush1.bf16.msra.mxu1 %v9481_v55  ;;  %v9483_v3 = vld [vmem:[#allocation218_spill] sm:$0xff]  ;;  %v9524_v21 = vld [vmem:[#allocation151_spill] sm:$0xff]  ;;  %v9527_v22 = vld [vmem:[#allocation129_spill] sm:$0xff] }
 0x40e   : > { %5565 = vmatprep.subr.bf16.mxu1 %v9483_v3  ;;  %v3866_v55 = vsub.f32 %v9475_v23, %v9511_v15  ;;  %v9514_v3 = vand.u32 4294901760, %v9478_v16  ;;  %v3855_v56 = vand.u32 4294901760, %v7805_v50  ;;  %v9528_v5 = vld [vmem:[#allocation130_spill] sm:$0xff] }
 0x40f   : > { %5179 = vmatpush1.bf16.msra.mxu0 %v9484_v9  ;;  %v9512_v9 = vld [vmem:[#allocation117_spill] sm:$0xff]  ;;  %v3861_v15 = vand.u32 4294901760, %v7797_v25  ;;  %v9529_v25 = vand.u32 4294901760, %v9516_v24 }
 0x410   : > { %5181 = vmatprep.subr.bf16.mxu0 %v9489_v52  ;;  %v5194_v52 = vpack.c.bf16 %v2559_v10, %v2547_v61  ;;  %v2564_v38 = vsub.f32 %v9478_v16, %v9514_v3  ;;  %v9517_v61 = vld [vmem:[#allocation127_spill] sm:$0xff]  ;;  %v9521_v3 = vand.u32 4294901760, %v9507_v8  ;;  %v9525_v50 = vand.u32 4294901760, %v9512_v9 }
 0x411   : > { %5567 = vmatpush1.bf16.msra.mxu1 %v9498_v58  ;;  %v9515_v58 = vand.u32 4294901760, %v9480_v36  ;;  %v9530_v53 = vand.u32 4294901760, %v9517_v61 }
 0x412   : > { %5569 = vmatprep.subr.bf16.mxu1 %v9506_v29  ;;  %v9513_v29 = vld [vmem:[#allocation118_spill] sm:$0xff]  ;;  %v2570_v11 = vsub.f32 %v9512_v9, %v9525_v50 }
 0x413   : > { %5183 = vmatpush1.bf16.msra.mxu0 %v9510_v59  ;;  %v2576_v13 = vsub.f32 %v9480_v36, %v9515_v58  ;;  %v3872_v58 = vsub.f32 %v9507_v8, %v9521_v3  ;;  %v9522_v59 = vand.u32 4294901760, %v9508_v37  ;;  %v2600_v50 = vsub.f32 %v9517_v61, %v9530_v53 }
 0x414   : > { %5185 = vmatprep.subr.bf16.mxu0 %v5184_v43  ;;  %v3867_v3 = vand.u32 4294901760, %v3866_v55  ;;  %v9534_v53 = vand.u32 4294901760, %v9523_v2 }
 0x415   : > { %5571 = vmatpush1.bf16.msra.mxu1 %v9518_v49  ;;  %v3884_v10 = vsub.f32 %v9508_v37, %v9522_v59  ;;  %v2565_v59 = vand.u32 4294901760, %v2564_v38  ;;  %v2577_v49 = vand.u32 4294901760, %v2576_v13  ;;  %v9533_v38 = vand.u32 4294901760, %v9520_v28 }
 0x416   : > { %5573 = vmatprep.subr.bf16.mxu1 %v7774_v57  ;;  %v9526_v57 = vand.u32 4294901760, %v9513_v29  ;;  %v2601_v32 = vand.u32 4294901760, %v2600_v50  ;;  %v9550_v50 = vld [vmem:[#allocation239_spill] sm:$0xff] }
 0x417   : > { %5187 = vmatpush1.bf16.msra.mxu0 %v7761_v19  ;;  %v2588_v19 = vsub.f32 %v9516_v24, %v9529_v25  ;;  %v3890_v13 = vsub.f32 %v9520_v28, %v9533_v38  ;;  %v3873_v25 = vand.u32 4294901760, %v3872_v58  ;;  %v3885_v44 = vand.u32 4294901760, %v3884_v10 }
 0x418   : > { %v2582_v43 = vsub.f32 %v9513_v29, %v9526_v57  ;;  %5189 = vmatprep.subr.bf16.mxu0 %v7780_v26  ;;  %v9531_v57 = vand.u32 4294901760, %v7766_v39  ;;  %v3878_v26 = vsub.f32 %v9519_v48, %v9532_v6  ;;  %v9535_v39 = vand.u32 4294901760, %v9524_v21 }
 0x419   : > { %5575 = vmatpush1.bf16.msra.mxu1 %v7778_v62  ;;  %v3896_v62 = vsub.f32 %v9523_v2, %v9534_v53  ;;  %v5196_v58 = vpack.c.bf16 %v2577_v49, %v2565_v59  ;;  %v2589_v53 = vand.u32 4294901760, %v2588_v19  ;;  %v9549_v19 = vld [vmem:[#allocation234_spill] sm:$0xff] }
 0x41a   : > { %v5580_v20 = vpack.c.bf16 %v3861_v15, %v9531_v57  ;;  %5577 = vmatprep.subr.bf16.mxu1 %v7785_v47  ;;  %v3908_v55 = vsub.f32 %v9524_v21, %v9535_v39  ;;  %v2571_v15 = vand.u32 4294901760, %v2570_v11  ;;  %v2583_v6 = vand.u32 4294901760, %v2582_v43 }
 0x41b   : > { %5191 = vmatpush1.bf16.msra.mxu0 %v7782_v7  ;;  %v9536_v57 = vand.u32 4294901760, %v9527_v22  ;;  %v9537_v47 = vand.u32 4294901760, %v9528_v5  ;;  %v5582_v39 = vpack.c.bf16 %v3867_v3, %v3855_v56  ;;  %v3879_v33 = vand.u32 4294901760, %v3878_v26  ;;  %v9538_v56 = vld [vmem:[#allocation225_spill] sm:$0xff]  ;;  %v9548_v3 = vld [vmem:[#allocation235_spill] sm:$0xff]  ;;  %v9551_v26 = vld [vmem:[#allocation238_spill] sm:$0xff] }
 0x41c   : > { %5193 = vmatprep.subr.bf16.mxu0 %v7792_v35  ;;  %v3891_v7 = vand.u32 4294901760, %v3890_v13  ;;  %v5584_v11 = vpack.c.bf16 %v3885_v44, %v3873_v25  ;;  %v3897_v43 = vand.u32 4294901760, %v3896_v62  ;;  %v3909_v18 = vand.u32 4294901760, %v3908_v55  ;;  %v9539_v44 = vld [vmem:[#allocation224_spill] sm:$0xff]  ;;  %v9552_v13 = vld [vmem:[#allocation241_spill] sm:$0xff]  ;;  %v9555_v55 = vld [vmem:[#allocation242_spill] sm:$0xff] }
 0x41d   : > { %v2594_v38 = vsub.f32 %v9527_v22, %v9536_v57  ;;  %v2606_v10 = vsub.f32 %v9528_v5, %v9537_v47  ;;  %5579 = vmatpush1.bf16.msra.mxu1 %v7787_v54  ;;  %v5198_v57 = vpack.c.bf16 %v2583_v6, %v2571_v15  ;;  %v5200_v47 = vpack.c.bf16 %v2601_v32, %v2589_v53  ;;  %v9540_v54 = vld [vmem:[#allocation227_spill] sm:$0xff]  ;;  %v9543_v32 = vld [vmem:[#allocation228_spill] sm:$0xff]  ;;  %v9554_v62 = vld [vmem:[#allocation245_spill] sm:$0xff] }
 0x41e   : > { %5581 = vmatprep.subr.bf16.mxu1 %v5580_v20  ;;  %v5586_v35 = vpack.c.bf16 %v3891_v7, %v3879_v33  ;;  %v5588_v49 = vpack.c.bf16 %v3909_v18, %v3897_v43  ;;  %v9541_v20 = vld [vmem:[#allocation226_spill] sm:$0xff]  ;;  %v9544_v33 = vld [vmem:[#allocation231_spill] sm:$0xff]  ;;  %v9553_v25 = vld [vmem:[#allocation240_spill] sm:$0xff] }
 0x41f   : > { %5195 = vmatpush1.bf16.msra.mxu0 %v5194_v52  ;;  %v2595_v27 = vand.u32 4294901760, %v2594_v38  ;;  %v2607_v60 = vand.u32 4294901760, %v2606_v10  ;;  %v9542_v52 = vld [vmem:[#allocation229_spill] sm:$0xff]  ;;  %v9545_v18 = vld [vmem:[#allocation230_spill] sm:$0xff]  ;;  %v9557_v6 = vld [vmem:[#allocation12_spill] sm:$0xff] }
 0x420   : > { %5197 = vmatprep.subr.bf16.mxu0 %v5196_v58  ;;  %v9556_v15 = vld [vmem:[#allocation253_spill] sm:$0xff]  ;;  %v9559_v58 = vld [vmem:[#allocation250_spill] sm:$0xff]  ;;  %v9563_v43 = vld [vmem:[#allocation16_spill] sm:$0xff] }
 0x421   : > { %5583 = vmatpush1.bf16.msra.mxu1 %v5582_v39  ;;  %v5202_v59 = vpack.c.bf16 %v2607_v60, %v2595_v27  ;;  %v9546_v27 = vld [vmem:[#allocation233_spill] sm:$0xff]  ;;  %v9547_v60 = vld [vmem:[#allocation232_spill] sm:$0xff]  ;;  %v9560_v53 = vld [vmem:[#allocation18_spill] sm:$0xff] }
 0x422   : > { %5585 = vmatprep.subr.bf16.mxu1 %v5584_v11  ;;  %v9558_v38 = vld [vmem:[#allocation13_spill] sm:$0xff]  ;;  %v9561_v39 = vld [vmem:[#allocation19_spill] sm:$0xff]  ;;  %v9562_v11 = vld [vmem:[#allocation14_spill] sm:$0xff] }
 0x423   : > { %5199 = vmatpush1.bf16.msra.mxu0 %v5198_v57  ;;  %v5612_v10 = vpack.c.bf16 %v9558_v38, %v9557_v6  ;;  %v5228_v7 = vpack.c.bf16 %v9561_v39, %v9560_v53  ;;  %v5614_v57 = vpack.c.bf16 %v9563_v43, %v9562_v11 }
 0x424   : > { %5201 = vmatprep.subr.bf16.mxu0 %v5200_v47  ;;  %v9564_v47 = vld [vmem:[#allocation23_spill] sm:$0xff] }
 0x425   : > { %5587 = vmatpush1.bf16.msra.mxu1 %v5586_v35  ;;  %v9565_v35 = vld [vmem:[#allocation25_spill] sm:$0xff] }
 0x426   : > { %5589 = vmatprep.subr.bf16.mxu1 %v5588_v49  ;;  %v5616_v49 = vpack.c.bf16 %v9565_v35, %v9564_v47 }
 0x427   : > { %5203 = vmatpush1.bf16.msra.mxu0 %v5202_v59  ;;  %v9566_v59 = vld [vmem:[#allocation21_spill] sm:$0xff] }
 0x428   : > { %5205 = vmatprep.subr.bf16.mxu0 %v9538_v56  ;;  %v9567_v56 = vld [vmem:[#allocation22_spill] sm:$0xff] }
 0x429   : > { %5591 = vmatpush1.bf16.msra.mxu1 %v9539_v44  ;;  %v5230_v44 = vpack.c.bf16 %v9567_v56, %v9566_v59 }
 0x42a   : > { %5593 = vmatprep.subr.bf16.mxu1 %v9540_v54  ;;  %v9568_v54 = vld [vmem:[#allocation243_spill] sm:$0xff] }
 0x42b   : > { %5207 = vmatpush1.bf16.msra.mxu0 %v9541_v20  ;;  %v9570_v20 = vld [vmem:[#allocation31_spill] sm:$0xff] }
 0x42c   : > { %5209 = vmatprep.subr.bf16.mxu0 %v9542_v52 }
 0x42d   : > { %5595 = vmatpush1.bf16.msra.mxu1 %v9543_v32  ;;  %v9572_v32 = vld [vmem:[#allocation27_spill] sm:$0xff] }
 0x42e   : > { %5597 = vmatprep.subr.bf16.mxu1 %v9544_v33  ;;  %v9573_v33 = vld [vmem:[#allocation28_spill] sm:$0xff] }
 0x42f   : > { %5211 = vmatpush1.bf16.msra.mxu0 %v9545_v18  ;;  %v5618_v18 = vpack.c.bf16 %v9573_v33, %v9572_v32 }
 0x430   : > { %5213 = vmatprep.subr.bf16.mxu0 %v9546_v27  ;;  %v9574_v27 = vld [vmem:[#allocation246_spill] sm:$0xff] }
 0x431   : > { %5599 = vmatpush1.bf16.msra.mxu1 %v9547_v60  ;;  %v9575_v60 = vld [vmem:[#allocation36_spill] sm:$0xff] }
 0x432   : > { %5601 = vmatprep.subr.bf16.mxu1 %v9548_v3 }
 0x433   : > { %5215 = vmatpush1.bf16.msra.mxu0 %v9549_v19  ;;  %v9577_v19 = vld [vmem:[#allocation251_spill] sm:$0xff] }
 0x434   : > { %5217 = vmatprep.subr.bf16.mxu0 %v9550_v50  ;;  %v9578_v50 = vld [vmem:[#allocation32_spill] sm:$0xff] }
 0x435   : > { %5603 = vmatpush1.bf16.msra.mxu1 %v9551_v26  ;;  %v9579_v26 = vld [vmem:[#allocation34_spill] sm:$0xff] }
 0x436   : > { %5605 = vmatprep.subr.bf16.mxu1 %v9552_v13  ;;  %v5234_v13 = vpack.c.bf16 %v9579_v26, %v9578_v50  ;;  %v9591_v50 = vld [vmem:[#allocation52_spill] sm:$0xff] }
 0x437   : > { %5219 = vmatpush1.bf16.msra.mxu0 %v9553_v25  ;;  %v9580_v25 = vld [vmem:[#allocation42_spill] sm:$0xff] }
 0x438   : > { %5221 = vmatprep.subr.bf16.mxu0 %v9554_v62  ;;  %v9581_v62 = vld [vmem:[#allocation43_spill] sm:$0xff] }
 0x439   : > { %5607 = vmatpush1.bf16.msra.mxu1 %v9555_v55  ;;  %v5236_v55 = vpack.c.bf16 %v9581_v62, %v9580_v25  ;;  %v9593_v25 = vld [vmem:[#allocation61_spill] sm:$0xff] }
 0x43a   : > { %5609 = vmatprep.subr.bf16.mxu1 %v9556_v15  ;;  %v9582_v15 = vld [vmem:[#allocation39_spill] sm:$0xff] }
 0x43b   : > { %5223 = vmatpush1.bf16.msra.mxu0 %v9559_v58 }
 0x43c   : > { %5225 = vmatprep.subr.bf16.mxu0 %v7733_v51  ;;  %v9569_v51 = vld [vmem:[#allocation29_spill] sm:$0xff] }
 0x43d   : > { %5611 = vmatpush1.bf16.msra.mxu1 %v7695_v63  ;;  %v5232_v52 = vpack.c.bf16 %v9570_v20, %v9569_v51  ;;  %v9571_v63 = vld [vmem:[#allocation247_spill] sm:$0xff] }
 0x43e   : > { %5613 = vmatprep.subr.bf16.mxu1 %v5612_v10  ;;  %v9583_v10 = vld [vmem:[#allocation40_spill] sm:$0xff] }
 0x43f   : > { %5227 = vmatpush1.bf16.msra.mxu0 %v7739_v4  ;;  %v9576_v4 = vld [vmem:[#allocation37_spill] sm:$0xff]  ;;  %v5622_v58 = vpack.c.bf16 %v9583_v10, %v9582_v15  ;;  %v9595_v15 = vld [vmem:[#allocation58_spill] sm:$0xff] }
 0x440   : > { %4040 = vmatmul.mubr.f32.vlgmr.msra.gmra.mrb[4].mxu1 %v9568_v54  ;;  %5229 = vmatprep.subr.bf16.mxu0 %v5228_v7  ;;  %v5620_v3 = vpack.c.bf16 %v9576_v4, %v9575_v60  ;;  %v9584_v7 = vld [vmem:[#allocation48_spill] sm:$0xff]  ;;  %v9588_v4 = vld [vmem:[#allocation54_spill] sm:$0xff]  ;;  %v9589_v60 = vld [vmem:[#allocation55_spill] sm:$0xff] }
 0x441   : > { %5615 = vmatpush1.bf16.msra.mxu1 %v5614_v57  ;;  %4240 = vmatprep.mubr.f32.mxu1 %v9571_v63  ;;  %v9585_v57 = vld [vmem:[#allocation49_spill] sm:$0xff]  ;;  %v5240_v26 = vpack.c.bf16 %v9589_v60, %v9588_v4 }
 0x442   : > { %2756 = vmatmul.mubr.f32.vlgmr.msra.gmra.mrb[2].mxu0 %v9574_v27  ;;  %5617 = vmatprep.subr.bf16.mxu1 %v5616_v49  ;;  %v5624_v49 = vpack.c.bf16 %v9585_v57, %v9584_v7  ;;  %v9586_v27 = vld [vmem:[#allocation45_spill] sm:$0xff]  ;;  %v9597_v7 = vld [vmem:[#allocation67_spill] sm:$0xff] }
 0x443   : > { %5231 = vmatpush1.bf16.msra.mxu0 %v5230_v44  ;;  %2956 = vmatprep.mubr.f32.mxu0 %v9577_v19  ;;  %v9587_v44 = vld [vmem:[#allocation46_spill] sm:$0xff]  ;;  %v9601_v4 = vld [vmem:[#allocation73_spill] sm:$0xff] }
 0x444   : > { %5233 = vmatprep.subr.bf16.mxu0 %v5232_v52  ;;  %v5238_v54 = vpack.c.bf16 %v9587_v44, %v9586_v27  ;;  %v9590_v52 = vld [vmem:[#allocation51_spill] sm:$0xff]  ;;  %v9599_v27 = vld [vmem:[#allocation64_spill] sm:$0xff] }
 0x445   : > { %5619 = vmatpush1.bf16.msra.mxu1 %v5618_v18  ;;  %v5626_v62 = vpack.c.bf16 %v9591_v50, %v9590_v52  ;;  %v9592_v18 = vld [vmem:[#allocation60_spill] sm:$0xff]  ;;  %v9603_v52 = vld [vmem:[#allocation70_spill] sm:$0xff] }
 0x446   : > { %5621 = vmatprep.subr.bf16.mxu1 %v5620_v3  ;;  %v5628_v10 = vpack.c.bf16 %v9593_v25, %v9592_v18  ;;  %v9594_v3 = vld [vmem:[#allocation57_spill] sm:$0xff]  ;;  %v9605_v18 = vld [vmem:[#allocation79_spill] sm:$0xff] }
 0x447   : > { %5235 = vmatpush1.bf16.msra.mxu0 %v5234_v13  ;;  %v5242_v57 = vpack.c.bf16 %v9595_v15, %v9594_v3  ;;  %v9596_v13 = vld [vmem:[#allocation66_spill] sm:$0xff]  ;;  %v9607_v3 = vld [vmem:[#allocation76_spill] sm:$0xff] }
 0x448   : > { %5237 = vmatprep.subr.bf16.mxu0 %v5236_v55  ;;  %v5244_v44 = vpack.c.bf16 %v9597_v7, %v9596_v13  ;;  %v9598_v55 = vld [vmem:[#allocation63_spill] sm:$0xff]  ;;  %v9609_v13 = vld [vmem:[#allocation85_spill] sm:$0xff] }
 0x449   : > { %5623 = vmatpush1.bf16.msra.mxu1 %v5622_v58  ;;  %v5630_v60 = vpack.c.bf16 %v9599_v27, %v9598_v55  ;;  %v9600_v58 = vld [vmem:[#allocation72_spill] sm:$0xff]  ;;  %v9611_v55 = vld [vmem:[#allocation82_spill] sm:$0xff] }
 0x44a   : > { %5625 = vmatprep.subr.bf16.mxu1 %v5624_v49  ;;  %v5632_v50 = vpack.c.bf16 %v9601_v4, %v9600_v58  ;;  %v9602_v49 = vld [vmem:[#allocation69_spill] sm:$0xff]  ;;  %v9613_v58 = vld [vmem:[#allocation91_spill] sm:$0xff] }
 0x44b   : > { %5239 = vmatpush1.bf16.msra.mxu0 %v5238_v54  ;;  %v5246_v25 = vpack.c.bf16 %v9603_v52, %v9602_v49  ;;  %v9604_v54 = vld [vmem:[#allocation78_spill] sm:$0xff]  ;;  %v9615_v49 = vld [vmem:[#allocation88_spill] sm:$0xff] }
 0x44c   : > { %5241 = vmatprep.subr.bf16.mxu0 %v5240_v26  ;;  %v5248_v15 = vpack.c.bf16 %v9605_v18, %v9604_v54  ;;  %v9606_v26 = vld [vmem:[#allocation75_spill] sm:$0xff] }
 0x44d   : > { %5627 = vmatpush1.bf16.msra.mxu1 %v5626_v62  ;;  %v5634_v7 = vpack.c.bf16 %v9607_v3, %v9606_v26  ;;  %v9608_v62 = vld [vmem:[#allocation84_spill] sm:$0xff]  ;;  %v9618_v26 = vld [vmem:[#allocation94_spill] sm:$0xff] }
 0x44e   : > { %5629 = vmatprep.subr.bf16.mxu1 %v5628_v10  ;;  %v5636_v27 = vpack.c.bf16 %v9609_v13, %v9608_v62  ;;  %v9610_v10 = vld [vmem:[#allocation81_spill] sm:$0xff]  ;;  %v9620_v62 = vld [vmem:[#allocation103_spill] sm:$0xff] }
 0x44f   : > { %5243 = vmatpush1.bf16.msra.mxu0 %v5242_v57  ;;  %v5250_v4 = vpack.c.bf16 %v9611_v55, %v9610_v10  ;;  %v9612_v57 = vld [vmem:[#allocation90_spill] sm:$0xff]  ;;  %v9622_v10 = vld [vmem:[#allocation100_spill] sm:$0xff] }
 0x450   : > { %5245 = vmatprep.subr.bf16.mxu0 %v5244_v44  ;;  %v5252_v52 = vpack.c.bf16 %v9613_v58, %v9612_v57  ;;  %v9614_v44 = vld [vmem:[#allocation87_spill] sm:$0xff] }
 0x451   : > { %5631 = vmatpush1.bf16.msra.mxu1 %v5630_v60  ;;  %v5638_v18 = vpack.c.bf16 %v9615_v49, %v9614_v44  ;;  %v9616_v60 = vld [vmem:[#allocation96_spill] sm:$0xff] }
 0x452   : > { %5633 = vmatprep.subr.bf16.mxu1 %v5632_v50  ;;  %v5640_v3 = vpack.c.bf16 %v9391_v42, %v9616_v60  ;;  %v9617_v50 = vld [vmem:[#allocation93_spill] sm:$0xff] }
 0x453   : > { %5247 = vmatpush1.bf16.msra.mxu0 %v5246_v25  ;;  %v5254_v13 = vpack.c.bf16 %v9618_v26, %v9617_v50  ;;  %v9619_v25 = vld [vmem:[#allocation102_spill] sm:$0xff] }
 0x454   : > { %5249 = vmatprep.subr.bf16.mxu0 %v5248_v15  ;;  %v5256_v55 = vpack.c.bf16 %v9620_v62, %v9619_v25  ;;  %v9621_v15 = vld [vmem:[#allocation99_spill] sm:$0xff] }
 0x455   : > { %5635 = vmatpush1.bf16.msra.mxu1 %v5634_v7  ;;  %v5642_v58 = vpack.c.bf16 %v9622_v10, %v9621_v15  ;;  %v5644_v7 = vpack.c.bf16 %v9462_v0, %v9456_v31 }
 0x456   : > { %5637 = vmatprep.subr.bf16.mxu1 %v5636_v27  ;;  %v9623_v27 = vld [vmem:[#allocation106_spill] sm:$0xff] }
 0x457   : > { %5251 = vmatpush1.bf16.msra.mxu0 %v5250_v4  ;;  %v5258_v42 = vpack.c.bf16 %v9623_v27, %v9449_v45  ;;  %v5260_v4 = vpack.c.bf16 %v9480_v36, %v9478_v16 }
 0x458   : > { %5253 = vmatprep.subr.bf16.mxu0 %v5252_v52  ;;  %v5646_v52 = vpack.c.bf16 %v9475_v23, %v9469_v46 }
 0x459   : > { %5639 = vmatpush1.bf16.msra.mxu1 %v5638_v18  ;;  %v5648_v18 = vpack.c.bf16 %v9508_v37, %v9507_v8 }
 0x45a   : > { %5641 = vmatprep.subr.bf16.mxu1 %v5640_v3  ;;  %v5262_v3 = vpack.c.bf16 %v9513_v29, %v9512_v9 }
 0x45b   : > { %5255 = vmatpush1.bf16.msra.mxu0 %v5254_v13  ;;  %v5264_v13 = vpack.c.bf16 %v9517_v61, %v9516_v24 }
 0x45c   : > { %5257 = vmatprep.subr.bf16.mxu0 %v5256_v55  ;;  %v5650_v55 = vpack.c.bf16 %v9520_v28, %v9519_v48 }
 0x45d   : > { %5643 = vmatpush1.bf16.msra.mxu1 %v5642_v58  ;;  %v5652_v58 = vpack.c.bf16 %v9524_v21, %v9523_v2 }
 0x45e   : > { %5645 = vmatprep.subr.bf16.mxu1 %v5644_v7  ;;  %v5266_v7 = vpack.c.bf16 %v9528_v5, %v9527_v22 }
 0x45f   : > { %5259 = vmatpush1.bf16.msra.mxu0 %v5258_v42  ;;  %v9624_v42 = vpack.c.bf16 %v6947_v1, %v6942_v41  ;;  %v9635_v41 = vld [vmem:[#allocation166_spill] sm:$0xff] }
 0x460   : > { %5261 = vmatprep.subr.bf16.mxu0 %v5260_v4  ;;  %v9625_v4 = vpack.c.bf16 %v6936_v12, %v6931_v17  ;;  %v9638_v17 = vld [vmem:[#allocation164_spill] sm:$0xff] }
 0x461   : > { %5647 = vmatpush1.bf16.msra.mxu1 %v5646_v52  ;;  %v9626_v52 = vpack.c.bf16 %v6968_v34, %v6963_v40  ;;  %v9641_v40 = vld [vmem:[#allocation170_spill] sm:$0xff] }
 0x462   : > { %5649 = vmatprep.subr.bf16.mxu1 %v5648_v18  ;;  %v9627_v18 = vpack.c.bf16 %v6957_v30, %v6952_v14  ;;  %v9644_v14 = vld [vmem:[#allocation168_spill] sm:$0xff] }
 0x463   : > { %5263 = vmatpush1.bf16.msra.mxu0 %v5262_v3  ;;  %v9628_v3 = vld [vmem:[#allocation163_spill] sm:$0xff] }
 0x464   : > { %5265 = vmatprep.subr.bf16.mxu0 %v5264_v13  ;;  %v9629_v13 = vld [vmem:[#allocation162_spill] sm:$0xff] }
 0x465   : > { %5651 = vmatpush1.bf16.msra.mxu1 %v5650_v55  ;;  %v9630_v55 = vpack.c.bf16 %v9628_v3, %v9629_v13  ;;  %v9647_v13 = vld [vmem:[#allocation174_spill] sm:$0xff] }
 0x466   : > { %5653 = vmatprep.subr.bf16.mxu1 %v5652_v58  ;;  %v9631_v58 = vld [vmem:[#allocation161_spill] sm:$0xff] }
 0x467   : > { %5267 = vmatpush1.bf16.msra.mxu0 %v5266_v7  ;;  %v9632_v7 = vld [vmem:[#allocation160_spill] sm:$0xff] }
 0x468   : > { %5269 = vmatprep.subr.bf16.mxu0 %v9624_v42  ;;  %v9633_v1 = vpack.c.bf16 %v9631_v58, %v9632_v7  ;;  %v9634_v42 = vld [vmem:[#allocation167_spill] sm:$0xff]  ;;  %v9650_v7 = vld [vmem:[#allocation172_spill] sm:$0xff] }
 0x469   : > { %5655 = vmatpush1.bf16.msra.mxu1 %v9625_v4  ;;  %v9636_v12 = vpack.c.bf16 %v9634_v42, %v9635_v41  ;;  %v9637_v4 = vld [vmem:[#allocation165_spill] sm:$0xff]  ;;  %v9653_v41 = vld [vmem:[#allocation178_spill] sm:$0xff] }
 0x46a   : > { %5657 = vmatprep.subr.bf16.mxu1 %v9626_v52  ;;  %v9639_v34 = vpack.c.bf16 %v9637_v4, %v9638_v17  ;;  %v9640_v52 = vld [vmem:[#allocation171_spill] sm:$0xff]  ;;  %v9656_v17 = vld [vmem:[#allocation176_spill] sm:$0xff] }
 0x46b   : > { %5271 = vmatpush1.bf16.msra.mxu0 %v9627_v18  ;;  %v9642_v30 = vpack.c.bf16 %v9640_v52, %v9641_v40  ;;  %v9643_v18 = vld [vmem:[#allocation169_spill] sm:$0xff]  ;;  %v9659_v40 = vld [vmem:[#allocation182_spill] sm:$0xff] }
 0x46c   : > { %5273 = vmatprep.subr.bf16.mxu0 %v9630_v55  ;;  %v9645_v3 = vpack.c.bf16 %v9643_v18, %v9644_v14  ;;  %v9646_v55 = vld [vmem:[#allocation175_spill] sm:$0xff]  ;;  %v9662_v14 = vld [vmem:[#allocation180_spill] sm:$0xff] }
 0x46d   : > { %5659 = vmatpush1.bf16.msra.mxu1 %v9633_v1  ;;  %v9648_v58 = vpack.c.bf16 %v9646_v55, %v9647_v13  ;;  %v9649_v1 = vld [vmem:[#allocation173_spill] sm:$0xff]  ;;  %v9665_v13 = vld [vmem:[#allocation187_spill] sm:$0xff] }
 0x46e   : > { %5661 = vmatprep.subr.bf16.mxu1 %v9636_v12  ;;  %v9651_v42 = vpack.c.bf16 %v9649_v1, %v9650_v7  ;;  %v9652_v12 = vld [vmem:[#allocation179_spill] sm:$0xff]  ;;  %v9668_v7 = vld [vmem:[#allocation184_spill] sm:$0xff] }
 0x46f   : > { %5275 = vmatpush1.bf16.msra.mxu0 %v9639_v34  ;;  %v9654_v4 = vpack.c.bf16 %v9652_v12, %v9653_v41  ;;  %v9655_v34 = vld [vmem:[#allocation177_spill] sm:$0xff] }
 0x470   : > { %5277 = vmatprep.subr.bf16.mxu0 %v9642_v30  ;;  %v9657_v52 = vpack.c.bf16 %v9655_v34, %v9656_v17  ;;  %v9658_v30 = vld [vmem:[#allocation183_spill] sm:$0xff]  ;;  %v9671_v41 = vld [vmem:[#allocation193_spill] sm:$0xff]  ;;  %v9674_v17 = vld [vmem:[#allocation190_spill] sm:$0xff] }
 0x471   : > { %5663 = vmatpush1.bf16.msra.mxu1 %v9645_v3  ;;  %v9660_v18 = vpack.c.bf16 %v9658_v30, %v9659_v40  ;;  %v9661_v3 = vld [vmem:[#allocation181_spill] sm:$0xff]  ;;  %v9677_v40 = vld [vmem:[#allocation199_spill] sm:$0xff] }
 0x472   : > { %5665 = vmatprep.subr.bf16.mxu1 %v9648_v58  ;;  %v9663_v55 = vpack.c.bf16 %v9661_v3, %v9662_v14  ;;  %v9664_v58 = vld [vmem:[#allocation188_spill] sm:$0xff] }
 0x473   : > { %5279 = vmatpush1.bf16.msra.mxu0 %v9651_v42  ;;  %v9666_v1 = vpack.c.bf16 %v9664_v58, %v9665_v13  ;;  %v9667_v42 = vld [vmem:[#allocation185_spill] sm:$0xff]  ;;  %v9680_v14 = vld [vmem:[#allocation196_spill] sm:$0xff] }
 0x474   : > { %5281 = vmatprep.subr.bf16.mxu0 %v9654_v4  ;;  %v9669_v12 = vpack.c.bf16 %v9667_v42, %v9668_v7  ;;  %v9670_v4 = vld [vmem:[#allocation194_spill] sm:$0xff]  ;;  %v9683_v42 = vld [vmem:[#allocation203_spill] sm:$0xff] }
 0x475   : > { %5667 = vmatpush1.bf16.msra.mxu1 %v9657_v52  ;;  %v9672_v34 = vpack.c.bf16 %v9670_v4, %v9671_v41  ;;  %v9673_v52 = vld [vmem:[#allocation191_spill] sm:$0xff]  ;;  %v9686_v4 = vld [vmem:[#allocation248_spill] sm:$0xff] }
 0x476   : > { %5669 = vmatprep.subr.bf16.mxu1 %v9660_v18  ;;  %v9675_v30 = vpack.c.bf16 %v9673_v52, %v9674_v17  ;;  %v9676_v18 = vld [vmem:[#allocation200_spill] sm:$0xff]  ;;  %v9688_v52 = vld [vmem:[#allocation15_spill] sm:$0xff] }
 0x477   : > { %5283 = vmatpush1.bf16.msra.mxu0 %v9663_v55  ;;  %v9678_v3 = vpack.c.bf16 %v9676_v18, %v9677_v40  ;;  %v9679_v55 = vld [vmem:[#allocation197_spill] sm:$0xff]  ;;  %v9691_v18 = vld [vmem:[#allocation24_spill] sm:$0xff] }
 0x478   : > { %5285 = vmatprep.subr.bf16.mxu0 %v9666_v1  ;;  %v9681_v58 = vpack.c.bf16 %v9679_v55, %v9680_v14  ;;  %v9682_v1 = vld [vmem:[#allocation11_spill] sm:$0xff] }
 0x479   : > { %5671 = vmatpush1.bf16.msra.mxu1 %v9669_v12  ;;  %v9684_v12 = vld [vmem:[#allocation201_spill] sm:$0xff]  ;;  %v9755_v55 = vld [vmem:[#allocation195_spill] sm:$0xff] }
 0x47a   : > { %5673 = vmatprep.subr.bf16.mxu1 %v9672_v34  ;;  %v9685_v7 = vpack.c.bf16 %v9683_v42, %v9684_v12  ;;  %v9687_v34 = vld [vmem:[#allocation17_spill] sm:$0xff]  ;;  %v9694_v42 = vld [vmem:[#allocation30_spill] sm:$0xff]  ;;  %v9696_v12 = vld [vmem:[#allocation35_spill] sm:$0xff] }
 0x47b   : > { %5287 = vmatpush1.bf16.msra.mxu0 %v9675_v30  ;;  %v9689_v30 = vand.u32 4294901760, %v9571_v63  ;;  %v9699_v63 = vld [vmem:[#allocation38_spill] sm:$0xff] }
 0x47c   : > { %5289 = vmatprep.subr.bf16.mxu0 %v9678_v3  ;;  %v9690_v3 = vld [vmem:[#allocation252_spill] sm:$0xff] }
 0x47d   : > { %5675 = vmatpush1.bf16.msra.mxu1 %v9681_v58  ;;  %v9692_v58 = vld [vmem:[#allocation20_spill] sm:$0xff] }
 0x47e   : > { %5677 = vmatprep.subr.bf16.mxu1 %v9682_v1  ;;  %v9693_v1 = vand.u32 4294901760, %v9577_v19  ;;  %v9703_v19 = vld [vmem:[#allocation50_spill] sm:$0xff] }
 0x47f   : > { %5291 = vmatpush1.bf16.msra.mxu0 %v9685_v7  ;;  %v9695_v7 = vld [vmem:[#allocation26_spill] sm:$0xff] }
 0x480   : > { %4243 = vmatmul.mubr.f32.vlgmr.msra.gmra.mrb[4].mxu1 %v9686_v4  ;;  %5293 = vmatprep.subr.bf16.mxu0 %v9687_v34  ;;  %v9697_v34 = vld [vmem:[#allocation33_spill] sm:$0xff] }
 0x481   : > { %5679 = vmatpush1.bf16.msra.mxu1 %v9688_v52  ;;  %4380 = vmatprep.mubr.f32.mxu1 %v9689_v30  ;;  %v9698_v52 = vld [vmem:[#allocation41_spill] sm:$0xff]  ;;  %v9700_v30 = vld [vmem:[#allocation47_spill] sm:$0xff] }
 0x482   : > { %2959 = vmatmul.mubr.f32.vlgmr.msra.gmra.mrb[2].mxu0 %v9690_v3  ;;  %5681 = vmatprep.subr.bf16.mxu1 %v9691_v18  ;;  %v9701_v18 = vld [vmem:[#allocation44_spill] sm:$0xff] }
 0x483   : > { %5295 = vmatpush1.bf16.msra.mxu0 %v9692_v58  ;;  %3096 = vmatprep.mubr.f32.mxu0 %v9693_v1  ;;  %v9702_v58 = vld [vmem:[#allocation53_spill] sm:$0xff]  ;;  %v9704_v1 = vld [vmem:[#allocation59_spill] sm:$0xff] }
 0x484   : > { %5297 = vmatprep.subr.bf16.mxu0 %v9694_v42  ;;  %v9705_v42 = vld [vmem:[#allocation56_spill] sm:$0xff] }
 0x485   : > { %5683 = vmatpush1.bf16.msra.mxu1 %v9695_v7  ;;  %v9706_v7 = vld [vmem:[#allocation65_spill] sm:$0xff] }
 0x486   : > { %5685 = vmatprep.subr.bf16.mxu1 %v9696_v12  ;;  %v9707_v12 = vld [vmem:[#allocation62_spill] sm:$0xff] }
 0x487   : > { %5299 = vmatpush1.bf16.msra.mxu0 %v9697_v34  ;;  %v9708_v34 = vld [vmem:[#allocation71_spill] sm:$0xff] }
 0x488   : > { %5301 = vmatprep.subr.bf16.mxu0 %v9698_v52  ;;  %v9709_v52 = vld [vmem:[#allocation68_spill] sm:$0xff] }
 0x489   : > { %5687 = vmatpush1.bf16.msra.mxu1 %v9699_v63  ;;  %v9710_v63 = vld [vmem:[#allocation77_spill] sm:$0xff] }
 0x48a   : > { %5689 = vmatprep.subr.bf16.mxu1 %v9700_v30  ;;  %v9711_v30 = vld [vmem:[#allocation74_spill] sm:$0xff] }
 0x48b   : > { %5303 = vmatpush1.bf16.msra.mxu0 %v9701_v18  ;;  %v9712_v18 = vld [vmem:[#allocation83_spill] sm:$0xff] }
 0x48c   : > { %5305 = vmatprep.subr.bf16.mxu0 %v9702_v58  ;;  %v9713_v58 = vld [vmem:[#allocation80_spill] sm:$0xff] }
 0x48d   : > { %5691 = vmatpush1.bf16.msra.mxu1 %v9703_v19  ;;  %v9714_v19 = vld [vmem:[#allocation89_spill] sm:$0xff] }
 0x48e   : > { %5693 = vmatprep.subr.bf16.mxu1 %v9704_v1  ;;  %v9715_v1 = vld [vmem:[#allocation86_spill] sm:$0xff] }
 0x48f   : > { %5307 = vmatpush1.bf16.msra.mxu0 %v9705_v42  ;;  %v9716_v42 = vld [vmem:[#allocation95_spill] sm:$0xff] }
 0x490   : > { %5309 = vmatprep.subr.bf16.mxu0 %v9706_v7  ;;  %v9717_v7 = vld [vmem:[#allocation92_spill] sm:$0xff] }
 0x491   : > { %5695 = vmatpush1.bf16.msra.mxu1 %v9707_v12  ;;  %v9718_v12 = vld [vmem:[#allocation101_spill] sm:$0xff] }
 0x492   : > { %5697 = vmatprep.subr.bf16.mxu1 %v9708_v34  ;;  %v9719_v34 = vld [vmem:[#allocation98_spill] sm:$0xff] }
 0x493   : > { %5311 = vmatpush1.bf16.msra.mxu0 %v9709_v52  ;;  %v9720_v52 = vld [vmem:[#allocation107_spill] sm:$0xff] }
 0x494   : > { %5313 = vmatprep.subr.bf16.mxu0 %v9710_v63  ;;  %v9721_v63 = vld [vmem:[#allocation104_spill] sm:$0xff] }
 0x495   : > { %5699 = vmatpush1.bf16.msra.mxu1 %v9711_v30  ;;  %v9722_v30 = vld [vmem:[#allocation113_spill] sm:$0xff] }
 0x496   : > { %5701 = vmatprep.subr.bf16.mxu1 %v9712_v18  ;;  %v9723_v18 = vld [vmem:[#allocation110_spill] sm:$0xff] }
 0x497   : > { %5315 = vmatpush1.bf16.msra.mxu0 %v9713_v58  ;;  %v9724_v58 = vld [vmem:[#allocation119_spill] sm:$0xff] }
 0x498   : > { %5317 = vmatprep.subr.bf16.mxu0 %v9714_v19  ;;  %v9725_v19 = vld [vmem:[#allocation116_spill] sm:$0xff] }
 0x499   : > { %5703 = vmatpush1.bf16.msra.mxu1 %v9715_v1  ;;  %v9726_v1 = vld [vmem:[#allocation125_spill] sm:$0xff] }
 0x49a   : > { %5705 = vmatprep.subr.bf16.mxu1 %v9716_v42  ;;  %v9727_v42 = vld [vmem:[#allocation122_spill] sm:$0xff] }
 0x49b   : > { %5319 = vmatpush1.bf16.msra.mxu0 %v9717_v7  ;;  %v9728_v7 = vld [vmem:[#allocation131_spill] sm:$0xff] }
 0x49c   : > { %5321 = vmatprep.subr.bf16.mxu0 %v9718_v12  ;;  %v9729_v12 = vld [vmem:[#allocation128_spill] sm:$0xff] }
 0x49d   : > { %5707 = vmatpush1.bf16.msra.mxu1 %v9719_v34  ;;  %v9730_v34 = vld [vmem:[#allocation133_spill] sm:$0xff] }
 0x49e   : > { %5709 = vmatprep.subr.bf16.mxu1 %v9720_v52  ;;  %v9731_v52 = vld [vmem:[#allocation132_spill] sm:$0xff] }
 0x49f   : > { %5323 = vmatpush1.bf16.msra.mxu0 %v9721_v63  ;;  %v9732_v63 = vld [vmem:[#allocation135_spill] sm:$0xff] }
 0x4a0   : > { %5325 = vmatprep.subr.bf16.mxu0 %v9722_v30  ;;  %v9733_v30 = vld [vmem:[#allocation134_spill] sm:$0xff] }
 0x4a1   : > { %5711 = vmatpush1.bf16.msra.mxu1 %v9723_v18  ;;  %v9734_v18 = vld [vmem:[#allocation137_spill] sm:$0xff] }
 0x4a2   : > { %5713 = vmatprep.subr.bf16.mxu1 %v9724_v58  ;;  %v9735_v58 = vld [vmem:[#allocation136_spill] sm:$0xff] }
 0x4a3   : > { %5327 = vmatpush1.bf16.msra.mxu0 %v9725_v19  ;;  %v9736_v19 = vld [vmem:[#allocation139_spill] sm:$0xff] }
 0x4a4   : > { %5329 = vmatprep.subr.bf16.mxu0 %v9726_v1  ;;  %v9737_v1 = vld [vmem:[#allocation138_spill] sm:$0xff] }
 0x4a5   : > { %5715 = vmatpush1.bf16.msra.mxu1 %v9727_v42  ;;  %v9738_v42 = vld [vmem:[#allocation142_spill] sm:$0xff] }
 0x4a6   : > { %5717 = vmatprep.subr.bf16.mxu1 %v9728_v7  ;;  %v9739_v7 = vld [vmem:[#allocation141_spill] sm:$0xff] }
 0x4a7   : > { %5331 = vmatpush1.bf16.msra.mxu0 %v9729_v12  ;;  %v9740_v12 = vld [vmem:[#allocation144_spill] sm:$0xff] }
 0x4a8   : > { %5333 = vmatprep.subr.bf16.mxu0 %v9730_v34  ;;  %v9741_v34 = vld [vmem:[#allocation143_spill] sm:$0xff] }
 0x4a9   : > { %5719 = vmatpush1.bf16.msra.mxu1 %v9731_v52  ;;  %v9742_v52 = vld [vmem:[#allocation146_spill] sm:$0xff] }
 0x4aa   : > { %5721 = vmatprep.subr.bf16.mxu1 %v9732_v63  ;;  %v9743_v63 = vld [vmem:[#allocation145_spill] sm:$0xff] }
 0x4ab   : > { %5335 = vmatpush1.bf16.msra.mxu0 %v9733_v30  ;;  %v9744_v30 = vld [vmem:[#allocation148_spill] sm:$0xff] }
 0x4ac   : > { %5337 = vmatprep.subr.bf16.mxu0 %v9734_v18  ;;  %v9745_v18 = vld [vmem:[#allocation147_spill] sm:$0xff] }
 0x4ad   : > { %5723 = vmatpush1.bf16.msra.mxu1 %v9735_v58  ;;  %v9746_v58 = vld [vmem:[#allocation186_spill] sm:$0xff] }
 0x4ae   : > { %5725 = vmatprep.subr.bf16.mxu1 %v9736_v19  ;;  %v9747_v19 = vld [vmem:[#allocation149_spill] sm:$0xff] }
 0x4af   : > { %5339 = vmatpush1.bf16.msra.mxu0 %v9737_v1  ;;  %v9748_v1 = vld [vmem:[#allocation192_spill] sm:$0xff] }
 0x4b0   : > { %5341 = vmatprep.subr.bf16.mxu0 %v9738_v42 }
 0x4b1   : > { %5727 = vmatpush1.bf16.msra.mxu1 %v9739_v7  ;;  %v9749_v7 = vand.u32 4294901760, %v9557_v6  ;;  %v9758_v6 = vand.u32 4294901760, %v9564_v47  ;;  %v9766_v47 = vld [vmem:[#allocation244_spill] sm:$0xff] }
 0x4b2   : > { %5729 = vmatprep.subr.bf16.mxu1 %v9740_v12  ;;  %v9750_v12 = vand.u32 4294901760, %v9558_v38  ;;  %v9759_v38 = vand.u32 4294901760, %v9565_v35  ;;  %v9767_v35 = vand.u32 4294901760, %v9572_v32 }
 0x4b3   : > { %5343 = vmatpush1.bf16.msra.mxu0 %v9741_v34  ;;  %v9751_v34 = vld [vmem:[#allocation189_spill] sm:$0xff] }
 0x4b4   : > { %5345 = vmatprep.subr.bf16.mxu0 %v9742_v52  ;;  %v5740_v42 = vpack.c.bf16 %v9750_v12, %v9749_v7  ;;  %v9752_v52 = vld [vmem:[#allocation198_spill] sm:$0xff]  ;;  %v5744_v12 = vpack.c.bf16 %v9759_v38, %v9758_v6 }
 0x4b5   : > { %5731 = vmatpush1.bf16.msra.mxu1 %v9743_v63  ;;  %v9753_v63 = vand.u32 4294901760, %v9560_v53  ;;  %v9760_v7 = vld [vmem:[#allocation202_spill] sm:$0xff]  ;;  %v9761_v53 = vand.u32 4294901760, %v9566_v59 }
 0x4b6   : > { %5733 = vmatprep.subr.bf16.mxu1 %v9744_v30  ;;  %v9754_v30 = vand.u32 4294901760, %v9561_v39  ;;  %v9762_v39 = vand.u32 4294901760, %v9567_v56  ;;  %v9769_v56 = vand.u32 4294901760, %v9690_v3 }
 0x4b7   : > { %5347 = vmatpush1.bf16.msra.mxu0 %v9745_v18 }
 0x4b8   : > { %5349 = vmatprep.subr.bf16.mxu0 %v9746_v58  ;;  %v5356_v18 = vpack.c.bf16 %v9754_v30, %v9753_v63  ;;  %v5358_v63 = vpack.c.bf16 %v9762_v39, %v9761_v53  ;;  %v9763_v30 = vand.u32 4294901760, %v9686_v4  ;;  %v9770_v4 = vld [vmem:[#allocation36_spill] sm:$0xff]  ;;  %v9777_v53 = vld [vmem:[#allocation34_spill] sm:$0xff] }
 0x4b9   : > { %5735 = vmatpush1.bf16.msra.mxu1 %v9747_v19  ;;  %v9756_v19 = vand.u32 4294901760, %v9562_v11  ;;  %v9764_v11 = vand.u32 4294901760, %v9569_v51  ;;  %v9778_v39 = vand.u32 4294901760, %v9777_v53  ;;  %v9793_v53 = vld [vmem:[#allocation46_spill] sm:$0xff] }
 0x4ba   : > { %5737 = vmatprep.subr.bf16.mxu1 %v9748_v1  ;;  %v9757_v1 = vand.u32 4294901760, %v9563_v43  ;;  %v9765_v43 = vand.u32 4294901760, %v9570_v20  ;;  %v9774_v20 = vld [vmem:[#allocation249_spill] sm:$0xff] }
 0x4bb   : > { %5351 = vmatpush1.bf16.msra.mxu0 %v9751_v34 }
 0x4bc   : > { %5353 = vmatprep.subr.bf16.mxu0 %v9752_v52  ;;  %v5742_v58 = vpack.c.bf16 %v9757_v1, %v9756_v19  ;;  %v9768_v19 = vand.u32 4294901760, %v9573_v33  ;;  %v9771_v1 = vand.u32 4294901760, %v9770_v4  ;;  %v9779_v33 = vld [vmem:[#allocation42_spill] sm:$0xff] }
 0x4bd   : > { %5739 = vmatpush1.bf16.msra.mxu1 %v9755_v55 }
 0x4be   : > { %5741 = vmatprep.subr.bf16.mxu1 %v5740_v42  ;;  %v5360_v42 = vpack.c.bf16 %v9765_v43, %v9764_v11  ;;  %v5746_v59 = vpack.c.bf16 %v9768_v19, %v9767_v35  ;;  %v9781_v11 = vld [vmem:[#allocation43_spill] sm:$0xff]  ;;  %v9785_v19 = vld [vmem:[#allocation40_spill] sm:$0xff] }
 0x4bf   : > { %5355 = vmatpush1.bf16.msra.mxu0 %v9760_v7  ;;  %v9782_v3 = vand.u32 4294901760, %v9781_v11  ;;  %v9797_v11 = vld [vmem:[#allocation55_spill] sm:$0xff] }
 0x4c0   : > { %4384 = vmatmul.mubr.f32.vlgmr.msra.gmra.mrb[4].mxu1 %v9763_v30  ;;  %5357 = vmatprep.subr.bf16.mxu0 %v5356_v18  ;;  %v9772_v18 = vld [vmem:[#allocation37_spill] sm:$0xff]  ;;  %v9780_v30 = vand.u32 4294901760, %v9779_v33 }
 0x4c1   : > { %5743 = vmatpush1.bf16.msra.mxu1 %v5742_v58  ;;  %4647 = vmatprep.mubr.f32.mxu1 %v9766_v47  ;;  %v9773_v6 = vand.u32 4294901760, %v9772_v18  ;;  %v9775_v58 = vld [vmem:[#allocation32_spill] sm:$0xff]  ;;  %v9789_v18 = vld [vmem:[#allocation49_spill] sm:$0xff] }
 0x4c2   : > { %3100 = vmatmul.mubr.f32.vlgmr.msra.gmra.mrb[2].mxu0 %v9769_v56  ;;  %5745 = vmatprep.subr.bf16.mxu1 %v5744_v12  ;;  %v9776_v38 = vand.u32 4294901760, %v9775_v58  ;;  %v5364_v43 = vpack.c.bf16 %v9782_v3, %v9780_v30  ;;  %v9783_v12 = vld [vmem:[#allocation39_spill] sm:$0xff]  ;;  %v9786_v56 = vand.u32 4294901760, %v9785_v19  ;;  %v9795_v30 = vld [vmem:[#allocation54_spill] sm:$0xff]  ;;  %v9798_v3 = vand.u32 4294901760, %v9797_v11  ;;  %v9801_v19 = vld [vmem:[#allocation52_spill] sm:$0xff] }
 0x4c3   : > { %v5748_v51 = vpack.c.bf16 %v9773_v6, %v9771_v1  ;;  %5359 = vmatpush1.bf16.msra.mxu0 %v5358_v63  ;;  %3363 = vmatprep.mubr.f32.mxu0 %v9774_v20  ;;  %v9784_v35 = vand.u32 4294901760, %v9783_v12  ;;  %v9787_v63 = vld [vmem:[#allocation48_spill] sm:$0xff]  ;;  %v9790_v6 = vand.u32 4294901760, %v9789_v18  ;;  %v9805_v18 = vld [vmem:[#allocation61_spill] sm:$0xff]  ;;  %v9813_v11 = vld [vmem:[#allocation67_spill] sm:$0xff] }
 0x4c4   : > { %v5362_v32 = vpack.c.bf16 %v9778_v39, %v9776_v38  ;;  %5361 = vmatprep.subr.bf16.mxu0 %v5360_v42  ;;  %v9788_v1 = vand.u32 4294901760, %v9787_v63  ;;  %v9791_v38 = vld [vmem:[#allocation45_spill] sm:$0xff]  ;;  %v9794_v39 = vand.u32 4294901760, %v9793_v53  ;;  %v9809_v53 = vld [vmem:[#allocation58_spill] sm:$0xff] }
 0x4c5   : > { %5747 = vmatpush1.bf16.msra.mxu1 %v5746_v59  ;;  %v5750_v4 = vpack.c.bf16 %v9786_v56, %v9784_v35  ;;  %v9792_v42 = vand.u32 4294901760, %v9791_v38  ;;  %v9796_v59 = vand.u32 4294901760, %v9795_v30  ;;  %v9799_v35 = vld [vmem:[#allocation51_spill] sm:$0xff]  ;;  %v9802_v56 = vand.u32 4294901760, %v9801_v19  ;;  %v9817_v19 = vld [vmem:[#allocation64_spill] sm:$0xff] }
 0x4c6   : > { %5749 = vmatprep.subr.bf16.mxu1 %v5748_v51  ;;  %v5752_v58 = vpack.c.bf16 %v9790_v6, %v9788_v1  ;;  %v9800_v51 = vand.u32 4294901760, %v9799_v35  ;;  %v9803_v1 = vld [vmem:[#allocation60_spill] sm:$0xff]  ;;  %v9806_v6 = vand.u32 4294901760, %v9805_v18  ;;  %v9821_v18 = vld [vmem:[#allocation73_spill] sm:$0xff] }
 0x4c7   : > { %5363 = vmatpush1.bf16.msra.mxu0 %v5362_v32  ;;  %v5366_v33 = vpack.c.bf16 %v9794_v39, %v9792_v42  ;;  %v5368_v12 = vpack.c.bf16 %v9798_v3, %v9796_v59  ;;  %v9804_v32 = vand.u32 4294901760, %v9803_v1  ;;  %v9807_v42 = vld [vmem:[#allocation57_spill] sm:$0xff]  ;;  %v9810_v39 = vand.u32 4294901760, %v9809_v53  ;;  %v9811_v59 = vld [vmem:[#allocation66_spill] sm:$0xff] }
 0x4c8   : > { %5365 = vmatprep.subr.bf16.mxu0 %v5364_v43  ;;  %v5754_v63 = vpack.c.bf16 %v9802_v56, %v9800_v51  ;;  %v9808_v43 = vand.u32 4294901760, %v9807_v42  ;;  %v9814_v3 = vand.u32 4294901760, %v9813_v11  ;;  %v9815_v51 = vld [vmem:[#allocation63_spill] sm:$0xff]  ;;  %v9818_v56 = vand.u32 4294901760, %v9817_v19  ;;  %v9825_v53 = vld [vmem:[#allocation70_spill] sm:$0xff] }
 0x4c9   : > { %5751 = vmatpush1.bf16.msra.mxu1 %v5750_v4  ;;  %v5756_v38 = vpack.c.bf16 %v9806_v6, %v9804_v32  ;;  %v9812_v4 = vand.u32 4294901760, %v9811_v59  ;;  %v9819_v32 = vld [vmem:[#allocation72_spill] sm:$0xff]  ;;  %v9822_v6 = vand.u32 4294901760, %v9821_v18 }
 0x4ca   : > { %5753 = vmatprep.subr.bf16.mxu1 %v5752_v58  ;;  %v5370_v30 = vpack.c.bf16 %v9810_v39, %v9808_v43  ;;  %v9816_v58 = vand.u32 4294901760, %v9815_v51  ;;  %v9823_v43 = vld [vmem:[#allocation69_spill] sm:$0xff]  ;;  %v9826_v39 = vand.u32 4294901760, %v9825_v53  ;;  %v9830_v51 = vld [vmem:[#allocation75_spill] sm:$0xff] }
 0x4cb   : > { %5367 = vmatpush1.bf16.msra.mxu0 %v5366_v33  ;;  %v5372_v35 = vpack.c.bf16 %v9814_v3, %v9812_v4  ;;  %v9820_v33 = vand.u32 4294901760, %v9819_v32  ;;  %v9828_v4 = vld [vmem:[#allocation79_spill] sm:$0xff]  ;;  %v9834_v32 = vld [vmem:[#allocation84_spill] sm:$0xff] }
 0x4cc   : > { %5369 = vmatprep.subr.bf16.mxu0 %v5368_v12  ;;  %v5758_v1 = vpack.c.bf16 %v9818_v56, %v9816_v58  ;;  %v9824_v12 = vand.u32 4294901760, %v9823_v43  ;;  %v9829_v11 = vand.u32 4294901760, %v9828_v4  ;;  %v9832_v58 = vld [vmem:[#allocation76_spill] sm:$0xff]  ;;  %v9838_v43 = vld [vmem:[#allocation81_spill] sm:$0xff] }
 0x4cd   : > { %5755 = vmatpush1.bf16.msra.mxu1 %v5754_v63  ;;  %v5760_v42 = vpack.c.bf16 %v9822_v6, %v9820_v33  ;;  %v9827_v63 = vand.u32 4294901760, %v9604_v54  ;;  %v9833_v19 = vand.u32 4294901760, %v9832_v58  ;;  %v9836_v33 = vld [vmem:[#allocation85_spill] sm:$0xff] }
 0x4ce   : > { %5757 = vmatprep.subr.bf16.mxu1 %v5756_v38  ;;  %v5374_v59 = vpack.c.bf16 %v9826_v39, %v9824_v12  ;;  %v9831_v38 = vand.u32 4294901760, %v9830_v51  ;;  %v9837_v18 = vand.u32 4294901760, %v9836_v33  ;;  %v9840_v12 = vld [vmem:[#allocation82_spill] sm:$0xff]  ;;  %v9843_v39 = vld [vmem:[#allocation91_spill] sm:$0xff] }
 0x4cf   : > { %5371 = vmatpush1.bf16.msra.mxu0 %v5370_v30  ;;  %v5376_v3 = vpack.c.bf16 %v9829_v11, %v9827_v63  ;;  %v9835_v30 = vand.u32 4294901760, %v9834_v32  ;;  %v9841_v54 = vand.u32 4294901760, %v9840_v12  ;;  %v9844_v63 = vand.u32 4294901760, %v9843_v39 }
 0x4d0   : > { %5373 = vmatprep.subr.bf16.mxu0 %v5372_v35  ;;  %v5762_v56 = vpack.c.bf16 %v9833_v19, %v9831_v38  ;;  %v9839_v35 = vand.u32 4294901760, %v9838_v43  ;;  %v9846_v11 = vand.u32 4294901760, %v9615_v49  ;;  %v9848_v38 = vld [vmem:[#allocation97_spill] sm:$0xff]  ;;  %v9854_v49 = vand.u32 4294901760, %v9621_v15 }
 0x4d1   : > { %5759 = vmatpush1.bf16.msra.mxu1 %v5758_v1  ;;  %v5764_v6 = vpack.c.bf16 %v9837_v18, %v9835_v30  ;;  %v9842_v1 = vand.u32 4294901760, %v9612_v57  ;;  %v9849_v58 = vand.u32 4294901760, %v9848_v38  ;;  %v9851_v57 = vand.u32 4294901760, %v9618_v26  ;;  %v9882_v38 = vld [vmem:[#allocation153_spill] sm:$0xff] }
 0x4d2   : > { %5761 = vmatprep.subr.bf16.mxu1 %v5760_v42  ;;  %v5378_v53 = vpack.c.bf16 %v9841_v54, %v9839_v35  ;;  %v9845_v42 = vand.u32 4294901760, %v9614_v44  ;;  %v9853_v44 = vand.u32 4294901760, %v9620_v62  ;;  %v9856_v18 = vand.u32 4294901760, %v9456_v31 }
 0x4d3   : > { %5375 = vmatpush1.bf16.msra.mxu0 %v5374_v59  ;;  %v5380_v4 = vpack.c.bf16 %v9844_v63, %v9842_v1  ;;  %v9847_v59 = vand.u32 4294901760, %v9616_v60  ;;  %v9855_v60 = vand.u32 4294901760, %v9622_v10  ;;  %v9858_v26 = vand.u32 4294901760, %v9449_v45 }
 0x4d4   : > { %5377 = vmatprep.subr.bf16.mxu0 %v5376_v3  ;;  %v5766_v51 = vpack.c.bf16 %v9846_v11, %v9845_v42  ;;  %v9850_v3 = vand.u32 4294901760, %v9617_v50  ;;  %v9857_v50 = vand.u32 4294901760, %v9462_v0  ;;  %v9860_v62 = vand.u32 4294901760, %v9478_v16  ;;  %v9878_v11 = vld [vmem:[#allocation155_spill] sm:$0xff] }
 0x4d5   : > { %5763 = vmatpush1.bf16.msra.mxu1 %v5762_v56  ;;  %v5768_v19 = vpack.c.bf16 %v9849_v58, %v9847_v59  ;;  %v9852_v56 = vand.u32 4294901760, %v9619_v25  ;;  %v5770_v33 = vpack.c.bf16 %v9855_v60, %v9854_v49  ;;  %v9859_v25 = vand.u32 4294901760, %v9623_v27  ;;  %v9892_v49 = vld [vmem:[#allocation162_spill] sm:$0xff] }
 0x4d6   : > { %5765 = vmatprep.subr.bf16.mxu1 %v5764_v6  ;;  %v5382_v32 = vpack.c.bf16 %v9851_v57, %v9850_v3  ;;  %v5772_v6 = vpack.c.bf16 %v9857_v50, %v9856_v18  ;;  %v9861_v15 = vand.u32 4294901760, %v9480_v36  ;;  %v9862_v10 = vand.u32 4294901760, %v9469_v46  ;;  %v9886_v3 = vld [vmem:[#allocation159_spill] sm:$0xff] }
 0x4d7   : > { %5379 = vmatpush1.bf16.msra.mxu0 %v5378_v53  ;;  %v5384_v30 = vpack.c.bf16 %v9853_v44, %v9852_v56  ;;  %v5386_v43 = vpack.c.bf16 %v9859_v25, %v9858_v26  ;;  %v9863_v31 = vand.u32 4294901760, %v9475_v23  ;;  %v9864_v0 = vand.u32 4294901760, %v9507_v8  ;;  %v9890_v56 = vld [vmem:[#allocation157_spill] sm:$0xff] }
 0x4d8   : > { %5381 = vmatprep.subr.bf16.mxu0 %v5380_v4  ;;  %v5388_v35 = vpack.c.bf16 %v9861_v15, %v9860_v62  ;;  %v9865_v45 = vand.u32 4294901760, %v9508_v37  ;;  %v9866_v27 = vand.u32 4294901760, %v9512_v9  ;;  %v9867_v16 = vand.u32 4294901760, %v9513_v29  ;;  %v9898_v25 = vld [vmem:[#allocation161_spill] sm:$0xff]  ;;  %v9900_v15 = vld [vmem:[#allocation166_spill] sm:$0xff] }
 0x4d9   : > { %5767 = vmatpush1.bf16.msra.mxu1 %v5766_v51  ;;  %v5774_v12 = vpack.c.bf16 %v9863_v31, %v9862_v10  ;;  %v9868_v36 = vand.u32 4294901760, %v9516_v24  ;;  %v9869_v46 = vand.u32 4294901760, %v9517_v61  ;;  %v9870_v23 = vand.u32 4294901760, %v9519_v48  ;;  %v9876_v61 = vld [vmem:[#allocation154_spill] sm:$0xff]  ;;  %v9902_v10 = vld [vmem:[#allocation167_spill] sm:$0xff] }
 0x4da   : > { %5769 = vmatprep.subr.bf16.mxu1 %v5768_v19  ;;  %v5776_v54 = vpack.c.bf16 %v9865_v45, %v9864_v0  ;;  %v5390_v53 = vpack.c.bf16 %v9867_v16, %v9866_v27  ;;  %v9871_v8 = vand.u32 4294901760, %v9520_v28  ;;  %v9872_v37 = vand.u32 4294901760, %v9523_v2  ;;  %v9880_v28 = vld [vmem:[#allocation152_spill] sm:$0xff] }
 0x4db   : > { %5383 = vmatpush1.bf16.msra.mxu0 %v5382_v32  ;;  %v5392_v1 = vpack.c.bf16 %v9869_v46, %v9868_v36  ;;  %v9873_v9 = vand.u32 4294901760, %v9524_v21  ;;  %v9874_v29 = vand.u32 4294901760, %v9527_v22  ;;  %v9875_v24 = vand.u32 4294901760, %v9528_v5  ;;  %v9884_v21 = vld [vmem:[#allocation158_spill] sm:$0xff]  ;;  %v9888_v5 = vld [vmem:[#allocation156_spill] sm:$0xff]  ;;  %v9910_v46 = vld [vmem:[#allocation171_spill] sm:$0xff] }
 0x4dc   : > { %5385 = vmatprep.subr.bf16.mxu0 %v5384_v30  ;;  %v5778_v39 = vpack.c.bf16 %v9871_v8, %v9870_v23  ;;  %v9877_v42 = vand.u32 4294901760, %v9876_v61  ;;  %v9879_v48 = vand.u32 4294901760, %v9878_v11  ;;  %v9881_v59 = vand.u32 4294901760, %v9880_v28  ;;  %v9904_v0 = vld [vmem:[#allocation164_spill] sm:$0xff] }
 0x4dd   : > { %5771 = vmatpush1.bf16.msra.mxu1 %v5770_v33  ;;  %v5780_v63 = vpack.c.bf16 %v9873_v9, %v9872_v37  ;;  %v5394_v4 = vpack.c.bf16 %v9875_v24, %v9874_v29  ;;  %v9883_v2 = vand.u32 4294901760, %v9882_v38  ;;  %v9885_v19 = vand.u32 4294901760, %v9884_v21  ;;  %v9894_v33 = vld [vmem:[#allocation163_spill] sm:$0xff]  ;;  %v9912_v8 = vld [vmem:[#allocation168_spill] sm:$0xff]  ;;  %v9914_v37 = vld [vmem:[#allocation169_spill] sm:$0xff] }
 0x4de   : > { %5773 = vmatprep.subr.bf16.mxu1 %v5772_v6  ;;  %v5396_v51 = vpack.c.bf16 %v9879_v48, %v9877_v42  ;;  %v9887_v22 = vand.u32 4294901760, %v9886_v3  ;;  %v9889_v32 = vand.u32 4294901760, %v9888_v5  ;;  %v9891_v44 = vand.u32 4294901760, %v9890_v56  ;;  %v9896_v6 = vld [vmem:[#allocation160_spill] sm:$0xff]  ;;  %v9916_v29 = vld [vmem:[#allocation174_spill] sm:$0xff] }
 0x4df   : > { %5387 = vmatpush1.bf16.msra.mxu0 %v5386_v43  ;;  %v5782_v58 = vpack.c.bf16 %v9883_v2, %v9881_v59  ;;  %v9893_v60 = vand.u32 4294901760, %v9892_v49  ;;  %v9895_v18 = vand.u32 4294901760, %v9894_v33  ;;  %v9897_v26 = vand.u32 4294901760, %v9896_v6  ;;  %v9920_v11 = vld [vmem:[#allocation172_spill] sm:$0xff]  ;;  %v9924_v38 = vld [vmem:[#allocation178_spill] sm:$0xff] }
 0x4e0   : > { %5389 = vmatprep.subr.bf16.mxu0 %v5388_v35  ;;  %v5784_v57 = vpack.c.bf16 %v9887_v22, %v9885_v19  ;;  %v5398_v30 = vpack.c.bf16 %v9891_v44, %v9889_v32  ;;  %v9899_v43 = vand.u32 4294901760, %v9898_v25  ;;  %v9901_v35 = vand.u32 4294901760, %v9900_v15  ;;  %v9928_v3 = vld [vmem:[#allocation176_spill] sm:$0xff]  ;;  %v9932_v56 = vld [vmem:[#allocation182_spill] sm:$0xff] }
 0x4e1   : > { %5775 = vmatpush1.bf16.msra.mxu1 %v5774_v12  ;;  %v5400_v50 = vpack.c.bf16 %v9895_v18, %v9893_v60  ;;  %v9903_v31 = vand.u32 4294901760, %v9902_v10  ;;  %v9905_v45 = vand.u32 4294901760, %v9904_v0  ;;  %v9915_v9 = vand.u32 4294901760, %v9914_v37  ;;  %v9936_v33 = vld [vmem:[#allocation180_spill] sm:$0xff] }
 0x4e2   : > { %5777 = vmatprep.subr.bf16.mxu1 %v5776_v54  ;;  %v5786_v62 = vpack.c.bf16 %v9899_v43, %v9897_v26  ;;  %v9906_v54 = vld [vmem:[#allocation165_spill] sm:$0xff]  ;;  %v9917_v24 = vand.u32 4294901760, %v9916_v29  ;;  %v9921_v48 = vand.u32 4294901760, %v9920_v11  ;;  %v9925_v2 = vand.u32 4294901760, %v9924_v38  ;;  %v9941_v43 = vld [vmem:[#allocation188_spill] sm:$0xff]  ;;  %v9971_v38 = vld [vmem:[#allocation26_spill] sm:$0xff] }
 0x4e3   : > { %5391 = vmatpush1.bf16.msra.mxu0 %v5390_v53  ;;  %v5788_v12 = vpack.c.bf16 %v9903_v31, %v9901_v35  ;;  %v9907_v27 = vand.u32 4294901760, %v9906_v54  ;;  %v9908_v53 = vld [vmem:[#allocation170_spill] sm:$0xff]  ;;  %v9929_v22 = vand.u32 4294901760, %v9928_v3  ;;  %v9933_v44 = vand.u32 4294901760, %v9932_v56  ;;  %v9943_v35 = vld [vmem:[#allocation184_spill] sm:$0xff]  ;;  %v9945_v31 = vld [vmem:[#allocation185_spill] sm:$0xff] }
 0x4e4   : > { %5393 = vmatprep.subr.bf16.mxu0 %v5392_v1  ;;  %v9909_v36 = vand.u32 4294901760, %v9908_v53  ;;  %v9911_v1 = vand.u32 4294901760, %v9910_v46  ;;  %v9937_v18 = vand.u32 4294901760, %v9936_v33  ;;  %v9940_v25 = vand.u32 4294901760, %v9665_v13  ;;  %v9948_v54 = vld [vmem:[#allocation194_spill] sm:$0xff]  ;;  %v9959_v29 = vld [vmem:[#allocation201_spill] sm:$0xff] }
 0x4e5   : > { %5779 = vmatpush1.bf16.msra.mxu1 %v5778_v39  ;;  %v5402_v16 = vpack.c.bf16 %v9907_v27, %v9905_v45  ;;  %v9913_v39 = vand.u32 4294901760, %v9912_v8  ;;  %v9944_v10 = vand.u32 4294901760, %v9943_v35  ;;  %v9947_v45 = vand.u32 4294901760, %v9671_v41  ;;  %v9965_v11 = vld [vmem:[#allocation17_spill] sm:$0xff]  ;;  %v9977_v3 = vld [vmem:[#allocation44_spill] sm:$0xff]  ;;  %v9983_v56 = vld [vmem:[#allocation62_spill] sm:$0xff] }
 0x4e6   : > { %5781 = vmatprep.subr.bf16.mxu1 %v5780_v63  ;;  %v5404_v23 = vpack.c.bf16 %v9911_v1, %v9909_v36  ;;  %v9949_v27 = vand.u32 4294901760, %v9948_v54  ;;  %v9950_v53 = vand.u32 4294901760, %v9674_v17  ;;  %v9951_v36 = vld [vmem:[#allocation191_spill] sm:$0xff]  ;;  %v9953_v1 = vand.u32 4294901760, %v9677_v40  ;;  %v9997_v35 = vld [vmem:[#allocation104_spill] sm:$0xff]  ;;  %v10003_v54 = vld [vmem:[#allocation122_spill] sm:$0xff] }
 0x4e7   : > { %5395 = vmatpush1.bf16.msra.mxu0 %v5394_v4  ;;  %v5790_v63 = vpack.c.bf16 %v9915_v9, %v9913_v39  ;;  %v9918_v4 = vld [vmem:[#allocation175_spill] sm:$0xff]  ;;  %v9952_v13 = vand.u32 4294901760, %v9951_v36  ;;  %v9956_v37 = vand.u32 4294901760, %v9680_v14  ;;  %v9957_v9 = vld [vmem:[#allocation197_spill] sm:$0xff]  ;;  %v10007_v36 = vld [vmem:[#allocation132_spill] sm:$0xff] }
 0x4e8   : > { %5397 = vmatprep.subr.bf16.mxu0 %v5396_v51  ;;  %v9919_v61 = vand.u32 4294901760, %v9918_v4  ;;  %v9922_v51 = vld [vmem:[#allocation173_spill] sm:$0xff]  ;;  %v9958_v41 = vand.u32 4294901760, %v9957_v9  ;;  %v9961_v17 = vld [vmem:[#allocation203_spill] sm:$0xff] }
 0x4e9   : > { %5783 = vmatpush1.bf16.msra.mxu1 %v5782_v58  ;;  %v9923_v28 = vand.u32 4294901760, %v9922_v51  ;;  %v9926_v58 = vld [vmem:[#allocation179_spill] sm:$0xff]  ;;  %v5414_v46 = vpack.c.bf16 %v9952_v13, %v9950_v53  ;;  %v9962_v4 = vand.u32 4294901760, %v9961_v17  ;;  %v9968_v51 = vld [vmem:[#allocation24_spill] sm:$0xff]  ;;  %v10006_v53 = vld [vmem:[#allocation133_spill] sm:$0xff] }
 0x4ea   : > { %5785 = vmatprep.subr.bf16.mxu1 %v5784_v57  ;;  %v5792_v42 = vpack.c.bf16 %v9919_v61, %v9917_v24  ;;  %v9927_v21 = vand.u32 4294901760, %v9926_v58  ;;  %v9930_v57 = vld [vmem:[#allocation177_spill] sm:$0xff]  ;;  %v9960_v24 = vand.u32 4294901760, %v9959_v29  ;;  %v9964_v40 = vld [vmem:[#allocation243_spill] sm:$0xff]  ;;  %v10018_v29 = vld [vmem:[#allocation146_spill] sm:$0xff] }
 0x4eb   : > { %5399 = vmatpush1.bf16.msra.mxu0 %v5398_v30  ;;  %v5406_v59 = vpack.c.bf16 %v9923_v28, %v9921_v48  ;;  %v9931_v5 = vand.u32 4294901760, %v9930_v57  ;;  %v9934_v30 = vld [vmem:[#allocation183_spill] sm:$0xff]  ;;  %v9967_v48 = vld [vmem:[#allocation246_spill] sm:$0xff]  ;;  %v9969_v28 = vld [vmem:[#allocation20_spill] sm:$0xff] }
 0x4ec   : > { %5401 = vmatprep.subr.bf16.mxu0 %v5400_v50  ;;  %v5408_v19 = vpack.c.bf16 %v9927_v21, %v9925_v2  ;;  %v9935_v49 = vand.u32 4294901760, %v9934_v30  ;;  %v9938_v50 = vld [vmem:[#allocation181_spill] sm:$0xff]  ;;  %v5418_v61 = vpack.c.bf16 %v9962_v4, %v9960_v24  ;;  %v9966_v14 = vld [vmem:[#allocation15_spill] sm:$0xff]  ;;  %v9979_v57 = vld [vmem:[#allocation50_spill] sm:$0xff] }
 0x4ed   : > { %5787 = vmatpush1.bf16.msra.mxu1 %v5786_v62  ;;  %v5794_v32 = vpack.c.bf16 %v9931_v5, %v9929_v22  ;;  %v9939_v6 = vand.u32 4294901760, %v9938_v50  ;;  %v9942_v62 = vand.u32 4294901760, %v9941_v43  ;;  %v9972_v2 = vld [vmem:[#allocation35_spill] sm:$0xff]  ;;  %v9973_v58 = vld [vmem:[#allocation33_spill] sm:$0xff]  ;;  %v9981_v5 = vld [vmem:[#allocation56_spill] sm:$0xff] }
 0x4ee   : > { %5789 = vmatprep.subr.bf16.mxu1 %v5788_v12  ;;  %v5796_v60 = vpack.c.bf16 %v9935_v49, %v9933_v44  ;;  %v9946_v12 = vand.u32 4294901760, %v9945_v31  ;;  %v9974_v21 = vld [vmem:[#allocation41_spill] sm:$0xff]  ;;  %v9984_v44 = vld [vmem:[#allocation71_spill] sm:$0xff]  ;;  %v9985_v30 = vld [vmem:[#allocation68_spill] sm:$0xff] }
 0x4ef   : > { %5403 = vmatpush1.bf16.msra.mxu0 %v5402_v16  ;;  %v5410_v26 = vpack.c.bf16 %v9939_v6, %v9937_v18  ;;  %v5412_v15 = vpack.c.bf16 %v9942_v62, %v9940_v25  ;;  %v5800_v16 = vpack.c.bf16 %v9949_v27, %v9947_v45  ;;  %v9978_v22 = vld [vmem:[#allocation53_spill] sm:$0xff]  ;;  %v9988_v33 = vld [vmem:[#allocation83_spill] sm:$0xff]  ;;  %v9989_v18 = vld [vmem:[#allocation80_spill] sm:$0xff] }
 0x4f0   : > { %5405 = vmatprep.subr.bf16.mxu0 %v5404_v23  ;;  %v5798_v0 = vpack.c.bf16 %v9946_v12, %v9944_v10  ;;  %v9954_v23 = vld [vmem:[#allocation200_spill] sm:$0xff]  ;;  %v9986_v49 = vld [vmem:[#allocation77_spill] sm:$0xff]  ;;  %v9991_v6 = vld [vmem:[#allocation86_spill] sm:$0xff] }
 0x4f1   : > { %5791 = vmatpush1.bf16.msra.mxu1 %v5790_v63  ;;  %v9955_v8 = vand.u32 4294901760, %v9954_v23  ;;  %v5802_v63 = vpack.c.bf16 %v9958_v41, %v9956_v37  ;;  %v9990_v50 = vld [vmem:[#allocation89_spill] sm:$0xff]  ;;  %v9993_v25 = vld [vmem:[#allocation92_spill] sm:$0xff]  ;;  %v9995_v62 = vld [vmem:[#allocation98_spill] sm:$0xff] }
 0x4f2   : > { %5793 = vmatprep.subr.bf16.mxu1 %v5792_v42  ;;  %v9963_v42 = vld [vmem:[#allocation11_spill] sm:$0xff]  ;;  %v9994_v43 = vld [vmem:[#allocation101_spill] sm:$0xff]  ;;  %v9999_v31 = vld [vmem:[#allocation110_spill] sm:$0xff] }
 0x4f3   : > { %5407 = vmatpush1.bf16.msra.mxu0 %v5406_v59  ;;  %v5416_v39 = vpack.c.bf16 %v9955_v8, %v9953_v1  ;;  %v9970_v59 = vld [vmem:[#allocation30_spill] sm:$0xff]  ;;  %v9998_v10 = vld [vmem:[#allocation113_spill] sm:$0xff]  ;;  %v10000_v12 = vld [vmem:[#allocation119_spill] sm:$0xff] }
 0x4f4   : > { %5409 = vmatprep.subr.bf16.mxu0 %v5408_v19  ;;  %v9975_v19 = vld [vmem:[#allocation38_spill] sm:$0xff]  ;;  %v10002_v45 = vld [vmem:[#allocation125_spill] sm:$0xff]  ;;  %v10004_v27 = vld [vmem:[#allocation131_spill] sm:$0xff] }
 0x4f5   : > { %5795 = vmatpush1.bf16.msra.mxu1 %v5794_v32  ;;  %v9982_v32 = vld [vmem:[#allocation65_spill] sm:$0xff]  ;;  %v10008_v13 = vld [vmem:[#allocation135_spill] sm:$0xff]  ;;  %v10011_v23 = vld [vmem:[#allocation136_spill] sm:$0xff] }
 0x4f6   : > { %5797 = vmatprep.subr.bf16.mxu1 %v5796_v60  ;;  %v9987_v60 = vld [vmem:[#allocation74_spill] sm:$0xff]  ;;  %v10010_v1 = vld [vmem:[#allocation137_spill] sm:$0xff]  ;;  %v10012_v8 = vld [vmem:[#allocation139_spill] sm:$0xff] }
 0x4f7   : > { %5411 = vmatpush1.bf16.msra.mxu0 %v5410_v26  ;;  %v9992_v26 = vld [vmem:[#allocation95_spill] sm:$0xff]  ;;  %v10014_v37 = vld [vmem:[#allocation142_spill] sm:$0xff]  ;;  %v10015_v9 = vld [vmem:[#allocation141_spill] sm:$0xff] }
 0x4f8   : > { %5413 = vmatprep.subr.bf16.mxu0 %v5412_v15  ;;  %v9996_v15 = vld [vmem:[#allocation107_spill] sm:$0xff]  ;;  %v10016_v41 = vld [vmem:[#allocation144_spill] sm:$0xff]  ;;  %v10019_v24 = vld [vmem:[#allocation145_spill] sm:$0xff] }
 0x4f9   : > { %5799 = vmatpush1.bf16.msra.mxu1 %v5798_v0  ;;  %v10001_v0 = vld [vmem:[#allocation116_spill] sm:$0xff]  ;;  %v10021_v4 = vld [vmem:[#allocation147_spill] sm:$0xff] }
 0x4fa   : > { %5801 = vmatprep.subr.bf16.mxu1 %v5800_v16  ;;  %v10005_v16 = vld [vmem:[#allocation128_spill] sm:$0xff] }
 0x4fb   : > { %5415 = vmatpush1.bf16.msra.mxu0 %v5414_v46  ;;  %v10009_v46 = vld [vmem:[#allocation134_spill] sm:$0xff]  ;;  %v10020_v17 = vld [vmem:[#allocation148_spill] sm:$0xff] }
 0x4fc   : > { %5417 = vmatprep.subr.bf16.mxu0 %v5416_v39  ;;  %v10013_v39 = vld [vmem:[#allocation138_spill] sm:$0xff] }
 0x4fd   : > { %5803 = vmatpush1.bf16.msra.mxu1 %v5802_v63  ;;  %v10017_v63 = vld [vmem:[#allocation143_spill] sm:$0xff] }
 0x4fe   : > { %5805 = vmatprep.subr.bf16.mxu1 %v9963_v42  ;;  %v10023_v42 = vld [vmem:[#allocation149_spill] sm:$0xff] }
 0x4ff   : > { %5419 = vmatpush1.bf16.msra.mxu0 %v5418_v61  ;;  %v10022_v61 = vld [vmem:[#allocation186_spill] sm:$0xff] }
 0x500   : > { %4649 = vmatmul.mubr.f32.vlgmr.msra.gmra.mrb[4].mxu1 %v9964_v40  ;;  %5421 = vmatprep.subr.bf16.mxu0 %v9965_v11  ;;  %v10024_v11 = vld [vmem:[#allocation192_spill] sm:$0xff] }
 0x501   : > { %5807 = vmatpush1.bf16.msra.mxu1 %v9966_v14  ;;  %4784 = vmatprep.mubr.f32.mxu1 %v9766_v47  ;;  %v9976_v47 = vld [vmem:[#allocation47_spill] sm:$0xff] }
 0x502   : > { %3365 = vmatmul.mubr.f32.vlgmr.msra.gmra.mrb[2].mxu0 %v9967_v48  ;;  %5809 = vmatprep.subr.bf16.mxu1 %v9968_v51 }
 0x503   : > { %5423 = vmatpush1.bf16.msra.mxu0 %v9969_v28  ;;  %3500 = vmatprep.mubr.f32.mxu0 %v9774_v20  ;;  %v9980_v20 = vld [vmem:[#allocation59_spill] sm:$0xff] }
 0x504   : > { %5425 = vmatprep.subr.bf16.mxu0 %v9970_v59 }
 0x505   : > { %5811 = vmatpush1.bf16.msra.mxu1 %v9971_v38 }
 0x506   : > { %5813 = vmatprep.subr.bf16.mxu1 %v9972_v2 }
 0x507   : > { %5427 = vmatpush1.bf16.msra.mxu0 %v9973_v58 }
 0x508   : > { %5429 = vmatprep.subr.bf16.mxu0 %v9974_v21 }
 0x509   : > { %5815 = vmatpush1.bf16.msra.mxu1 %v9975_v19  ;;  %v10025_v19 = vld [vmem:[#allocation140_spill] sm:$0xff] }
 0x50a   : > { %5817 = vmatprep.subr.bf16.mxu1 %v9976_v47 }
 0x50b   : > { %5431 = vmatpush1.bf16.msra.mxu0 %v9977_v3 }
 0x50c   : > { %5433 = vmatprep.subr.bf16.mxu0 %v9978_v22  ;;  %v10026_v22 = vld [vmem:[#allocation236_spill] sm:$0xff] }
 0x50d   : > { %5819 = vmatpush1.bf16.msra.mxu1 %v9979_v57 }
 0x50e   : > { %5821 = vmatprep.subr.bf16.mxu1 %v9980_v20  ;;  %v10027_v20 = vld [vmem:[#allocation237_spill] sm:$0xff] }
 0x50f   : > { %5435 = vmatpush1.bf16.msra.mxu0 %v9981_v5 }
 0x510   : > { %5437 = vmatprep.subr.bf16.mxu0 %v9982_v32 }
 0x511   : > { %5823 = vmatpush1.bf16.msra.mxu1 %v9983_v56 }
 0x512   : > { %5825 = vmatprep.subr.bf16.mxu1 %v9984_v44 }
 0x513   : > { %5439 = vmatpush1.bf16.msra.mxu0 %v9985_v30 }
 0x514   : > { %5441 = vmatprep.subr.bf16.mxu0 %v9986_v49 }
 0x515   : > { %5827 = vmatpush1.bf16.msra.mxu1 %v9987_v60 }
 0x516   : > { %5829 = vmatprep.subr.bf16.mxu1 %v9988_v33 }
 0x517   : > { %5443 = vmatpush1.bf16.msra.mxu0 %v9989_v18 }
 0x518   : > { %5445 = vmatprep.subr.bf16.mxu0 %v9990_v50 }
 0x519   : > { %5831 = vmatpush1.bf16.msra.mxu1 %v9991_v6 }
 0x51a   : > { %5833 = vmatprep.subr.bf16.mxu1 %v9992_v26 }
 0x51b   : > { %5447 = vmatpush1.bf16.msra.mxu0 %v9993_v25 }
 0x51c   : > { %5449 = vmatprep.subr.bf16.mxu0 %v9994_v43 }
 0x51d   : > { %5835 = vmatpush1.bf16.msra.mxu1 %v9995_v62 }
 0x51e   : > { %5837 = vmatprep.subr.bf16.mxu1 %v9996_v15 }
 0x51f   : > { %5451 = vmatpush1.bf16.msra.mxu0 %v9997_v35 }
 0x520   : > { %5453 = vmatprep.subr.bf16.mxu0 %v9998_v10 }
 0x521   : > { %5839 = vmatpush1.bf16.msra.mxu1 %v9999_v31 }
 0x522   : > { %5841 = vmatprep.subr.bf16.mxu1 %v10000_v12 }
 0x523   : > { %5455 = vmatpush1.bf16.msra.mxu0 %v10001_v0 }
 0x524   : > { %5457 = vmatprep.subr.bf16.mxu0 %v10002_v45 }
 0x525   : > { %5843 = vmatpush1.bf16.msra.mxu1 %v10003_v54 }
 0x526   : > { %5845 = vmatprep.subr.bf16.mxu1 %v10004_v27 }
 0x527   : > { %5459 = vmatpush1.bf16.msra.mxu0 %v10005_v16 }
 0x528   : > { %5461 = vmatprep.subr.bf16.mxu0 %v10006_v53 }
 0x529   : > { %5847 = vmatpush1.bf16.msra.mxu1 %v10007_v36 }
 0x52a   : > { %5849 = vmatprep.subr.bf16.mxu1 %v10008_v13 }
 0x52b   : > { %5463 = vmatpush1.bf16.msra.mxu0 %v10009_v46 }
 0x52c   : > { %5465 = vmatprep.subr.bf16.mxu0 %v10010_v1 }
 0x52d   : > { %5851 = vmatpush1.bf16.msra.mxu1 %v10011_v23 }
 0x52e   : > { %5853 = vmatprep.subr.bf16.mxu1 %v10012_v8 }
 0x52f   : > { %5467 = vmatpush1.bf16.msra.mxu0 %v10013_v39 }
 0x530   : > { %5469 = vmatprep.subr.bf16.mxu0 %v10014_v37 }
 0x531   : > { %5855 = vmatpush1.bf16.msra.mxu1 %v10015_v9 }
 0x532   : > { %5857 = vmatprep.subr.bf16.mxu1 %v10016_v41 }
 0x533   : > { %5471 = vmatpush1.bf16.msra.mxu0 %v10017_v63 }
 0x534   : > { %5473 = vmatprep.subr.bf16.mxu0 %v10018_v29 }
 0x535   : > { %5859 = vmatpush1.bf16.msra.mxu1 %v10019_v24 }
 0x536   : > { %5861 = vmatprep.subr.bf16.mxu1 %v10020_v17 }
 0x537   : > { %5475 = vmatpush1.bf16.msra.mxu0 %v10021_v4 }
 0x538   : > { %5477 = vmatprep.subr.bf16.mxu0 %v10022_v61 }
 0x539   : > { %5863 = vmatpush1.bf16.msra.mxu1 %v10023_v42 }
 0x53a   : > { %5865 = vmatprep.subr.bf16.mxu1 %v10024_v11 }
 0x53b   : > { %5479 = vmatpush1.bf16.msra.mxu0 %v9751_v34 }
 0x53c   : > { %5481 = vmatprep.subr.bf16.mxu0 %v9752_v52 }
 0x53d   : > { %5867 = vmatpush1.bf16.msra.mxu1 %v9755_v55 }
 0x53f   : > { %5483 = vmatpush1.bf16.msra.mxu0 %v9760_v7 }
 0x540   : > { %4786 = vmatmul.mubr.f32.vlgmr.msra.gmra.mrb[4].mxu1 %v9964_v40 }
 0x542   : > { %3502 = vmatmul.mubr.f32.vlgmr.msra.gmra.mrb[2].mxu0 %v9967_v48 }
 0x613   : > { %v4787_v14 = vpop.f32.mrb[4].mxu1 }
 0x614   : > { %v4789_v51 = vpop.f32.mrb[5].mxu1 }
 0x615   : > { %v3503_v28 = vpop.f32.mrb[2].mxu0 }
 0x616   : > { %v5868_v59 = vadd.f32 %v4787_v14, %v3503_v28  ;;  %v3505_v38 = vpop.f32.mrb[3].mxu0 }
 0x617   : > { %v5869_v2 = vadd.f32 %v4789_v51, %v3505_v38 }
 0x618   : > { %v4923_v58 = vmul.f32 -1.442695, %v5868_v59 }
 0x619   : > { %v4924_v34 = vmul.f32 -1.442695, %v5869_v2 }
 0x61a   : > { %5997 = vpow2.f32 %v4923_v58 }
 0x61b   : > { %5999 = vpow2.f32 %v4924_v34 }
 0x624   : > { %v5998_v52 = vpop.eup %5997 }
 0x625   : > { %v6000_v55 = vpop.eup %5999  ;;  %v4798_v21 = vadd.f32 1.0, %v5998_v52 }
 0x626   : > { %v4799_v7 = vadd.f32 1.0, %v6000_v55 }
 0x627   : > { %6001 = vrcp.f32 %v4798_v21 }
 0x628   : > { %6003 = vrcp.f32 %v4799_v7 }
 0x631   : > { %v6002_v40 = vpop.eup %6001 }
 0x632   : > { %v6004_v48 = vpop.eup %6003  ;;  %v4807_v47 = vrot.slane %v6002_v40, %v10025_v19 }
 0x633   : > { %v4811_v3 = vrot.slane %v6004_v48, %v10025_v19 }
 0x634   : > { %v4812_v57 = vmul.f32 %v4807_v47, %v10026_v22 }
 0x635   : > { %v4813_v5 = vmul.f32 %v4811_v3, %v10027_v20 }
 0x636   : > { %4814 = vst [vmem:[%s228_s10] sm:$0xff] %v4812_v57 }
 0x637   : > { %4815 = vst [vmem:[%s228_s10 + $0x8] sm:$0xff] %v4813_v5 }
 0x638   : > { %6078 = shalt.err (!%p6075_p7)
}
 0x639   : > { %s6079_s25 = scalar_lea.hbm %s8521_s5, 256  ;;  %s6083_s23 = scalar_lea.hbm %s8569_s4, 512 }
 0x63a   : > { %p6080_p9 = scmp.ne.s32.totalorder %s8521_s5, %s6079_s25  ;;  %p6084_p0 = scmp.lt.u32.totalorder %s8521_s5, %s8569_s4 }
 0x63b   : > { %p6085_p11 = scmp.lt.u32.totalorder %s6083_s23, %s6079_s25  ;;  %p6087_p4 = scmp.lt.u32.totalorder %s6079_s25, %s8521_s5 }
 0x63c   : > { %p6081_p2 = pnand %p6080_p9, %p6260_p12 }
 0x63d   : > { %p6086_p1 = por %p6085_p11, %p6084_p0 }
 0x63e   : > { %p6082_p5 = pneg %p6081_p2 }
 0x63f   : > { %p6088_p6 = por %p6087_p4, %p6086_p1 }
 0x641   : > { %p6089_p8 = pnand %p6088_p6, %p6082_p5 }
 0x643   : > { %6092 = shalt.err (!%p6089_p8)
}
 0x644   : > { %5938 = dma.vmem_to_hbm [thread:$0]  (%p6260_p12), %s8523_s14, 256, %s8521_s5, %s4817_s19  }
 0x645 PF: > { %s4843_s28 = sand.u32 1, %s6123_s15   ;;  %p10028_p10 = scmp.ne.s32.totalorder %s9024_s22, 0 }
 0x646   : > { %p10029_p13 = scmp.ge.s32.totalorder %s6135_s18, 2  ;;  %s4844_s29 = scalar_lea.sflag [#allocation4], %s4843_s28 }
 0x648   : > { %p5949_p3 = pnand %p10029_p13, %p10028_p10 }
 0x64a   : > { %6118 = dma.done.wait (!%p5949_p3), %s4844_s29, 256  }
 0x64b   : > { %6120 = vsyncadd (!%p5949_p3), %s4844_s29, 4294967040  ;;  %p18_p7 = scmp.ge.s32.totalorder %s6225_s27, 4   ;;  %s10030_s15 = smov %s6127_s16 }
 0x64c   : > { %s10031_s16 = smov %s6131_s17  ;;  %s10032_s17 = smov %s6256_s24 }
 0x64d   : > { %s10033_s18 = smov %s6225_s27  ;;  %20 = sbr.rel (!%p18_p7) target bundleno = 6 (0x6), region = 86 }
 0x654   :  { %4849 = vsyncpa [#allocation3], 1 }
 0x655   :  { %4851 = vsyncpa [#allocation3 + $0x1], 1 }
 0x656   :  { %4852 = vsyncpa [#allocation6], 1 }
 0x657   :  { %4853 = vsyncpa [#allocation4], 1 }
 0x658   :  { %4855 = vsyncpa [#allocation4 + $0x1], 1 }

</bundles_post_ra>
